<compile_context>
chip_gen: v7x
topology: tpu7x:2x2x1
jax: 0.10.0
libtpu: 0.0.40
codegen_flags: <defaults>
</compile_context>

<pallas_src>
import functools
import math

import jax
import jax.numpy as jnp
from jax.experimental import pallas as pl
from jax.experimental.pallas import tpu as pltpu


# ----------------------------- in-kernel helpers -----------------------------

def _layernorm(x, gamma, beta, eps=1e-5):
    # x: (N, C); gamma/beta: (1, C); all f32
    mean = jnp.mean(x, axis=-1, keepdims=True)
    var = jnp.mean((x - mean) ** 2, axis=-1, keepdims=True)
    return (x - mean) * jax.lax.rsqrt(var + eps) * gamma + beta


def _gelu_exact(x):
    # nn.GELU() default = exact erf-based GELU
    return 0.5 * x * (1.0 + jax.lax.erf(x * (1.0 / math.sqrt(2.0))))


def _softmax_last(s):
    # numerically-stable softmax along the last axis, EUP-friendly reciprocal
    m = jnp.max(s, axis=-1, keepdims=True)
    e = jnp.exp(s - m)
    denom = jnp.sum(e, axis=-1, keepdims=True)
    return e * pl.reciprocal(denom, approx=True)


# ------------------------------- fused kernel --------------------------------

def part_block_kernel(x1_ref, x2_ref, x3_ref,
                      ln3_ref,        # (9, 2, C3) f32   gamma/beta of norm3_xy
                      attn_w_ref,     # (3, 4, C3, C3) bf16   [wq*scale, wk, wv, wp]
                      attn_bp_ref,    # (3, 1, C3) f32   proj bias
                      n2_ref,         # (2, DIM) f32     norm2 gamma/beta
                      w1_ref,         # (DIM, HID) bf16
                      b1_ref,         # (1, HID) f32
                      w2_ref,         # (HID, DIM) bf16
                      b2_ref,         # (1, DIM) f32
                      out_ref,        # (1, N, DIM) f32
                      *, num_heads):
    N = x1_ref.shape[1]
    C3 = x1_ref.shape[2]
    H = num_heads
    D = C3 // H
    bf16 = jnp.bfloat16

    x1 = x1_ref[0]                                   # (N, C3) f32
    x2 = x2_ref[0]
    x3 = x3_ref[0]

    def ln3(x, idx):
        gb = ln3_ref[idx]                            # (2, C3)
        return _layernorm(x, gb[0:1, :], gb[1:2, :])

    def attention(a_idx, ln_base, xq, xk, xv, x_res):
        # q from xq, k from xk, v from xv (matching Part_Attention.forward)
        qin = ln3(xq, ln_base + 0).astype(bf16)
        kin = ln3(xk, ln_base + 1).astype(bf16)
        vin = ln3(xv, ln_base + 2).astype(bf16)

        wq = attn_w_ref[a_idx, 0]                    # (C3, C3) bf16, scale folded in
        wk = attn_w_ref[a_idx, 1]
        wv = attn_w_ref[a_idx, 2]
        wp = attn_w_ref[a_idx, 3]
        bp = attn_bp_ref[a_idx]                      # (1, C3) f32

        q = jnp.dot(qin, wq, preferred_element_type=jnp.float32)   # (N, C3) f32
        k = jnp.dot(kin, wk, preferred_element_type=jnp.float32)
        v = jnp.dot(vin, wv, preferred_element_type=jnp.float32)

        # Head-batched attention: one dot_general over a head axis instead of
        # a per-head loop of tiny (N, D) matmuls + lane slices + concat.
        q3 = q.reshape(N, H, D).astype(bf16)
        k3 = k.reshape(N, H, D).astype(bf16)
        v3 = v.reshape(N, H, D).astype(bf16)

        scores = jnp.einsum('nhd,mhd->hnm', q3, k3,
                            preferred_element_type=jnp.float32)    # (H, N, N) f32
        probs = _softmax_last(scores)                               # f32
        o = jnp.einsum('hnm,mhd->nhd', probs.astype(bf16), v3,
                       preferred_element_type=jnp.float32)          # (N, H, D) f32
        o = o.reshape(N, C3).astype(bf16)

        proj = jnp.dot(o, wp, preferred_element_type=jnp.float32) + bp
        return x_res + proj                                         # (N, C3) f32

    # Sequential dependency exactly as in Part_Block.forward
    x1 = attention(0, 0, x2, x3, x1, x1)   # attn_1(norm3_11(x2), norm3_12(x3), norm3_13(x1))
    x2 = attention(1, 3, x1, x3, x2, x2)   # attn_2(norm3_21(x1), norm3_22(x3), norm3_23(x2))
    x3 = attention(2, 6, x1, x2, x3, x3)   # attn_3(norm3_31(x1), norm3_32(x2), norm3_33(x3))

    # concat -> LayerNorm -> MLP -> residual, all in VMEM
    x = jnp.concatenate([x1, x2, x3], axis=-1)                      # (N, DIM) f32
    h = _layernorm(x, n2_ref[0:1, :], n2_ref[1:2, :])
    h = jnp.dot(h.astype(bf16), w1_ref[...],
                preferred_element_type=jnp.float32) + b1_ref[...]
    h = _gelu_exact(h)
    h = jnp.dot(h.astype(bf16), w2_ref[...],
                preferred_element_type=jnp.float32) + b2_ref[...]

    out_ref[0] = x + h                                              # lane-dense (N, DIM) store


# ------------------------------- host wrappers --------------------------------

def prepare_params(p, *, num_heads):
    """Pack raw f32 params into a few stacked tensors; fold the attention scale
    into Wq; pre-cast matmul weights to bf16 (halves weight DMA bytes)."""
    c3 = p["attn_1"][0].shape[0]
    head_dim = c3 // num_heads
    scale = head_dim ** (-0.5)

    ln_names = ["norm3_11", "norm3_12", "norm3_13",
                "norm3_21", "norm3_22", "norm3_23",
                "norm3_31", "norm3_32", "norm3_33"]
    ln3 = jnp.stack([jnp.concatenate([p[n][0], p[n][1]], axis=0)   # (2, C3)
                     for n in ln_names], axis=0)                   # (9, 2, C3)

    def pack_attn(w):
        wq, wk, wv, wp, _ = w
        return jnp.stack([wq * scale, wk, wv, wp], axis=0)         # (4, C3, C3)

    attn_w = jnp.stack([pack_attn(p["attn_1"]),
                        pack_attn(p["attn_2"]),
                        pack_attn(p["attn_3"])], axis=0).astype(jnp.bfloat16)
    attn_bp = jnp.stack([p["attn_1"][4], p["attn_2"][4], p["attn_3"][4]],
                        axis=0)                                    # (3, 1, C3) f32

    n2 = jnp.concatenate([p["norm2"][0], p["norm2"][1]], axis=0)   # (2, DIM)
    w1, b1, w2, b2 = p["mlp"]
    return dict(ln3=ln3, attn_w=attn_w, attn_bp=attn_bp, n2=n2,
                w1=w1.astype(jnp.bfloat16), b1=b1,
                w2=w2.astype(jnp.bfloat16), b2=b2)


def part_block_forward(x_1, x_2, x_3, packed, *, num_heads):
    B, N, c3 = x_1.shape
    dim = 3 * c3

    def const_spec(a):
        shp = a.shape
        return pl.BlockSpec(shp, lambda b, _s=shp: (0,) * len(_s))

    seq_spec = pl.BlockSpec((1, N, c3), lambda b: (b, 0, 0))
    out_spec = pl.BlockSpec((1, N, dim), lambda b: (b, 0, 0))

    kernel = functools.partial(part_block_kernel, num_heads=num_heads)

    x = pl.pallas_call(
        kernel,
        out_shape=jax.ShapeDtypeStruct((B, N, dim), jnp.float32),
        grid=(B,),
        in_specs=[seq_spec, seq_spec, seq_spec,
                  const_spec(packed["ln3"]), const_spec(packed["attn_w"]),
                  const_spec(packed["attn_bp"]), const_spec(packed["n2"]),
                  const_spec(packed["w1"]), const_spec(packed["b1"]),
                  const_spec(packed["w2"]), const_spec(packed["b2"])],
        out_specs=out_spec,
        compiler_params=pltpu.CompilerParams(
            dimension_semantics=("parallel",),     # v7x: 2 TCs split the batch
            vmem_limit_bytes=64 * 1024 * 1024),
    )(x_1, x_2, x_3,
      packed["ln3"], packed["attn_w"], packed["attn_bp"], packed["n2"],
      packed["w1"], packed["b1"], packed["w2"], packed["b2"])

    return x[:, :, :c3], x[:, :, c3:2 * c3], x[:, :, 2 * c3:]


# -------------------------- pure-JAX f32 reference -----------------------------

def _ref_attn_block(x_res, x_q, x_k, x_v, ln_q, ln_k, ln_v, attn_params,
                    *, num_heads):
    B, N, C = x_res.shape
    D = C // num_heads
    scale = D ** (-0.5)
    wq, wk, wv, wp, bp = attn_params
    q = _layernorm(x_q, ln_q[0], ln_q[1]) @ wq
    k = _layernorm(x_k, ln_k[0], ln_k[1]) @ wk
    v = _layernorm(x_v, ln_v[0], ln_v[1]) @ wv
    q = q.reshape(B, N, num_heads, D).transpose(0, 2, 1, 3)
    k = k.reshape(B, N, num_heads, D).transpose(0, 2, 1, 3)
    v = v.reshape(B, N, num_heads, D).transpose(0, 2, 1, 3)
    attn = jax.nn.softmax((q @ jnp.swapaxes(k, -2, -1)) * scale, axis=-1)
    o = (attn @ v).transpose(0, 2, 1, 3).reshape(B, N, C)
    return x_res + (o @ wp + bp)


def _ref_forward(x_1, x_2, x_3, p, *, num_heads):
    x_1 = _ref_attn_block(x_1, x_2, x_3, x_1, p["norm3_11"], p["norm3_12"],
                          p["norm3_13"], p["attn_1"], num_heads=num_heads)
    x_2 = _ref_attn_block(x_2, x_1, x_3, x_2, p["norm3_21"], p["norm3_22"],
                          p["norm3_23"], p["attn_2"], num_heads=num_heads)
    x_3 = _ref_attn_block(x_3, x_1, x_2, x_3, p["norm3_31"], p["norm3_32"],
                          p["norm3_33"], p["attn_3"], num_heads=num_heads)
    x = jnp.concatenate([x_1, x_2, x_3], axis=2)
    w1, b1, w2, b2 = p["mlp"]
    h = _layernorm(x, p["norm2"][0], p["norm2"][1])
    h = _gelu_exact(h @ w1 + b1) @ w2 + b2
    x = x + h
    c3 = x.shape[2] // 3
    return x[:, :, :c3], x[:, :, c3:2 * c3], x[:, :, 2 * c3:]


# ----------------------------------- main --------------------------------------

def make_params(key, dim, num_heads, mlp_hidden_dim):
    c3 = dim // 3
    keys = iter(jax.random.split(key, 64))

    def ln_params(c):
        g = 1.0 + 0.1 * jax.random.normal(next(keys), (1, c), jnp.float32)
        b = 0.1 * jax.random.normal(next(keys), (1, c), jnp.float32)
        return (g, b)

    def attn_params(c):
        wq = 0.05 * jax.random.normal(next(keys), (c, c), jnp.float32)
        wk = 0.05 * jax.random.normal(next(keys), (c, c), jnp.float32)
        wv = 0.05 * jax.random.normal(next(keys), (c, c), jnp.float32)
        wp = 0.05 * jax.random.normal(next(keys), (c, c), jnp.float32)
        bp = 0.05 * jax.random.normal(next(keys), (1, c), jnp.float32)
        return (wq, wk, wv, wp, bp)

    params = {}
    for name in ["norm3_11", "norm3_12", "norm3_13",
                 "norm3_21", "norm3_22", "norm3_23",
                 "norm3_31", "norm3_32", "norm3_33"]:
        params[name] = ln_params(c3)
    params["attn_1"] = attn_params(c3)
    params["attn_2"] = attn_params(c3)
    params["attn_3"] = attn_params(c3)
    params["norm2"] = ln_params(dim)
    params["mlp"] = (
        0.05 * jax.random.normal(next(keys), (dim, mlp_hidden_dim), jnp.float32),
        0.05 * jax.random.normal(next(keys), (1, mlp_hidden_dim), jnp.float32),
        0.05 * jax.random.normal(next(keys), (mlp_hidden_dim, dim), jnp.float32),
        0.05 * jax.random.normal(next(keys), (1, dim), jnp.float32),
    )
    return params


if __name__ == "__main__":
    B, N = 2, 8
    dim, num_heads, mlp_hidden_dim = 96, 4, 64   # dim//3 = 32, head_dim = 8
    c3 = dim // 3

    key = jax.random.PRNGKey(0)
    k1, k2, k3, kp = jax.random.split(key, 4)
    x_1 = jax.random.normal(k1, (B, N, c3), jnp.float32)
    x_2 = jax.random.normal(k2, (B, N, c3), jnp.float32)
    x_3 = jax.random.normal(k3, (B, N, c3), jnp.float32)
    params = make_params(kp, dim, num_heads, mlp_hidden_dim)

    packed = prepare_params(params, num_heads=num_heads)
    y1, y2, y3 = part_block_forward(x_1, x_2, x_3, packed, num_heads=num_heads)
    jax.block_until_ready((y1, y2, y3))

    # f32 reference; kernel uses bf16 matmul inputs with f32 accumulation and an
    # approximate reciprocal in softmax, so compare with a relaxed tolerance.
    r1, r2, r3 = _ref_forward(x_1, x_2, x_3, params, num_heads=num_heads)
    for a, b in zip((y1, y2, y3), (r1, r2, r3)):
        assert a.shape == (B, N, c3)
        assert jnp.allclose(a, b, rtol=3e-2, atol=3e-2), "mismatch vs JAX reference"

    print("KERNEL_OK")
</pallas_src>

<mosaic_0001>
module attributes {stable_mosaic.version = 11 : i64} {
  func.func @part_block_kernel(%arg0: i32, %arg1: memref<1x8x32xf32, #tpu.memory_space<vmem>>, %arg2: memref<1x8x32xf32, #tpu.memory_space<vmem>>, %arg3: memref<1x8x32xf32, #tpu.memory_space<vmem>>, %arg4: memref<9x2x32xf32, #tpu.memory_space<vmem>>, %arg5: memref<3x4x32x32xbf16, #tpu.memory_space<vmem>>, %arg6: memref<3x1x32xf32, #tpu.memory_space<vmem>>, %arg7: memref<2x96xf32, #tpu.memory_space<vmem>>, %arg8: memref<96x64xbf16, #tpu.memory_space<vmem>>, %arg9: memref<1x64xf32, #tpu.memory_space<vmem>>, %arg10: memref<64x96xbf16, #tpu.memory_space<vmem>>, %arg11: memref<1x96xf32, #tpu.memory_space<vmem>>, %arg12: memref<1x8x96xf32, #tpu.memory_space<vmem>>) attributes {dimension_semantics = [#tpu.dimension_semantics<parallel>], iteration_bounds = array<i64: 2>, scalar_prefetch = 0 : i64, scratch_operands = 0 : i64, tpu.core_type = #tpu.core_type<tc>, window_params = [{transform_indices = @transform_0, window_bounds = array<i64: 1, 8, 32>}, {transform_indices = @transform_1, window_bounds = array<i64: 1, 8, 32>}, {transform_indices = @transform_2, window_bounds = array<i64: 1, 8, 32>}, {pipeline_mode = #tpu.pipeline_mode<synchronous>, transform_indices = @transform_3, window_bounds = array<i64: 9, 2, 32>}, {pipeline_mode = #tpu.pipeline_mode<synchronous>, transform_indices = @transform_4, window_bounds = array<i64: 3, 4, 32, 32>}, {pipeline_mode = #tpu.pipeline_mode<synchronous>, transform_indices = @transform_5, window_bounds = array<i64: 3, 1, 32>}, {pipeline_mode = #tpu.pipeline_mode<synchronous>, transform_indices = @transform_6, window_bounds = array<i64: 2, 96>}, {pipeline_mode = #tpu.pipeline_mode<synchronous>, transform_indices = @transform_7, window_bounds = array<i64: 96, 64>}, {pipeline_mode = #tpu.pipeline_mode<synchronous>, transform_indices = @transform_8, window_bounds = array<i64: 1, 64>}, {pipeline_mode = #tpu.pipeline_mode<synchronous>, transform_indices = @transform_9, window_bounds = array<i64: 64, 96>}, {pipeline_mode = #tpu.pipeline_mode<synchronous>, transform_indices = @transform_10, window_bounds = array<i64: 1, 96>}, {transform_indices = @transform_11, window_bounds = array<i64: 1, 8, 96>}]} {
    %c0 = arith.constant 0 : index
    %c0_0 = arith.constant 0 : index
    %c0_1 = arith.constant 0 : index
    %0 = vector.load %arg1[%c0, %c0_0, %c0_1] : memref<1x8x32xf32, #tpu.memory_space<vmem>>, vector<1x8x32xf32>
    %1 = vector.shape_cast %0 : vector<1x8x32xf32> to vector<8x32xf32>
    %c0_2 = arith.constant 0 : index
    %c0_3 = arith.constant 0 : index
    %c0_4 = arith.constant 0 : index
    %2 = vector.load %arg2[%c0_2, %c0_3, %c0_4] : memref<1x8x32xf32, #tpu.memory_space<vmem>>, vector<1x8x32xf32>
    %3 = vector.shape_cast %2 : vector<1x8x32xf32> to vector<8x32xf32>
    %c0_5 = arith.constant 0 : index
    %c0_6 = arith.constant 0 : index
    %c0_7 = arith.constant 0 : index
    %4 = vector.load %arg3[%c0_5, %c0_6, %c0_7] : memref<1x8x32xf32, #tpu.memory_space<vmem>>, vector<1x8x32xf32>
    %5 = vector.shape_cast %4 : vector<1x8x32xf32> to vector<8x32xf32>
    %c0_8 = arith.constant 0 : index
    %c0_9 = arith.constant 0 : index
    %c0_10 = arith.constant 0 : index
    %6 = vector.load %arg4[%c0_8, %c0_9, %c0_10] : memref<9x2x32xf32, #tpu.memory_space<vmem>>, vector<1x2x32xf32>
    %7 = vector.shape_cast %6 : vector<1x2x32xf32> to vector<2x32xf32>
    %8 = vector.extract_strided_slice %7 {offsets = [0, 0], sizes = [1, 32], strides = [1, 1]} : vector<2x32xf32> to vector<1x32xf32>
    %9 = vector.extract_strided_slice %7 {offsets = [1, 0], sizes = [1, 32], strides = [1, 1]} : vector<2x32xf32> to vector<1x32xf32>
    %cst = arith.constant dense<0.000000e+00> : vector<8xf32>
    %10 = vector.multi_reduction <add>, %3, %cst [1] : vector<8x32xf32> to vector<8xf32>
    %11 = vector.shape_cast %10 : vector<8xf32> to vector<8x1xf32>
    %cst_11 = arith.constant 3.200000e+01 : f32
    %12 = vector.broadcast %cst_11 : f32 to vector<8x1xf32>
    %13 = arith.divf %11, %12 : vector<8x1xf32>
    %14 = vector.broadcast %13 : vector<8x1xf32> to vector<8x32xf32>
    %15 = arith.subf %3, %14 : vector<8x32xf32>
    %16 = arith.mulf %15, %15 : vector<8x32xf32>
    %cst_12 = arith.constant dense<0.000000e+00> : vector<8xf32>
    %17 = vector.multi_reduction <add>, %16, %cst_12 [1] : vector<8x32xf32> to vector<8xf32>
    %18 = vector.shape_cast %17 : vector<8xf32> to vector<8x1xf32>
    %cst_13 = arith.constant 3.200000e+01 : f32
    %19 = vector.broadcast %cst_13 : f32 to vector<8x1xf32>
    %20 = arith.divf %18, %19 : vector<8x1xf32>
    %21 = vector.broadcast %13 : vector<8x1xf32> to vector<8x32xf32>
    %22 = arith.subf %3, %21 : vector<8x32xf32>
    %cst_14 = arith.constant 9.99999974E-6 : f32
    %23 = vector.broadcast %cst_14 : f32 to vector<8x1xf32>
    %24 = arith.addf %20, %23 : vector<8x1xf32>
    %25 = math.rsqrt %24 : vector<8x1xf32>
    %26 = vector.broadcast %25 : vector<8x1xf32> to vector<8x32xf32>
    %27 = arith.mulf %22, %26 : vector<8x32xf32>
    %28 = vector.broadcast %8 : vector<1x32xf32> to vector<8x32xf32>
    %29 = arith.mulf %27, %28 : vector<8x32xf32>
    %30 = vector.broadcast %9 : vector<1x32xf32> to vector<8x32xf32>
    %31 = arith.addf %29, %30 : vector<8x32xf32>
    %32 = arith.truncf %31 : vector<8x32xf32> to vector<8x32xbf16>
    %c1 = arith.constant 1 : index
    %c0_15 = arith.constant 0 : index
    %c0_16 = arith.constant 0 : index
    %33 = vector.load %arg4[%c1, %c0_15, %c0_16] : memref<9x2x32xf32, #tpu.memory_space<vmem>>, vector<1x2x32xf32>
    %34 = vector.shape_cast %33 : vector<1x2x32xf32> to vector<2x32xf32>
    %35 = vector.extract_strided_slice %34 {offsets = [0, 0], sizes = [1, 32], strides = [1, 1]} : vector<2x32xf32> to vector<1x32xf32>
    %36 = vector.extract_strided_slice %34 {offsets = [1, 0], sizes = [1, 32], strides = [1, 1]} : vector<2x32xf32> to vector<1x32xf32>
    %cst_17 = arith.constant dense<0.000000e+00> : vector<8xf32>
    %37 = vector.multi_reduction <add>, %5, %cst_17 [1] : vector<8x32xf32> to vector<8xf32>
    %38 = vector.shape_cast %37 : vector<8xf32> to vector<8x1xf32>
    %cst_18 = arith.constant 3.200000e+01 : f32
    %39 = vector.broadcast %cst_18 : f32 to vector<8x1xf32>
    %40 = arith.divf %38, %39 : vector<8x1xf32>
    %41 = vector.broadcast %40 : vector<8x1xf32> to vector<8x32xf32>
    %42 = arith.subf %5, %41 : vector<8x32xf32>
    %43 = arith.mulf %42, %42 : vector<8x32xf32>
    %cst_19 = arith.constant dense<0.000000e+00> : vector<8xf32>
    %44 = vector.multi_reduction <add>, %43, %cst_19 [1] : vector<8x32xf32> to vector<8xf32>
    %45 = vector.shape_cast %44 : vector<8xf32> to vector<8x1xf32>
    %cst_20 = arith.constant 3.200000e+01 : f32
    %46 = vector.broadcast %cst_20 : f32 to vector<8x1xf32>
    %47 = arith.divf %45, %46 : vector<8x1xf32>
    %48 = vector.broadcast %40 : vector<8x1xf32> to vector<8x32xf32>
    %49 = arith.subf %5, %48 : vector<8x32xf32>
    %cst_21 = arith.constant 9.99999974E-6 : f32
    %50 = vector.broadcast %cst_21 : f32 to vector<8x1xf32>
    %51 = arith.addf %47, %50 : vector<8x1xf32>
    %52 = math.rsqrt %51 : vector<8x1xf32>
    %53 = vector.broadcast %52 : vector<8x1xf32> to vector<8x32xf32>
    %54 = arith.mulf %49, %53 : vector<8x32xf32>
    %55 = vector.broadcast %35 : vector<1x32xf32> to vector<8x32xf32>
    %56 = arith.mulf %54, %55 : vector<8x32xf32>
    %57 = vector.broadcast %36 : vector<1x32xf32> to vector<8x32xf32>
    %58 = arith.addf %56, %57 : vector<8x32xf32>
    %59 = arith.truncf %58 : vector<8x32xf32> to vector<8x32xbf16>
    %c2 = arith.constant 2 : index
    %c0_22 = arith.constant 0 : index
    %c0_23 = arith.constant 0 : index
    %60 = vector.load %arg4[%c2, %c0_22, %c0_23] : memref<9x2x32xf32, #tpu.memory_space<vmem>>, vector<1x2x32xf32>
    %61 = vector.shape_cast %60 : vector<1x2x32xf32> to vector<2x32xf32>
    %62 = vector.extract_strided_slice %61 {offsets = [0, 0], sizes = [1, 32], strides = [1, 1]} : vector<2x32xf32> to vector<1x32xf32>
    %63 = vector.extract_strided_slice %61 {offsets = [1, 0], sizes = [1, 32], strides = [1, 1]} : vector<2x32xf32> to vector<1x32xf32>
    %cst_24 = arith.constant dense<0.000000e+00> : vector<8xf32>
    %64 = vector.multi_reduction <add>, %1, %cst_24 [1] : vector<8x32xf32> to vector<8xf32>
    %65 = vector.shape_cast %64 : vector<8xf32> to vector<8x1xf32>
    %cst_25 = arith.constant 3.200000e+01 : f32
    %66 = vector.broadcast %cst_25 : f32 to vector<8x1xf32>
    %67 = arith.divf %65, %66 : vector<8x1xf32>
    %68 = vector.broadcast %67 : vector<8x1xf32> to vector<8x32xf32>
    %69 = arith.subf %1, %68 : vector<8x32xf32>
    %70 = arith.mulf %69, %69 : vector<8x32xf32>
    %cst_26 = arith.constant dense<0.000000e+00> : vector<8xf32>
    %71 = vector.multi_reduction <add>, %70, %cst_26 [1] : vector<8x32xf32> to vector<8xf32>
    %72 = vector.shape_cast %71 : vector<8xf32> to vector<8x1xf32>
    %cst_27 = arith.constant 3.200000e+01 : f32
    %73 = vector.broadcast %cst_27 : f32 to vector<8x1xf32>
    %74 = arith.divf %72, %73 : vector<8x1xf32>
    %75 = vector.broadcast %67 : vector<8x1xf32> to vector<8x32xf32>
    %76 = arith.subf %1, %75 : vector<8x32xf32>
    %cst_28 = arith.constant 9.99999974E-6 : f32
    %77 = vector.broadcast %cst_28 : f32 to vector<8x1xf32>
    %78 = arith.addf %74, %77 : vector<8x1xf32>
    %79 = math.rsqrt %78 : vector<8x1xf32>
    %80 = vector.broadcast %79 : vector<8x1xf32> to vector<8x32xf32>
    %81 = arith.mulf %76, %80 : vector<8x32xf32>
    %82 = vector.broadcast %62 : vector<1x32xf32> to vector<8x32xf32>
    %83 = arith.mulf %81, %82 : vector<8x32xf32>
    %84 = vector.broadcast %63 : vector<1x32xf32> to vector<8x32xf32>
    %85 = arith.addf %83, %84 : vector<8x32xf32>
    %86 = arith.truncf %85 : vector<8x32xf32> to vector<8x32xbf16>
    %c0_29 = arith.constant 0 : index
    %c0_30 = arith.constant 0 : index
    %c0_31 = arith.constant 0 : index
    %c0_32 = arith.constant 0 : index
    %87 = vector.load %arg5[%c0_29, %c0_30, %c0_31, %c0_32] : memref<3x4x32x32xbf16, #tpu.memory_space<vmem>>, vector<1x1x32x32xbf16>
    %88 = vector.shape_cast %87 : vector<1x1x32x32xbf16> to vector<32x32xbf16>
    %c0_33 = arith.constant 0 : index
    %c1_34 = arith.constant 1 : index
    %c0_35 = arith.constant 0 : index
    %c0_36 = arith.constant 0 : index
    %89 = vector.load %arg5[%c0_33, %c1_34, %c0_35, %c0_36] : memref<3x4x32x32xbf16, #tpu.memory_space<vmem>>, vector<1x1x32x32xbf16>
    %90 = vector.shape_cast %89 : vector<1x1x32x32xbf16> to vector<32x32xbf16>
    %c0_37 = arith.constant 0 : index
    %c2_38 = arith.constant 2 : index
    %c0_39 = arith.constant 0 : index
    %c0_40 = arith.constant 0 : index
    %91 = vector.load %arg5[%c0_37, %c2_38, %c0_39, %c0_40] : memref<3x4x32x32xbf16, #tpu.memory_space<vmem>>, vector<1x1x32x32xbf16>
    %92 = vector.shape_cast %91 : vector<1x1x32x32xbf16> to vector<32x32xbf16>
    %c0_41 = arith.constant 0 : index
    %c3 = arith.constant 3 : index
    %c0_42 = arith.constant 0 : index
    %c0_43 = arith.constant 0 : index
    %93 = vector.load %arg5[%c0_41, %c3, %c0_42, %c0_43] : memref<3x4x32x32xbf16, #tpu.memory_space<vmem>>, vector<1x1x32x32xbf16>
    %94 = vector.shape_cast %93 : vector<1x1x32x32xbf16> to vector<32x32xbf16>
    %c0_44 = arith.constant 0 : index
    %c0_45 = arith.constant 0 : index
    %c0_46 = arith.constant 0 : index
    %95 = vector.load %arg6[%c0_44, %c0_45, %c0_46] : memref<3x1x32xf32, #tpu.memory_space<vmem>>, vector<1x1x32xf32>
    %96 = vector.shape_cast %95 : vector<1x1x32xf32> to vector<1x32xf32>
    %cst_47 = arith.constant dense<0.000000e+00> : vector<8x32xf32>
    %97 = tpu.matmul %32, %88, %cst_47 {dimension_numbers = #tpu.dot_dimension_numbers<[1], [0], [0], [1], [0, 0, 1, 1], [], []>} : vector<8x32xbf16>, vector<32x32xbf16>, vector<8x32xf32> -> vector<8x32xf32>
    %cst_48 = arith.constant dense<0.000000e+00> : vector<8x32xf32>
    %98 = tpu.matmul %59, %90, %cst_48 {dimension_numbers = #tpu.dot_dimension_numbers<[1], [0], [0], [1], [0, 0, 1, 1], [], []>} : vector<8x32xbf16>, vector<32x32xbf16>, vector<8x32xf32> -> vector<8x32xf32>
    %cst_49 = arith.constant dense<0.000000e+00> : vector<8x32xf32>
    %99 = tpu.matmul %86, %92, %cst_49 {dimension_numbers = #tpu.dot_dimension_numbers<[1], [0], [0], [1], [0, 0, 1, 1], [], []>} : vector<8x32xbf16>, vector<32x32xbf16>, vector<8x32xf32> -> vector<8x32xf32>
    %100 = vector.shape_cast %97 : vector<8x32xf32> to vector<8x4x8xf32>
    %101 = arith.truncf %100 : vector<8x4x8xf32> to vector<8x4x8xbf16>
    %102 = vector.shape_cast %98 : vector<8x32xf32> to vector<8x4x8xf32>
    %103 = arith.truncf %102 : vector<8x4x8xf32> to vector<8x4x8xbf16>
    %104 = vector.shape_cast %99 : vector<8x32xf32> to vector<8x4x8xf32>
    %105 = arith.truncf %104 : vector<8x4x8xf32> to vector<8x4x8xbf16>
    "tpu.trace_start"() <{level = 10 : i32, message = "nhd,mhd->hnm"}> : () -> ()
    %cst_50 = arith.constant dense<0.000000e+00> : vector<4x8x8xf32>
    %106 = tpu.matmul %101, %103, %cst_50 {dimension_numbers = #tpu.dot_dimension_numbers<[2], [2], [0], [0], [0, 1, 0, 0, 1, 0], [1], [1]>} : vector<8x4x8xbf16>, vector<8x4x8xbf16>, vector<4x8x8xf32> -> vector<4x8x8xf32>
    "tpu.trace_stop"() : () -> ()
    %cst_51 = arith.constant dense<0xFF800000> : vector<4x8xf32>
    %107 = vector.multi_reduction <maximumf>, %106, %cst_51 [2] : vector<4x8x8xf32> to vector<4x8xf32>
    %108 = vector.shape_cast %107 : vector<4x8xf32> to vector<4x8x1xf32>
    %109 = vector.broadcast %108 : vector<4x8x1xf32> to vector<4x8x8xf32>
    %110 = arith.subf %106, %109 : vector<4x8x8xf32>
    %111 = math.exp %110 : vector<4x8x8xf32>
    %cst_52 = arith.constant dense<0.000000e+00> : vector<4x8xf32>
    %112 = vector.multi_reduction <add>, %111, %cst_52 [2] : vector<4x8x8xf32> to vector<4x8xf32>
    %113 = vector.shape_cast %112 : vector<4x8xf32> to vector<4x8x1xf32>
    %114 = tpu.reciprocal %113 {approx = true} : vector<4x8x1xf32> -> vector<4x8x1xf32>
    %115 = vector.broadcast %114 : vector<4x8x1xf32> to vector<4x8x8xf32>
    %116 = arith.mulf %111, %115 : vector<4x8x8xf32>
    %117 = arith.truncf %116 : vector<4x8x8xf32> to vector<4x8x8xbf16>
    "tpu.trace_start"() <{level = 10 : i32, message = "hnm,mhd->nhd"}> : () -> ()
    %cst_53 = arith.constant dense<0.000000e+00> : vector<4x8x8xf32>
    %118 = tpu.matmul %105, %117, %cst_53 {dimension_numbers = #tpu.dot_dimension_numbers<[0], [2], [2], [1], [0, 1, 0, 2, 1, 1], [1], [0]>} : vector<8x4x8xbf16>, vector<4x8x8xbf16>, vector<4x8x8xf32> -> vector<4x8x8xf32>
    %119 = tpu.transpose %118, [2, 0, 1] : vector<4x8x8xf32> -> vector<8x4x8xf32>
    "tpu.trace_stop"() : () -> ()
    %120 = vector.shape_cast %119 : vector<8x4x8xf32> to vector<8x32xf32>
    %121 = arith.truncf %120 : vector<8x32xf32> to vector<8x32xbf16>
    %cst_54 = arith.constant dense<0.000000e+00> : vector<8x32xf32>
    %122 = tpu.matmul %121, %94, %cst_54 {dimension_numbers = #tpu.dot_dimension_numbers<[1], [0], [0], [1], [0, 0, 1, 1], [], []>} : vector<8x32xbf16>, vector<32x32xbf16>, vector<8x32xf32> -> vector<8x32xf32>
    %123 = vector.broadcast %96 : vector<1x32xf32> to vector<8x32xf32>
    %124 = arith.addf %122, %123 : vector<8x32xf32>
    %125 = arith.addf %1, %124 : vector<8x32xf32>
    %c3_55 = arith.constant 3 : index
    %c0_56 = arith.constant 0 : index
    %c0_57 = arith.constant 0 : index
    %126 = vector.load %arg4[%c3_55, %c0_56, %c0_57] : memref<9x2x32xf32, #tpu.memory_space<vmem>>, vector<1x2x32xf32>
    %127 = vector.shape_cast %126 : vector<1x2x32xf32> to vector<2x32xf32>
    %128 = vector.extract_strided_slice %127 {offsets = [0, 0], sizes = [1, 32], strides = [1, 1]} : vector<2x32xf32> to vector<1x32xf32>
    %129 = vector.extract_strided_slice %127 {offsets = [1, 0], sizes = [1, 32], strides = [1, 1]} : vector<2x32xf32> to vector<1x32xf32>
    %cst_58 = arith.constant dense<0.000000e+00> : vector<8xf32>
    %130 = vector.multi_reduction <add>, %125, %cst_58 [1] : vector<8x32xf32> to vector<8xf32>
    %131 = vector.shape_cast %130 : vector<8xf32> to vector<8x1xf32>
    %cst_59 = arith.constant 3.200000e+01 : f32
    %132 = vector.broadcast %cst_59 : f32 to vector<8x1xf32>
    %133 = arith.divf %131, %132 : vector<8x1xf32>
    %134 = vector.broadcast %133 : vector<8x1xf32> to vector<8x32xf32>
    %135 = arith.subf %125, %134 : vector<8x32xf32>
    %136 = arith.mulf %135, %135 : vector<8x32xf32>
    %cst_60 = arith.constant dense<0.000000e+00> : vector<8xf32>
    %137 = vector.multi_reduction <add>, %136, %cst_60 [1] : vector<8x32xf32> to vector<8xf32>
    %138 = vector.shape_cast %137 : vector<8xf32> to vector<8x1xf32>
    %cst_61 = arith.constant 3.200000e+01 : f32
    %139 = vector.broadcast %cst_61 : f32 to vector<8x1xf32>
    %140 = arith.divf %138, %139 : vector<8x1xf32>
    %141 = vector.broadcast %133 : vector<8x1xf32> to vector<8x32xf32>
    %142 = arith.subf %125, %141 : vector<8x32xf32>
    %cst_62 = arith.constant 9.99999974E-6 : f32
    %143 = vector.broadcast %cst_62 : f32 to vector<8x1xf32>
    %144 = arith.addf %140, %143 : vector<8x1xf32>
    %145 = math.rsqrt %144 : vector<8x1xf32>
    %146 = vector.broadcast %145 : vector<8x1xf32> to vector<8x32xf32>
    %147 = arith.mulf %142, %146 : vector<8x32xf32>
    %148 = vector.broadcast %128 : vector<1x32xf32> to vector<8x32xf32>
    %149 = arith.mulf %147, %148 : vector<8x32xf32>
    %150 = vector.broadcast %129 : vector<1x32xf32> to vector<8x32xf32>
    %151 = arith.addf %149, %150 : vector<8x32xf32>
    %152 = arith.truncf %151 : vector<8x32xf32> to vector<8x32xbf16>
    %c4 = arith.constant 4 : index
    %c0_63 = arith.constant 0 : index
    %c0_64 = arith.constant 0 : index
    %153 = vector.load %arg4[%c4, %c0_63, %c0_64] : memref<9x2x32xf32, #tpu.memory_space<vmem>>, vector<1x2x32xf32>
    %154 = vector.shape_cast %153 : vector<1x2x32xf32> to vector<2x32xf32>
    %155 = vector.extract_strided_slice %154 {offsets = [0, 0], sizes = [1, 32], strides = [1, 1]} : vector<2x32xf32> to vector<1x32xf32>
    %156 = vector.extract_strided_slice %154 {offsets = [1, 0], sizes = [1, 32], strides = [1, 1]} : vector<2x32xf32> to vector<1x32xf32>
    %cst_65 = arith.constant dense<0.000000e+00> : vector<8xf32>
    %157 = vector.multi_reduction <add>, %5, %cst_65 [1] : vector<8x32xf32> to vector<8xf32>
    %158 = vector.shape_cast %157 : vector<8xf32> to vector<8x1xf32>
    %cst_66 = arith.constant 3.200000e+01 : f32
    %159 = vector.broadcast %cst_66 : f32 to vector<8x1xf32>
    %160 = arith.divf %158, %159 : vector<8x1xf32>
    %161 = vector.broadcast %160 : vector<8x1xf32> to vector<8x32xf32>
    %162 = arith.subf %5, %161 : vector<8x32xf32>
    %163 = arith.mulf %162, %162 : vector<8x32xf32>
    %cst_67 = arith.constant dense<0.000000e+00> : vector<8xf32>
    %164 = vector.multi_reduction <add>, %163, %cst_67 [1] : vector<8x32xf32> to vector<8xf32>
    %165 = vector.shape_cast %164 : vector<8xf32> to vector<8x1xf32>
    %cst_68 = arith.constant 3.200000e+01 : f32
    %166 = vector.broadcast %cst_68 : f32 to vector<8x1xf32>
    %167 = arith.divf %165, %166 : vector<8x1xf32>
    %168 = vector.broadcast %160 : vector<8x1xf32> to vector<8x32xf32>
    %169 = arith.subf %5, %168 : vector<8x32xf32>
    %cst_69 = arith.constant 9.99999974E-6 : f32
    %170 = vector.broadcast %cst_69 : f32 to vector<8x1xf32>
    %171 = arith.addf %167, %170 : vector<8x1xf32>
    %172 = math.rsqrt %171 : vector<8x1xf32>
    %173 = vector.broadcast %172 : vector<8x1xf32> to vector<8x32xf32>
    %174 = arith.mulf %169, %173 : vector<8x32xf32>
    %175 = vector.broadcast %155 : vector<1x32xf32> to vector<8x32xf32>
    %176 = arith.mulf %174, %175 : vector<8x32xf32>
    %177 = vector.broadcast %156 : vector<1x32xf32> to vector<8x32xf32>
    %178 = arith.addf %176, %177 : vector<8x32xf32>
    %179 = arith.truncf %178 : vector<8x32xf32> to vector<8x32xbf16>
    %c5 = arith.constant 5 : index
    %c0_70 = arith.constant 0 : index
    %c0_71 = arith.constant 0 : index
    %180 = vector.load %arg4[%c5, %c0_70, %c0_71] : memref<9x2x32xf32, #tpu.memory_space<vmem>>, vector<1x2x32xf32>
    %181 = vector.shape_cast %180 : vector<1x2x32xf32> to vector<2x32xf32>
    %182 = vector.extract_strided_slice %181 {offsets = [0, 0], sizes = [1, 32], strides = [1, 1]} : vector<2x32xf32> to vector<1x32xf32>
    %183 = vector.extract_strided_slice %181 {offsets = [1, 0], sizes = [1, 32], strides = [1, 1]} : vector<2x32xf32> to vector<1x32xf32>
    %cst_72 = arith.constant dense<0.000000e+00> : vector<8xf32>
    %184 = vector.multi_reduction <add>, %3, %cst_72 [1] : vector<8x32xf32> to vector<8xf32>
    %185 = vector.shape_cast %184 : vector<8xf32> to vector<8x1xf32>
    %cst_73 = arith.constant 3.200000e+01 : f32
    %186 = vector.broadcast %cst_73 : f32 to vector<8x1xf32>
    %187 = arith.divf %185, %186 : vector<8x1xf32>
    %188 = vector.broadcast %187 : vector<8x1xf32> to vector<8x32xf32>
    %189 = arith.subf %3, %188 : vector<8x32xf32>
    %190 = arith.mulf %189, %189 : vector<8x32xf32>
    %cst_74 = arith.constant dense<0.000000e+00> : vector<8xf32>
    %191 = vector.multi_reduction <add>, %190, %cst_74 [1] : vector<8x32xf32> to vector<8xf32>
    %192 = vector.shape_cast %191 : vector<8xf32> to vector<8x1xf32>
    %cst_75 = arith.constant 3.200000e+01 : f32
    %193 = vector.broadcast %cst_75 : f32 to vector<8x1xf32>
    %194 = arith.divf %192, %193 : vector<8x1xf32>
    %195 = vector.broadcast %187 : vector<8x1xf32> to vector<8x32xf32>
    %196 = arith.subf %3, %195 : vector<8x32xf32>
    %cst_76 = arith.constant 9.99999974E-6 : f32
    %197 = vector.broadcast %cst_76 : f32 to vector<8x1xf32>
    %198 = arith.addf %194, %197 : vector<8x1xf32>
    %199 = math.rsqrt %198 : vector<8x1xf32>
    %200 = vector.broadcast %199 : vector<8x1xf32> to vector<8x32xf32>
    %201 = arith.mulf %196, %200 : vector<8x32xf32>
    %202 = vector.broadcast %182 : vector<1x32xf32> to vector<8x32xf32>
    %203 = arith.mulf %201, %202 : vector<8x32xf32>
    %204 = vector.broadcast %183 : vector<1x32xf32> to vector<8x32xf32>
    %205 = arith.addf %203, %204 : vector<8x32xf32>
    %206 = arith.truncf %205 : vector<8x32xf32> to vector<8x32xbf16>
    %c1_77 = arith.constant 1 : index
    %c0_78 = arith.constant 0 : index
    %c0_79 = arith.constant 0 : index
    %c0_80 = arith.constant 0 : index
    %207 = vector.load %arg5[%c1_77, %c0_78, %c0_79, %c0_80] : memref<3x4x32x32xbf16, #tpu.memory_space<vmem>>, vector<1x1x32x32xbf16>
    %208 = vector.shape_cast %207 : vector<1x1x32x32xbf16> to vector<32x32xbf16>
    %c1_81 = arith.constant 1 : index
    %c1_82 = arith.constant 1 : index
    %c0_83 = arith.constant 0 : index
    %c0_84 = arith.constant 0 : index
    %209 = vector.load %arg5[%c1_81, %c1_82, %c0_83, %c0_84] : memref<3x4x32x32xbf16, #tpu.memory_space<vmem>>, vector<1x1x32x32xbf16>
    %210 = vector.shape_cast %209 : vector<1x1x32x32xbf16> to vector<32x32xbf16>
    %c1_85 = arith.constant 1 : index
    %c2_86 = arith.constant 2 : index
    %c0_87 = arith.constant 0 : index
    %c0_88 = arith.constant 0 : index
    %211 = vector.load %arg5[%c1_85, %c2_86, %c0_87, %c0_88] : memref<3x4x32x32xbf16, #tpu.memory_space<vmem>>, vector<1x1x32x32xbf16>
    %212 = vector.shape_cast %211 : vector<1x1x32x32xbf16> to vector<32x32xbf16>
    %c1_89 = arith.constant 1 : index
    %c3_90 = arith.constant 3 : index
    %c0_91 = arith.constant 0 : index
    %c0_92 = arith.constant 0 : index
    %213 = vector.load %arg5[%c1_89, %c3_90, %c0_91, %c0_92] : memref<3x4x32x32xbf16, #tpu.memory_space<vmem>>, vector<1x1x32x32xbf16>
    %214 = vector.shape_cast %213 : vector<1x1x32x32xbf16> to vector<32x32xbf16>
    %c1_93 = arith.constant 1 : index
    %c0_94 = arith.constant 0 : index
    %c0_95 = arith.constant 0 : index
    %215 = vector.load %arg6[%c1_93, %c0_94, %c0_95] : memref<3x1x32xf32, #tpu.memory_space<vmem>>, vector<1x1x32xf32>
    %216 = vector.shape_cast %215 : vector<1x1x32xf32> to vector<1x32xf32>
    %cst_96 = arith.constant dense<0.000000e+00> : vector<8x32xf32>
    %217 = tpu.matmul %152, %208, %cst_96 {dimension_numbers = #tpu.dot_dimension_numbers<[1], [0], [0], [1], [0, 0, 1, 1], [], []>} : vector<8x32xbf16>, vector<32x32xbf16>, vector<8x32xf32> -> vector<8x32xf32>
    %cst_97 = arith.constant dense<0.000000e+00> : vector<8x32xf32>
    %218 = tpu.matmul %179, %210, %cst_97 {dimension_numbers = #tpu.dot_dimension_numbers<[1], [0], [0], [1], [0, 0, 1, 1], [], []>} : vector<8x32xbf16>, vector<32x32xbf16>, vector<8x32xf32> -> vector<8x32xf32>
    %cst_98 = arith.constant dense<0.000000e+00> : vector<8x32xf32>
    %219 = tpu.matmul %206, %212, %cst_98 {dimension_numbers = #tpu.dot_dimension_numbers<[1], [0], [0], [1], [0, 0, 1, 1], [], []>} : vector<8x32xbf16>, vector<32x32xbf16>, vector<8x32xf32> -> vector<8x32xf32>
    %220 = vector.shape_cast %217 : vector<8x32xf32> to vector<8x4x8xf32>
    %221 = arith.truncf %220 : vector<8x4x8xf32> to vector<8x4x8xbf16>
    %222 = vector.shape_cast %218 : vector<8x32xf32> to vector<8x4x8xf32>
    %223 = arith.truncf %222 : vector<8x4x8xf32> to vector<8x4x8xbf16>
    %224 = vector.shape_cast %219 : vector<8x32xf32> to vector<8x4x8xf32>
    %225 = arith.truncf %224 : vector<8x4x8xf32> to vector<8x4x8xbf16>
    "tpu.trace_start"() <{level = 10 : i32, message = "nhd,mhd->hnm"}> : () -> ()
    %cst_99 = arith.constant dense<0.000000e+00> : vector<4x8x8xf32>
    %226 = tpu.matmul %221, %223, %cst_99 {dimension_numbers = #tpu.dot_dimension_numbers<[2], [2], [0], [0], [0, 1, 0, 0, 1, 0], [1], [1]>} : vector<8x4x8xbf16>, vector<8x4x8xbf16>, vector<4x8x8xf32> -> vector<4x8x8xf32>
    "tpu.trace_stop"() : () -> ()
    %cst_100 = arith.constant dense<0xFF800000> : vector<4x8xf32>
    %227 = vector.multi_reduction <maximumf>, %226, %cst_100 [2] : vector<4x8x8xf32> to vector<4x8xf32>
    %228 = vector.shape_cast %227 : vector<4x8xf32> to vector<4x8x1xf32>
    %229 = vector.broadcast %228 : vector<4x8x1xf32> to vector<4x8x8xf32>
    %230 = arith.subf %226, %229 : vector<4x8x8xf32>
    %231 = math.exp %230 : vector<4x8x8xf32>
    %cst_101 = arith.constant dense<0.000000e+00> : vector<4x8xf32>
    %232 = vector.multi_reduction <add>, %231, %cst_101 [2] : vector<4x8x8xf32> to vector<4x8xf32>
    %233 = vector.shape_cast %232 : vector<4x8xf32> to vector<4x8x1xf32>
    %234 = tpu.reciprocal %233 {approx = true} : vector<4x8x1xf32> -> vector<4x8x1xf32>
    %235 = vector.broadcast %234 : vector<4x8x1xf32> to vector<4x8x8xf32>
    %236 = arith.mulf %231, %235 : vector<4x8x8xf32>
    %237 = arith.truncf %236 : vector<4x8x8xf32> to vector<4x8x8xbf16>
    "tpu.trace_start"() <{level = 10 : i32, message = "hnm,mhd->nhd"}> : () -> ()
    %cst_102 = arith.constant dense<0.000000e+00> : vector<4x8x8xf32>
    %238 = tpu.matmul %225, %237, %cst_102 {dimension_numbers = #tpu.dot_dimension_numbers<[0], [2], [2], [1], [0, 1, 0, 2, 1, 1], [1], [0]>} : vector<8x4x8xbf16>, vector<4x8x8xbf16>, vector<4x8x8xf32> -> vector<4x8x8xf32>
    %239 = tpu.transpose %238, [2, 0, 1] : vector<4x8x8xf32> -> vector<8x4x8xf32>
    "tpu.trace_stop"() : () -> ()
    %240 = vector.shape_cast %239 : vector<8x4x8xf32> to vector<8x32xf32>
    %241 = arith.truncf %240 : vector<8x32xf32> to vector<8x32xbf16>
    %cst_103 = arith.constant dense<0.000000e+00> : vector<8x32xf32>
    %242 = tpu.matmul %241, %214, %cst_103 {dimension_numbers = #tpu.dot_dimension_numbers<[1], [0], [0], [1], [0, 0, 1, 1], [], []>} : vector<8x32xbf16>, vector<32x32xbf16>, vector<8x32xf32> -> vector<8x32xf32>
    %243 = vector.broadcast %216 : vector<1x32xf32> to vector<8x32xf32>
    %244 = arith.addf %242, %243 : vector<8x32xf32>
    %245 = arith.addf %3, %244 : vector<8x32xf32>
    %c6 = arith.constant 6 : index
    %c0_104 = arith.constant 0 : index
    %c0_105 = arith.constant 0 : index
    %246 = vector.load %arg4[%c6, %c0_104, %c0_105] : memref<9x2x32xf32, #tpu.memory_space<vmem>>, vector<1x2x32xf32>
    %247 = vector.shape_cast %246 : vector<1x2x32xf32> to vector<2x32xf32>
    %248 = vector.extract_strided_slice %247 {offsets = [0, 0], sizes = [1, 32], strides = [1, 1]} : vector<2x32xf32> to vector<1x32xf32>
    %249 = vector.extract_strided_slice %247 {offsets = [1, 0], sizes = [1, 32], strides = [1, 1]} : vector<2x32xf32> to vector<1x32xf32>
    %cst_106 = arith.constant dense<0.000000e+00> : vector<8xf32>
    %250 = vector.multi_reduction <add>, %125, %cst_106 [1] : vector<8x32xf32> to vector<8xf32>
    %251 = vector.shape_cast %250 : vector<8xf32> to vector<8x1xf32>
    %cst_107 = arith.constant 3.200000e+01 : f32
    %252 = vector.broadcast %cst_107 : f32 to vector<8x1xf32>
    %253 = arith.divf %251, %252 : vector<8x1xf32>
    %254 = vector.broadcast %253 : vector<8x1xf32> to vector<8x32xf32>
    %255 = arith.subf %125, %254 : vector<8x32xf32>
    %256 = arith.mulf %255, %255 : vector<8x32xf32>
    %cst_108 = arith.constant dense<0.000000e+00> : vector<8xf32>
    %257 = vector.multi_reduction <add>, %256, %cst_108 [1] : vector<8x32xf32> to vector<8xf32>
    %258 = vector.shape_cast %257 : vector<8xf32> to vector<8x1xf32>
    %cst_109 = arith.constant 3.200000e+01 : f32
    %259 = vector.broadcast %cst_109 : f32 to vector<8x1xf32>
    %260 = arith.divf %258, %259 : vector<8x1xf32>
    %261 = vector.broadcast %253 : vector<8x1xf32> to vector<8x32xf32>
    %262 = arith.subf %125, %261 : vector<8x32xf32>
    %cst_110 = arith.constant 9.99999974E-6 : f32
    %263 = vector.broadcast %cst_110 : f32 to vector<8x1xf32>
    %264 = arith.addf %260, %263 : vector<8x1xf32>
    %265 = math.rsqrt %264 : vector<8x1xf32>
    %266 = vector.broadcast %265 : vector<8x1xf32> to vector<8x32xf32>
    %267 = arith.mulf %262, %266 : vector<8x32xf32>
    %268 = vector.broadcast %248 : vector<1x32xf32> to vector<8x32xf32>
    %269 = arith.mulf %267, %268 : vector<8x32xf32>
    %270 = vector.broadcast %249 : vector<1x32xf32> to vector<8x32xf32>
    %271 = arith.addf %269, %270 : vector<8x32xf32>
    %272 = arith.truncf %271 : vector<8x32xf32> to vector<8x32xbf16>
    %c7 = arith.constant 7 : index
    %c0_111 = arith.constant 0 : index
    %c0_112 = arith.constant 0 : index
    %273 = vector.load %arg4[%c7, %c0_111, %c0_112] : memref<9x2x32xf32, #tpu.memory_space<vmem>>, vector<1x2x32xf32>
    %274 = vector.shape_cast %273 : vector<1x2x32xf32> to vector<2x32xf32>
    %275 = vector.extract_strided_slice %274 {offsets = [0, 0], sizes = [1, 32], strides = [1, 1]} : vector<2x32xf32> to vector<1x32xf32>
    %276 = vector.extract_strided_slice %274 {offsets = [1, 0], sizes = [1, 32], strides = [1, 1]} : vector<2x32xf32> to vector<1x32xf32>
    %cst_113 = arith.constant dense<0.000000e+00> : vector<8xf32>
    %277 = vector.multi_reduction <add>, %245, %cst_113 [1] : vector<8x32xf32> to vector<8xf32>
    %278 = vector.shape_cast %277 : vector<8xf32> to vector<8x1xf32>
    %cst_114 = arith.constant 3.200000e+01 : f32
    %279 = vector.broadcast %cst_114 : f32 to vector<8x1xf32>
    %280 = arith.divf %278, %279 : vector<8x1xf32>
    %281 = vector.broadcast %280 : vector<8x1xf32> to vector<8x32xf32>
    %282 = arith.subf %245, %281 : vector<8x32xf32>
    %283 = arith.mulf %282, %282 : vector<8x32xf32>
    %cst_115 = arith.constant dense<0.000000e+00> : vector<8xf32>
    %284 = vector.multi_reduction <add>, %283, %cst_115 [1] : vector<8x32xf32> to vector<8xf32>
    %285 = vector.shape_cast %284 : vector<8xf32> to vector<8x1xf32>
    %cst_116 = arith.constant 3.200000e+01 : f32
    %286 = vector.broadcast %cst_116 : f32 to vector<8x1xf32>
    %287 = arith.divf %285, %286 : vector<8x1xf32>
    %288 = vector.broadcast %280 : vector<8x1xf32> to vector<8x32xf32>
    %289 = arith.subf %245, %288 : vector<8x32xf32>
    %cst_117 = arith.constant 9.99999974E-6 : f32
    %290 = vector.broadcast %cst_117 : f32 to vector<8x1xf32>
    %291 = arith.addf %287, %290 : vector<8x1xf32>
    %292 = math.rsqrt %291 : vector<8x1xf32>
    %293 = vector.broadcast %292 : vector<8x1xf32> to vector<8x32xf32>
    %294 = arith.mulf %289, %293 : vector<8x32xf32>
    %295 = vector.broadcast %275 : vector<1x32xf32> to vector<8x32xf32>
    %296 = arith.mulf %294, %295 : vector<8x32xf32>
    %297 = vector.broadcast %276 : vector<1x32xf32> to vector<8x32xf32>
    %298 = arith.addf %296, %297 : vector<8x32xf32>
    %299 = arith.truncf %298 : vector<8x32xf32> to vector<8x32xbf16>
    %c8 = arith.constant 8 : index
    %c0_118 = arith.constant 0 : index
    %c0_119 = arith.constant 0 : index
    %300 = vector.load %arg4[%c8, %c0_118, %c0_119] : memref<9x2x32xf32, #tpu.memory_space<vmem>>, vector<1x2x32xf32>
    %301 = vector.shape_cast %300 : vector<1x2x32xf32> to vector<2x32xf32>
    %302 = vector.extract_strided_slice %301 {offsets = [0, 0], sizes = [1, 32], strides = [1, 1]} : vector<2x32xf32> to vector<1x32xf32>
    %303 = vector.extract_strided_slice %301 {offsets = [1, 0], sizes = [1, 32], strides = [1, 1]} : vector<2x32xf32> to vector<1x32xf32>
    %cst_120 = arith.constant dense<0.000000e+00> : vector<8xf32>
    %304 = vector.multi_reduction <add>, %5, %cst_120 [1] : vector<8x32xf32> to vector<8xf32>
    %305 = vector.shape_cast %304 : vector<8xf32> to vector<8x1xf32>
    %cst_121 = arith.constant 3.200000e+01 : f32
    %306 = vector.broadcast %cst_121 : f32 to vector<8x1xf32>
    %307 = arith.divf %305, %306 : vector<8x1xf32>
    %308 = vector.broadcast %307 : vector<8x1xf32> to vector<8x32xf32>
    %309 = arith.subf %5, %308 : vector<8x32xf32>
    %310 = arith.mulf %309, %309 : vector<8x32xf32>
    %cst_122 = arith.constant dense<0.000000e+00> : vector<8xf32>
    %311 = vector.multi_reduction <add>, %310, %cst_122 [1] : vector<8x32xf32> to vector<8xf32>
    %312 = vector.shape_cast %311 : vector<8xf32> to vector<8x1xf32>
    %cst_123 = arith.constant 3.200000e+01 : f32
    %313 = vector.broadcast %cst_123 : f32 to vector<8x1xf32>
    %314 = arith.divf %312, %313 : vector<8x1xf32>
    %315 = vector.broadcast %307 : vector<8x1xf32> to vector<8x32xf32>
    %316 = arith.subf %5, %315 : vector<8x32xf32>
    %cst_124 = arith.constant 9.99999974E-6 : f32
    %317 = vector.broadcast %cst_124 : f32 to vector<8x1xf32>
    %318 = arith.addf %314, %317 : vector<8x1xf32>
    %319 = math.rsqrt %318 : vector<8x1xf32>
    %320 = vector.broadcast %319 : vector<8x1xf32> to vector<8x32xf32>
    %321 = arith.mulf %316, %320 : vector<8x32xf32>
    %322 = vector.broadcast %302 : vector<1x32xf32> to vector<8x32xf32>
    %323 = arith.mulf %321, %322 : vector<8x32xf32>
    %324 = vector.broadcast %303 : vector<1x32xf32> to vector<8x32xf32>
    %325 = arith.addf %323, %324 : vector<8x32xf32>
    %326 = arith.truncf %325 : vector<8x32xf32> to vector<8x32xbf16>
    %c2_125 = arith.constant 2 : index
    %c0_126 = arith.constant 0 : index
    %c0_127 = arith.constant 0 : index
    %c0_128 = arith.constant 0 : index
    %327 = vector.load %arg5[%c2_125, %c0_126, %c0_127, %c0_128] : memref<3x4x32x32xbf16, #tpu.memory_space<vmem>>, vector<1x1x32x32xbf16>
    %328 = vector.shape_cast %327 : vector<1x1x32x32xbf16> to vector<32x32xbf16>
    %c2_129 = arith.constant 2 : index
    %c1_130 = arith.constant 1 : index
    %c0_131 = arith.constant 0 : index
    %c0_132 = arith.constant 0 : index
    %329 = vector.load %arg5[%c2_129, %c1_130, %c0_131, %c0_132] : memref<3x4x32x32xbf16, #tpu.memory_space<vmem>>, vector<1x1x32x32xbf16>
    %330 = vector.shape_cast %329 : vector<1x1x32x32xbf16> to vector<32x32xbf16>
    %c2_133 = arith.constant 2 : index
    %c2_134 = arith.constant 2 : index
    %c0_135 = arith.constant 0 : index
    %c0_136 = arith.constant 0 : index
    %331 = vector.load %arg5[%c2_133, %c2_134, %c0_135, %c0_136] : memref<3x4x32x32xbf16, #tpu.memory_space<vmem>>, vector<1x1x32x32xbf16>
    %332 = vector.shape_cast %331 : vector<1x1x32x32xbf16> to vector<32x32xbf16>
    %c2_137 = arith.constant 2 : index
    %c3_138 = arith.constant 3 : index
    %c0_139 = arith.constant 0 : index
    %c0_140 = arith.constant 0 : index
    %333 = vector.load %arg5[%c2_137, %c3_138, %c0_139, %c0_140] : memref<3x4x32x32xbf16, #tpu.memory_space<vmem>>, vector<1x1x32x32xbf16>
    %334 = vector.shape_cast %333 : vector<1x1x32x32xbf16> to vector<32x32xbf16>
    %c2_141 = arith.constant 2 : index
    %c0_142 = arith.constant 0 : index
    %c0_143 = arith.constant 0 : index
    %335 = vector.load %arg6[%c2_141, %c0_142, %c0_143] : memref<3x1x32xf32, #tpu.memory_space<vmem>>, vector<1x1x32xf32>
    %336 = vector.shape_cast %335 : vector<1x1x32xf32> to vector<1x32xf32>
    %cst_144 = arith.constant dense<0.000000e+00> : vector<8x32xf32>
    %337 = tpu.matmul %272, %328, %cst_144 {dimension_numbers = #tpu.dot_dimension_numbers<[1], [0], [0], [1], [0, 0, 1, 1], [], []>} : vector<8x32xbf16>, vector<32x32xbf16>, vector<8x32xf32> -> vector<8x32xf32>
    %cst_145 = arith.constant dense<0.000000e+00> : vector<8x32xf32>
    %338 = tpu.matmul %299, %330, %cst_145 {dimension_numbers = #tpu.dot_dimension_numbers<[1], [0], [0], [1], [0, 0, 1, 1], [], []>} : vector<8x32xbf16>, vector<32x32xbf16>, vector<8x32xf32> -> vector<8x32xf32>
    %cst_146 = arith.constant dense<0.000000e+00> : vector<8x32xf32>
    %339 = tpu.matmul %326, %332, %cst_146 {dimension_numbers = #tpu.dot_dimension_numbers<[1], [0], [0], [1], [0, 0, 1, 1], [], []>} : vector<8x32xbf16>, vector<32x32xbf16>, vector<8x32xf32> -> vector<8x32xf32>
    %340 = vector.shape_cast %337 : vector<8x32xf32> to vector<8x4x8xf32>
    %341 = arith.truncf %340 : vector<8x4x8xf32> to vector<8x4x8xbf16>
    %342 = vector.shape_cast %338 : vector<8x32xf32> to vector<8x4x8xf32>
    %343 = arith.truncf %342 : vector<8x4x8xf32> to vector<8x4x8xbf16>
    %344 = vector.shape_cast %339 : vector<8x32xf32> to vector<8x4x8xf32>
    %345 = arith.truncf %344 : vector<8x4x8xf32> to vector<8x4x8xbf16>
    "tpu.trace_start"() <{level = 10 : i32, message = "nhd,mhd->hnm"}> : () -> ()
    %cst_147 = arith.constant dense<0.000000e+00> : vector<4x8x8xf32>
    %346 = tpu.matmul %341, %343, %cst_147 {dimension_numbers = #tpu.dot_dimension_numbers<[2], [2], [0], [0], [0, 1, 0, 0, 1, 0], [1], [1]>} : vector<8x4x8xbf16>, vector<8x4x8xbf16>, vector<4x8x8xf32> -> vector<4x8x8xf32>
    "tpu.trace_stop"() : () -> ()
    %cst_148 = arith.constant dense<0xFF800000> : vector<4x8xf32>
    %347 = vector.multi_reduction <maximumf>, %346, %cst_148 [2] : vector<4x8x8xf32> to vector<4x8xf32>
    %348 = vector.shape_cast %347 : vector<4x8xf32> to vector<4x8x1xf32>
    %349 = vector.broadcast %348 : vector<4x8x1xf32> to vector<4x8x8xf32>
    %350 = arith.subf %346, %349 : vector<4x8x8xf32>
    %351 = math.exp %350 : vector<4x8x8xf32>
    %cst_149 = arith.constant dense<0.000000e+00> : vector<4x8xf32>
    %352 = vector.multi_reduction <add>, %351, %cst_149 [2] : vector<4x8x8xf32> to vector<4x8xf32>
    %353 = vector.shape_cast %352 : vector<4x8xf32> to vector<4x8x1xf32>
    %354 = tpu.reciprocal %353 {approx = true} : vector<4x8x1xf32> -> vector<4x8x1xf32>
    %355 = vector.broadcast %354 : vector<4x8x1xf32> to vector<4x8x8xf32>
    %356 = arith.mulf %351, %355 : vector<4x8x8xf32>
    %357 = arith.truncf %356 : vector<4x8x8xf32> to vector<4x8x8xbf16>
    "tpu.trace_start"() <{level = 10 : i32, message = "hnm,mhd->nhd"}> : () -> ()
    %cst_150 = arith.constant dense<0.000000e+00> : vector<4x8x8xf32>
    %358 = tpu.matmul %345, %357, %cst_150 {dimension_numbers = #tpu.dot_dimension_numbers<[0], [2], [2], [1], [0, 1, 0, 2, 1, 1], [1], [0]>} : vector<8x4x8xbf16>, vector<4x8x8xbf16>, vector<4x8x8xf32> -> vector<4x8x8xf32>
    %359 = tpu.transpose %358, [2, 0, 1] : vector<4x8x8xf32> -> vector<8x4x8xf32>
    "tpu.trace_stop"() : () -> ()
    %360 = vector.shape_cast %359 : vector<8x4x8xf32> to vector<8x32xf32>
    %361 = arith.truncf %360 : vector<8x32xf32> to vector<8x32xbf16>
    %cst_151 = arith.constant dense<0.000000e+00> : vector<8x32xf32>
    %362 = tpu.matmul %361, %334, %cst_151 {dimension_numbers = #tpu.dot_dimension_numbers<[1], [0], [0], [1], [0, 0, 1, 1], [], []>} : vector<8x32xbf16>, vector<32x32xbf16>, vector<8x32xf32> -> vector<8x32xf32>
    %363 = vector.broadcast %336 : vector<1x32xf32> to vector<8x32xf32>
    %364 = arith.addf %362, %363 : vector<8x32xf32>
    %365 = arith.addf %5, %364 : vector<8x32xf32>
    %366 = tpu.concatenate %125, %245, %365 in 1 : vector<8x32xf32>, vector<8x32xf32>, vector<8x32xf32> -> vector<8x96xf32>
    %c0_152 = arith.constant 0 : index
    %c0_153 = arith.constant 0 : index
    %367 = vector.load %arg7[%c0_152, %c0_153] : memref<2x96xf32, #tpu.memory_space<vmem>>, vector<1x96xf32>
    %c1_154 = arith.constant 1 : index
    %c0_155 = arith.constant 0 : index
    %368 = vector.load %arg7[%c1_154, %c0_155] : memref<2x96xf32, #tpu.memory_space<vmem>>, vector<1x96xf32>
    %cst_156 = arith.constant dense<0.000000e+00> : vector<8xf32>
    %369 = vector.multi_reduction <add>, %366, %cst_156 [1] : vector<8x96xf32> to vector<8xf32>
    %370 = vector.shape_cast %369 : vector<8xf32> to vector<8x1xf32>
    %cst_157 = arith.constant 9.600000e+01 : f32
    %371 = vector.broadcast %cst_157 : f32 to vector<8x1xf32>
    %372 = arith.divf %370, %371 : vector<8x1xf32>
    %373 = vector.broadcast %372 : vector<8x1xf32> to vector<8x96xf32>
    %374 = arith.subf %366, %373 : vector<8x96xf32>
    %375 = arith.mulf %374, %374 : vector<8x96xf32>
    %cst_158 = arith.constant dense<0.000000e+00> : vector<8xf32>
    %376 = vector.multi_reduction <add>, %375, %cst_158 [1] : vector<8x96xf32> to vector<8xf32>
    %377 = vector.shape_cast %376 : vector<8xf32> to vector<8x1xf32>
    %cst_159 = arith.constant 9.600000e+01 : f32
    %378 = vector.broadcast %cst_159 : f32 to vector<8x1xf32>
    %379 = arith.divf %377, %378 : vector<8x1xf32>
    %380 = vector.broadcast %372 : vector<8x1xf32> to vector<8x96xf32>
    %381 = arith.subf %366, %380 : vector<8x96xf32>
    %cst_160 = arith.constant 9.99999974E-6 : f32
    %382 = vector.broadcast %cst_160 : f32 to vector<8x1xf32>
    %383 = arith.addf %379, %382 : vector<8x1xf32>
    %384 = math.rsqrt %383 : vector<8x1xf32>
    %385 = vector.broadcast %384 : vector<8x1xf32> to vector<8x96xf32>
    %386 = arith.mulf %381, %385 : vector<8x96xf32>
    %387 = vector.broadcast %367 : vector<1x96xf32> to vector<8x96xf32>
    %388 = arith.mulf %386, %387 : vector<8x96xf32>
    %389 = vector.broadcast %368 : vector<1x96xf32> to vector<8x96xf32>
    %390 = arith.addf %388, %389 : vector<8x96xf32>
    %391 = arith.truncf %390 : vector<8x96xf32> to vector<8x96xbf16>
    %c0_161 = arith.constant 0 : index
    %c0_162 = arith.constant 0 : index
    %392 = vector.load %arg8[%c0_161, %c0_162] : memref<96x64xbf16, #tpu.memory_space<vmem>>, vector<96x64xbf16>
    %cst_163 = arith.constant dense<0.000000e+00> : vector<8x64xf32>
    %393 = tpu.matmul %391, %392, %cst_163 {dimension_numbers = #tpu.dot_dimension_numbers<[1], [0], [0], [1], [0, 0, 1, 1], [], []>} : vector<8x96xbf16>, vector<96x64xbf16>, vector<8x64xf32> -> vector<8x64xf32>
    %c0_164 = arith.constant 0 : index
    %c0_165 = arith.constant 0 : index
    %394 = vector.load %arg9[%c0_164, %c0_165] : memref<1x64xf32, #tpu.memory_space<vmem>>, vector<1x64xf32>
    %395 = vector.broadcast %394 : vector<1x64xf32> to vector<8x64xf32>
    %396 = arith.addf %393, %395 : vector<8x64xf32>
    %cst_166 = arith.constant 5.000000e-01 : f32
    %397 = vector.broadcast %cst_166 : f32 to vector<8x64xf32>
    %398 = arith.mulf %397, %396 : vector<8x64xf32>
    %cst_167 = arith.constant 0.707106769 : f32
    %399 = vector.broadcast %cst_167 : f32 to vector<8x64xf32>
    %400 = arith.mulf %396, %399 : vector<8x64xf32>
    %401 = math.erf %400 : vector<8x64xf32>
    %cst_168 = arith.constant 1.000000e+00 : f32
    %402 = vector.broadcast %cst_168 : f32 to vector<8x64xf32>
    %403 = arith.addf %402, %401 : vector<8x64xf32>
    %404 = arith.mulf %398, %403 : vector<8x64xf32>
    %405 = arith.truncf %404 : vector<8x64xf32> to vector<8x64xbf16>
    %c0_169 = arith.constant 0 : index
    %c0_170 = arith.constant 0 : index
    %406 = vector.load %arg10[%c0_169, %c0_170] : memref<64x96xbf16, #tpu.memory_space<vmem>>, vector<64x96xbf16>
    %cst_171 = arith.constant dense<0.000000e+00> : vector<8x96xf32>
    %407 = tpu.matmul %405, %406, %cst_171 {dimension_numbers = #tpu.dot_dimension_numbers<[1], [0], [0], [1], [0, 0, 1, 1], [], []>} : vector<8x64xbf16>, vector<64x96xbf16>, vector<8x96xf32> -> vector<8x96xf32>
    %c0_172 = arith.constant 0 : index
    %c0_173 = arith.constant 0 : index
    %408 = vector.load %arg11[%c0_172, %c0_173] : memref<1x96xf32, #tpu.memory_space<vmem>>, vector<1x96xf32>
    %409 = vector.broadcast %408 : vector<1x96xf32> to vector<8x96xf32>
    %410 = arith.addf %407, %409 : vector<8x96xf32>
    %411 = arith.addf %366, %410 : vector<8x96xf32>
    %c0_174 = arith.constant 0 : index
    %c0_175 = arith.constant 0 : index
    %c0_176 = arith.constant 0 : index
    %412 = vector.load %arg12[%c0_174, %c0_175, %c0_176] : memref<1x8x96xf32, #tpu.memory_space<vmem>>, vector<1x8x96xf32>
    %413 = vector.shape_cast %412 : vector<1x8x96xf32> to vector<8x96xf32>
    %414 = vector.shape_cast %411 : vector<8x96xf32> to vector<1x8x96xf32>
    tpu.vector_store %arg12[%c0_174, %c0_175, %c0_176], %414 {strides = array<i32>} : memref<1x8x96xf32, #tpu.memory_space<vmem>>, vector<1x8x96xf32>,
    return
  }
  func.func @transform_0(%arg0: i32) -> (i32, i32, i32) {
    %c0_i32 = arith.constant 0 : i32
    %c0_i32_0 = arith.constant 0 : i32
    %c0_i32_1 = arith.constant 0 : i32
    return %arg0, %c0_i32, %c0_i32_0 : i32, i32, i32
  }
  func.func @transform_1(%arg0: i32) -> (i32, i32, i32) {
    %c0_i32 = arith.constant 0 : i32
    %c0_i32_0 = arith.constant 0 : i32
    %c0_i32_1 = arith.constant 0 : i32
    return %arg0, %c0_i32, %c0_i32_0 : i32, i32, i32
  }
  func.func @transform_2(%arg0: i32) -> (i32, i32, i32) {
    %c0_i32 = arith.constant 0 : i32
    %c0_i32_0 = arith.constant 0 : i32
    %c0_i32_1 = arith.constant 0 : i32
    return %arg0, %c0_i32, %c0_i32_0 : i32, i32, i32
  }
  func.func @transform_3(%arg0: i32) -> (i32, i32, i32) {
    %c0_i32 = arith.constant 0 : i32
    %c0_i32_0 = arith.constant 0 : i32
    %c0_i32_1 = arith.constant 0 : i32
    %c0_i32_2 = arith.constant 0 : i32
    return %c0_i32, %c0_i32_0, %c0_i32_1 : i32, i32, i32
  }
  func.func @transform_4(%arg0: i32) -> (i32, i32, i32, i32) {
    %c0_i32 = arith.constant 0 : i32
    %c0_i32_0 = arith.constant 0 : i32
    %c0_i32_1 = arith.constant 0 : i32
    %c0_i32_2 = arith.constant 0 : i32
    %c0_i32_3 = arith.constant 0 : i32
    return %c0_i32, %c0_i32_0, %c0_i32_1, %c0_i32_2 : i32, i32, i32, i32
  }
  func.func @transform_5(%arg0: i32) -> (i32, i32, i32) {
    %c0_i32 = arith.constant 0 : i32
    %c0_i32_0 = arith.constant 0 : i32
    %c0_i32_1 = arith.constant 0 : i32
    %c0_i32_2 = arith.constant 0 : i32
    return %c0_i32, %c0_i32_0, %c0_i32_1 : i32, i32, i32
  }
  func.func @transform_6(%arg0: i32) -> (i32, i32) {
    %c0_i32 = arith.constant 0 : i32
    %c0_i32_0 = arith.constant 0 : i32
    %c0_i32_1 = arith.constant 0 : i32
    return %c0_i32, %c0_i32_0 : i32, i32
  }
  func.func @transform_7(%arg0: i32) -> (i32, i32) {
    %c0_i32 = arith.constant 0 : i32
    %c0_i32_0 = arith.constant 0 : i32
    %c0_i32_1 = arith.constant 0 : i32
    return %c0_i32, %c0_i32_0 : i32, i32
  }
  func.func @transform_8(%arg0: i32) -> (i32, i32) {
    %c0_i32 = arith.constant 0 : i32
    %c0_i32_0 = arith.constant 0 : i32
    %c0_i32_1 = arith.constant 0 : i32
    return %c0_i32, %c0_i32_0 : i32, i32
  }
  func.func @transform_9(%arg0: i32) -> (i32, i32) {
    %c0_i32 = arith.constant 0 : i32
    %c0_i32_0 = arith.constant 0 : i32
    %c0_i32_1 = arith.constant 0 : i32
    return %c0_i32, %c0_i32_0 : i32, i32
  }
  func.func @transform_10(%arg0: i32) -> (i32, i32) {
    %c0_i32 = arith.constant 0 : i32
    %c0_i32_0 = arith.constant 0 : i32
    %c0_i32_1 = arith.constant 0 : i32
    return %c0_i32, %c0_i32_0 : i32, i32
  }
  func.func @transform_11(%arg0: i32) -> (i32, i32, i32) {
    %c0_i32 = arith.constant 0 : i32
    %c0_i32_0 = arith.constant 0 : i32
    %c0_i32_1 = arith.constant 0 : i32
    return %arg0, %c0_i32, %c0_i32_0 : i32, i32, i32
  }
}

</mosaic_0001>

<bundles_post_ra>
// kernel: tpu_custom_call.1
= control target key start
LH: loop header
LB: loop body
LE: loop exit
PB: predicated region body
PF: predicated region fallthrough
CT: control target
= control target key end

     0   :  { %s9934_s0 = inlined_call_operand.hbm [shape: f32[2,8,32], index: 0, kind: input, shape index: {}]   ;;  %s9935_s1 = inlined_call_operand.hbm [shape: f32[2,8,32], index: 1, kind: input, shape index: {}]   ;;  %s9936_s2 = inlined_call_operand.hbm [shape: f32[2,8,32], index: 2, kind: input, shape index: {}]   ;;  %s9937_s3 = inlined_call_operand.hbm [shape: f32[9,2,32], index: 3, kind: input, shape index: {}]   ;;  %s9938_s4 = inlined_call_operand.hbm [shape: bf16[3,4,32,32], index: 4, kind: input, shape index: {}]   ;;  %s9939_s5 = inlined_call_operand.hbm [shape: f32[3,1,32], index: 5, kind: input, shape index: {}]   ;;  %s9940_s6 = inlined_call_operand.hbm [shape: f32[2,96], index: 6, kind: input, shape index: {}]   ;;  %s9941_s7 = inlined_call_operand.hbm [shape: bf16[96,64], index: 7, kind: input, shape index: {}]   ;;  %s9942_s8 = inlined_call_operand.hbm [shape: f32[1,64], index: 8, kind: input, shape index: {}]   ;;  %s9943_s9 = inlined_call_operand.hbm [shape: bf16[64,96], index: 9, kind: input, shape index: {}]   ;;  %s9944_s10 = inlined_call_operand.hbm [shape: f32[1,96], index: 10, kind: input, shape index: {}]   ;;  %s9945_s11 = inlined_call_operand.hbm [shape: f32[2,8,96], index: 11, kind: output, shape index: {}]  }
   0x1   :  { %9972 = sst [smem:[#allocation36_spill]] %s9935_s1 }
   0x2   :  { %9973 = sst [smem:[#allocation37_spill]] %s9937_s3 }
   0x3   :  { %9974 = sst [smem:[#allocation38_spill]] %s9939_s5 }
   0x4   :  { %9975 = sst [smem:[#allocation39_spill]] %s9941_s7 }
   0x5   :  { %9976 = sst [smem:[#allocation40_spill]] %s9943_s9 }
   0x6   :  { %9977 = sst [smem:[#allocation41_spill]] %s9945_s11 }
   0x7   :  { %16 = vsyncpa [#allocation3], 0 }
   0x8   :  { %18 = vsyncpa [#allocation3 + $0x1], 0 }
   0x9   :  { %19 = vsyncpa [#allocation6], 0 }
   0xa   :  { %21 = vsyncpa [#allocation6 + $0x1], 0 }
   0xb   :  { %22 = vsyncpa [#allocation9], 0 }
   0xc   :  { %23 = vsyncpa [#allocation12], 0 }
   0xd   :  { %24 = vsyncpa [#allocation15], 0 }
   0xe   :  { %25 = vsyncpa [#allocation18], 0 }
   0xf   :  { %26 = vsyncpa [#allocation4], 0 }
  0x10   :  { %28 = vsyncpa [#allocation4 + $0x1], 0  ;;  %s8748_s17 = smov 0   ;;  %s8750_s18 = smov 0  }
  0x11   :  { %s8752_s19 = smov 0   ;;  %s8754_s20 = smov 0  }
  0x12 LB: > { %9978 = sst [smem:[#allocation28_spill]] %s8643_s17  ;;  %s8657_s21 = smov [#allocation8]   ;;  %s8655_s20 = sphi %s8754_s20, %s10028_s20   ;;  %s8651_s19 = sphi %s8752_s19, %s10032_s19   ;;  %s8647_s18 = sphi %s8750_s18, %s10031_s18   ;;  %s8643_s17 = sphi %s8748_s17, %s10030_s17  }
  0x13   : > { %9979 = sst [smem:[#allocation29_spill]] %s8655_s20  ;;  %s323_s22 = sshll.u32 %s8657_s21, 4  ;;  %s8774_s22 = int_to_ptr.vmem [resolvable:$true] %s323_s22 }
  0x14   : > { %s8769_s23 = sadd.s32 4294967295, %s8655_s20   ;;  %p7506_p0 = scmp.ge.s32.totalorder %s8655_s20, 1 }
  0x15   : > { %9980 = sst [smem:[#allocation30_spill]] %s8769_s23  ;;  %p9948_p1 = scmp.eq.s32.totalorder %s8769_s23, 0 }
  0x16   : > { %p311_p2 = scmp.lt.s32.totalorder %s8655_s20, 3  ;;  %s8658_s25 = smov [#allocation11]  }
  0x17   : > { %s349_s26 = sshll.u32 %s8658_s25, 4  ;;  %s9984_s3 = sld [smem:[#allocation37_spill]]  ;;  %s8789_s26 = int_to_ptr.vmem [resolvable:$true] %s349_s26 }
  0x18   : > { %p8776_p3 = pnand %p7506_p0, %p311_p2 }
  0x1a   : > { %s9981_s24 = scalar_select %p8776_p3, 1, 0 }
  0x1b   : > { %p8040_p5 = pneg %p8776_p3 }
  0x1c   : > { %9982 = sst [smem:[#allocation31_spill]] %s9981_s24 }
  0x1d   : > { %p8785_p6 = pnand %p8040_p5, %p9948_p1  ;;  %s8255_s30 = scalar_lea.hbm %s9984_s3, 288 }
  0x1e   : > { %p8256_p7 = scmp.ne.s32.totalorder %s9984_s3, %s8255_s30  ;;  %p8262_p11 = scmp.lt.u32.totalorder %s8255_s30, %s9984_s3 }
  0x1f   : > { %s9983_s27 = scalar_select %p8785_p6, 1, 0 }
  0x20   : > { %p8799_p8 = pneg %p8785_p6 }
  0x22   : > { %s9985_s14 = scalar_select %p8799_p8, 1, 0 }
  0x23   : > { %p8258_p9 = pnand %p8799_p8, %p8256_p7 }
  0x25   : > { %p8259_p10 = pneg %p8258_p9 }
  0x27   : > { %p8264_p12 = pnand %p8262_p11, %p8259_p10 }
  0x29   : > { %8267 = shalt.err (!%p8264_p12)
}
  0x2a   : > { %s8268_s21 = scalar_lea.vmem %s8774_s22, 288  ;;  %p8276_p5 = scmp.lt.s32.totalorder %s8774_s22, %s8774_s22 }
  0x2b   : > { %p8269_p13 = scmp.ne.s32.totalorder %s8774_s22, %s8268_s21  ;;  %p8277_p4 = scmp.lt.s32.totalorder %s8268_s21, %s8268_s21 }
  0x2d   : > { %p8271_p0 = pnand %p8269_p13, %p8799_p8  ;;  %p8278_p7 = por %p8277_p4, %p8276_p5 }
  0x2f   : > { %p8272_p2 = pneg %p8271_p0 }
  0x31   : > { %p8279_p9 = pnand %p8278_p7, %p8272_p2 }
  0x33   : > { %8282 = shalt.err (!%p8279_p9)
}
  0x34   : > { %s8659_s25 = smov 32   ;;  %s8660_s28 = smov 2  }
  0x35   : > { %8043 = dma.hbm_to_vmem [thread:$0]  (!%p8785_p6), %s9984_s3, 288, %s8774_s22, [#allocation9], %s8659_s25, %s8659_s25, %s8660_s28  }
  0x36   : > { %s9986_s5 = sld [smem:[#allocation38_spill]] }
  0x3c   : > { %s8283_s15 = scalar_lea.hbm %s9986_s5, 48 }
  0x3d   : > { %p8284_p4 = scmp.ne.s32.totalorder %s9986_s5, %s8283_s15  ;;  %p8290_p12 = scmp.lt.u32.totalorder %s8283_s15, %s9986_s5 }
  0x3f   : > { %p8286_p10 = pnand %p8284_p4, %p8799_p8 }
  0x41   : > { %p8287_p11 = pneg %p8286_p10 }
  0x43   : > { %p8292_p13 = pnand %p8290_p12, %p8287_p11 }
  0x45   : > { %8295 = shalt.err (!%p8292_p13)
}
  0x46   : > { %s8296_s22 = scalar_lea.vmem %s8789_s26, 48  ;;  %s8303_s11 = scalar_lea.vmem %s8789_s26, 64 }
  0x47   : > { %p8297_p0 = scmp.ne.s32.totalorder %s8789_s26, %s8296_s22  ;;  %p8304_p7 = scmp.lt.s32.totalorder %s8789_s26, %s8789_s26 }
  0x48   : > { %p8305_p9 = scmp.lt.s32.totalorder %s8303_s11, %s8296_s22 }
  0x49   : > { %p8299_p2 = pnand %p8297_p0, %p8799_p8 }
  0x4a   : > { %p8306_p4 = por %p8305_p9, %p8304_p7 }
  0x4b   : > { %p8300_p5 = pneg %p8299_p2 }
  0x4d   : > { %p8307_p10 = pnand %p8306_p4, %p8300_p5 }
  0x4f   : > { %8310 = shalt.err (!%p8307_p10)
}
  0x50   : > { %s8661_s24 = smov 16   ;;  %s8662_s25 = smov 1  }
  0x51   : > { %8049 = dma.hbm_to_vmem [thread:$0]  (!%p8785_p6), %s9986_s5, 48, %s8789_s26, [#allocation12], %s8661_s24, %s8661_s24, %s8662_s25  }
  0x52   : > { %s8663_s30 = smov [#allocation14]   ;;  %s8664_s13 = smov [#allocation17]  }
  0x53   : > { %s373_s12 = sshll.u32 %s8663_s30, 4  ;;  %s397_s15 = sshll.u32 %s8664_s13, 4  ;;  %s374_s12 = int_to_ptr.vmem [resolvable:$true] %s373_s12  ;;  %s8844_s15 = int_to_ptr.vmem [resolvable:$true] %s397_s15 }
  0x54   : > { %s9987_s7 = sld [smem:[#allocation39_spill]] }
  0x5a   : > { %s8311_s22 = scalar_lea.hbm %s9987_s7, 768 }
  0x5b   : > { %p8312_p11 = scmp.ne.s32.totalorder %s9987_s7, %s8311_s22  ;;  %p8318_p0 = scmp.lt.u32.totalorder %s8311_s22, %s9987_s7 }
  0x5d   : > { %p8314_p12 = pnand %p8312_p11, %p8799_p8 }
  0x5f   : > { %p8315_p13 = pneg %p8314_p12 }
  0x61   : > { %p8320_p2 = pnand %p8318_p0, %p8315_p13 }
  0x63   : > { %8323 = shalt.err (!%p8320_p2)
}
  0x64   : > { %s8324_s24 = scalar_lea.vmem %s374_s12, 768  ;;  %p8332_p4 = scmp.lt.s32.totalorder %s374_s12, %s374_s12 }
  0x65   : > { %p8325_p5 = scmp.ne.s32.totalorder %s374_s12, %s8324_s24  ;;  %p8333_p10 = scmp.lt.s32.totalorder %s8324_s24, %s8324_s24 }
  0x67   : > { %p8327_p7 = pnand %p8325_p5, %p8799_p8  ;;  %p8334_p1 = por %p8333_p10, %p8332_p4 }
  0x69   : > { %p8328_p9 = pneg %p8327_p7 }
  0x6b   : > { %p8335_p3 = pnand %p8334_p1, %p8328_p9 }
  0x6d   : > { %8338 = shalt.err (!%p8335_p3)
}
  0x6e   : > { %s9950_s3 = smov 64   ;;  %s9952_s25 = smov 4  }
  0x6f   : > { %8055 = dma.hbm_to_vmem [thread:$0]  (!%p8785_p6), %s9987_s7, 768, %s374_s12, [#allocation15], %s9950_s3, %s9950_s3, %s9952_s25  }
  0x70   : > { %s9988_s9 = sld [smem:[#allocation40_spill]] }
  0x76   : > { %s8339_s21 = scalar_lea.hbm %s9988_s9, 512 }
  0x77   : > { %p8340_p1 = scmp.ne.s32.totalorder %s9988_s9, %s8339_s21  ;;  %p8346_p12 = scmp.lt.u32.totalorder %s8339_s21, %s9988_s9 }
  0x79   : > { %p8342_p3 = pnand %p8340_p1, %p8799_p8 }
  0x7b   : > { %p8343_p11 = pneg %p8342_p3 }
  0x7d   : > { %p8348_p13 = pnand %p8346_p12, %p8343_p11 }
  0x7f   : > { %8351 = shalt.err (!%p8348_p13)
}
  0x80   : > { %s8352_s12 = scalar_lea.vmem %s8844_s15, 512  ;;  %p8360_p7 = scmp.lt.s32.totalorder %s8844_s15, %s8844_s15 }
  0x81   : > { %p8353_p0 = scmp.ne.s32.totalorder %s8844_s15, %s8352_s12  ;;  %p8361_p9 = scmp.lt.s32.totalorder %s8352_s12, %s8352_s12 }
  0x83   : > { %p8355_p2 = pnand %p8353_p0, %p8799_p8  ;;  %p8362_p4 = por %p8361_p9, %p8360_p7 }
  0x85   : > { %p8356_p5 = pneg %p8355_p2 }
  0x87   : > { %p8363_p10 = pnand %p8362_p4, %p8356_p5 }
  0x89   : > { %8366 = shalt.err (!%p8363_p10)
}
  0x8a   : > { %8061 = dma.hbm_to_vmem [thread:$0]  (!%p8785_p6), %s9988_s9, 512, %s8844_s15, [#allocation18], %s9950_s3, %s9950_s3, %s9952_s25  }
  0x8b   : > { %s7505_s30 = sadd.s32 4294967294, %s8655_s20   ;;  %s8895_s13 = sadd.s32 1, %s8655_s20  }
  0x8c   : > { %9989 = sst [smem:[#allocation32_spill]] %s8895_s13  ;;  %s38_s16 = ssub.s32 %s8655_s20, %s8895_s13 }
  0x8d   : > { %s41_s21 = sadd.s32 1, %s8651_s19  ;;  %p39_p1 = scmp.eq.s32.totalorder %s38_s16, 0 }
  0x8e   : > { %p48_p3 = scmp.ne.s32.totalorder %s8651_s19, %s8647_s18  ;;  %p49_p11 = scmp.eq.s32.totalorder %s8655_s20, 0 }
  0x8f   : > { %p54_p12 = scmp.ne.s32.totalorder %s8647_s18, %s8643_s17  ;;  %p9991_p0 = scmp.eq.s32.totalorder %s8769_s23, 0 }
  0x90   : > { %s8906_s22 = scalar_select %p39_p1, %s8651_s19, %s41_s21  }
  0x91   : > { %p50_p13 = por %p49_p11, %p48_p3  ;;  %p8910_p2 = por %p9991_p0, %p54_p12 }
  0x92   : > { %9990 = sst [smem:[#allocation33_spill]] %s8906_s22  ;;  %p298_p5 = scmp.eq.s32.totalorder %s8769_s23, 1 }
  0x93   : > { %s9992_s11 = scalar_select %p8910_p2, 1, 0 }
  0x94   : > { %p304_p7 = scmp.eq.s32.totalorder %s7505_s30, 1  ;;  %p8087_p9 = scmp.lt.s32.totalorder %s8655_s20, 2 }
  0x95   : > { %s9951_s15 = sand.u32 1, %s8651_s19   ;;  %p8917_p4 = por %p298_p5, %p48_p3 }
  0x96   : > { %p8921_p10 = por %p304_p7, %p54_p12  ;;  %s8927_s12 = sshll.u32 %s9951_s15, 3 }
  0x97   : > { %s9993_s28 = scalar_select %p8917_p4, 1, 0 }
  0x98   : > { %s9995_s26 = scalar_select %p8921_p10, 1, 0 }
  0x99   : > { %9994 = sst [smem:[#allocation34_spill]] %s9993_s28  ;;  %s8930_s24 = sshll.u32 %s8655_s20, 7 }
  0x9a   : > { %9996 = sst [smem:[#allocation35_spill]] %s9995_s26  ;;  %p8932_p1 = pnand %p8087_p9, %p50_p13 }
  0x9b   : > { %s440_s30 = sand.u32 1, %s8655_s20   ;;  %s9998_s1 = sld [smem:[#allocation36_spill]] }
  0x9c   : > { %s9997_s29 = scalar_select %p8932_p1, 1, 0 }
  0x9d   : > { %s444_s15 = scalar_lea.vmem [#allocation5], %s8927_s12  ;;  %s8667_s5 = smov [#allocation10]  }
  0x9e   : > { %s451_s25 = sshll.u32 %s444_s15, 4  ;;  %s8946_s7 = sshll.u32 %s8667_s5, 4  ;;  %s8944_s25 = int_to_ptr.vmem [resolvable:$true] %s451_s25  ;;  %s337_s7 = int_to_ptr.vmem [resolvable:$true] %s8946_s7 }
  0x9f   : > { %s8948_s9 = scalar_lea.sflag [#allocation6], %s440_s30  ;;  %p8954_p11 = pneg %p8932_p1 }
  0xa1   : > { %s8941_s3 = scalar_lea.hbm %s9998_s1, %s8930_s24  ;;  %s8372_s13 = scalar_lea.hbm %s9998_s1, 256 }
  0xa2   : > { %s8367_s22 = scalar_lea.hbm %s8941_s3, 128  ;;  %p8373_p0 = scmp.lt.u32.totalorder %s8941_s3, %s9998_s1 }
  0xa3   : > { %p8368_p3 = scmp.ne.s32.totalorder %s8941_s3, %s8367_s22  ;;  %p8374_p5 = scmp.lt.u32.totalorder %s8372_s13, %s8367_s22 }
  0xa4   : > { %s9999_s16 = scalar_select %p8954_p11, 1, 0 }
  0xa5   : > { %p8370_p12 = pnand %p8954_p11, %p8368_p3  ;;  %p8375_p7 = por %p8374_p5, %p8373_p0 }
  0xa6   : > { %p8376_p9 = scmp.lt.u32.totalorder %s8367_s22, %s8941_s3 }
  0xa7   : > { %p8371_p13 = pneg %p8370_p12 }
  0xa8   : > { %p8377_p10 = por %p8376_p9, %p8375_p7 }
  0xaa   : > { %p8378_p4 = pnand %p8377_p10, %p8371_p13 }
  0xac   : > { %8381 = shalt.err (!%p8378_p4)
}
  0xad   : > { %s8382_s30 = scalar_lea.vmem %s8944_s25, 128  ;;  %s8668_s21 = smov [#allocation5]  }
  0xae   : > { %p8383_p3 = scmp.ne.s32.totalorder %s8944_s25, %s8382_s30  ;;  %s8387_s15 = sshll.u32 %s8668_s21, 4  ;;  %s8388_s15 = int_to_ptr.vmem [resolvable:$false] %s8387_s15 }
  0xaf   : > { %s8389_s20 = scalar_lea.vmem %s8388_s15, 256  ;;  %p8390_p6 = scmp.lt.s32.totalorder %s8944_s25, %s8388_s15 }
  0xb0   : > { %p8385_p12 = pnand %p8383_p3, %p8954_p11  ;;  %p8391_p8 = scmp.lt.s32.totalorder %s8389_s20, %s8382_s30 }
  0xb2   : > { %p8386_p2 = pneg %p8385_p12  ;;  %p8392_p0 = por %p8391_p8, %p8390_p6 }
  0xb4   : > { %p8393_p5 = pnand %p8392_p0, %p8386_p2 }
  0xb6   : > { %8396 = shalt.err (!%p8393_p5)
}
  0xb7   : > { %8071 = dma.hbm_to_vmem [thread:$0]  (!%p8932_p1), %s8941_s3, 128, %s8944_s25, %s8948_s9  }
  0xb8   : > { %s8397_s5 = scalar_lea.hbm %s9938_s4, 3072  ;;  %p10000_p6 = scmp.ne.s32.totalorder %s9985_s14, 0 }
  0xb9   : > { %p8398_p4 = scmp.ne.s32.totalorder %s9938_s4, %s8397_s5  ;;  %p8404_p10 = scmp.lt.u32.totalorder %s8397_s5, %s9938_s4 }
  0xbb   : > { %p8400_p8 = pnand %p8398_p4, %p10000_p6 }
  0xbd   : > { %p8401_p2 = pneg %p8400_p8 }
  0xbf   : > { %p8406_p13 = pnand %p8404_p10, %p8401_p2 }
  0xc1   : > { %8409 = shalt.err (!%p8406_p13)
}
  0xc2   : > { %s8410_s20 = scalar_lea.vmem %s337_s7, 3072  ;;  %p8418_p12 = scmp.lt.s32.totalorder %s337_s7, %s337_s7 }
  0xc3   : > { %p8411_p7 = scmp.ne.s32.totalorder %s337_s7, %s8410_s20  ;;  %p8419_p0 = scmp.lt.s32.totalorder %s8410_s20, %s8410_s20 }
  0xc5   : > { %p8413_p9 = pnand %p8411_p7, %p10000_p6  ;;  %p8420_p5 = por %p8419_p0, %p8418_p12 }
  0xc7   : > { %p8414_p3 = pneg %p8413_p9 }
  0xc9   : > { %p8421_p1 = pnand %p8420_p5, %p8414_p3 }
  0xcb   : > { %8424 = shalt.err (!%p8421_p1)
}
  0xcc   : > { %p10001_p4 = scmp.ne.s32.totalorder %s9983_s27, 0  ;;  %s10002_s1 = smov 4  }
  0xcd   : > { %s10003_s3 = smov 64   ;;  %s8669_s22 = smov [#allocation13]  }
  0xce   : > { %8046 = dma.hbm_to_vmem [thread:$0]  (!%p10001_p4), %s9938_s4, 3072, %s337_s7, [#allocation9], %s10003_s3, %s10003_s3, %s10002_s1  }
  0xcf   : > { %s363_s5 = sshll.u32 %s8669_s22, 4  ;;  %s8670_s21 = smov [#allocation16]   ;;  %s364_s5 = int_to_ptr.vmem [resolvable:$true] %s363_s5 }
  0xd0   : > { %s387_s30 = sshll.u32 %s8670_s21, 4  ;;  %s8425_s26 = scalar_lea.hbm %s9940_s6, 32  ;;  %s388_s30 = int_to_ptr.vmem [resolvable:$true] %s387_s30 }
  0xd1   : > { %p8426_p1 = scmp.ne.s32.totalorder %s9940_s6, %s8425_s26  ;;  %p8432_p10 = scmp.lt.u32.totalorder %s8425_s26, %s9940_s6 }
  0xd3   : > { %p8428_p8 = pnand %p8426_p1, %p10000_p6 }
  0xd5   : > { %p8429_p2 = pneg %p8428_p8 }
  0xd7   : > { %p8434_p13 = pnand %p8432_p10, %p8429_p2 }
  0xd9   : > { %8437 = shalt.err (!%p8434_p13)
}
  0xda   : > { %s8438_s7 = scalar_lea.vmem %s364_s5, 32  ;;  %p8446_p12 = scmp.lt.s32.totalorder %s364_s5, %s364_s5 }
  0xdb   : > { %p8439_p7 = scmp.ne.s32.totalorder %s364_s5, %s8438_s7  ;;  %p8447_p0 = scmp.lt.s32.totalorder %s8438_s7, %s8438_s7 }
  0xdd   : > { %p8441_p9 = pnand %p8439_p7, %p10000_p6  ;;  %p8448_p5 = por %p8447_p0, %p8446_p12 }
  0xdf   : > { %p8442_p3 = pneg %p8441_p9 }
  0xe1   : > { %p8449_p11 = pnand %p8448_p5, %p8442_p3 }
  0xe3   : > { %8452 = shalt.err (!%p8449_p11)
}
  0xe4   : > { %8052 = dma.hbm_to_vmem [thread:$0]  (!%p10001_p4), %s9940_s6, 32, %s364_s5, [#allocation12]  }
  0xe5   : > { %s8453_s1 = scalar_lea.hbm %s9942_s8, 16 }
  0xe6   : > { %p8454_p1 = scmp.ne.s32.totalorder %s9942_s8, %s8453_s1  ;;  %p8460_p11 = scmp.lt.u32.totalorder %s8453_s1, %s9942_s8 }
  0xe8   : > { %p8456_p8 = pnand %p8454_p1, %p10000_p6 }
  0xea   : > { %p8457_p2 = pneg %p8456_p8 }
  0xec   : > { %p8462_p10 = pnand %p8460_p11, %p8457_p2 }
  0xee   : > { %8465 = shalt.err (!%p8462_p10)
}
  0xef   : > { %s8466_s15 = scalar_lea.vmem %s388_s30, 16  ;;  %s8473_s5 = scalar_lea.vmem %s388_s30, 32 }
  0xf0   : > { %p8467_p13 = scmp.ne.s32.totalorder %s388_s30, %s8466_s15  ;;  %p8474_p3 = scmp.lt.s32.totalorder %s388_s30, %s388_s30 }
  0xf1   : > { %p8475_p12 = scmp.lt.s32.totalorder %s8473_s5, %s8466_s15 }
  0xf2   : > { %p8469_p7 = pnand %p8467_p13, %p10000_p6 }
  0xf3   : > { %p8476_p0 = por %p8475_p12, %p8474_p3 }
  0xf4   : > { %p8470_p9 = pneg %p8469_p7 }
  0xf6   : > { %p8477_p5 = pnand %p8476_p0, %p8470_p9 }
  0xf8   : > { %8480 = shalt.err (!%p8477_p5)
}
  0xf9   : > { %8058 = dma.hbm_to_vmem [thread:$0]  (!%p10001_p4), %s9942_s8, 16, %s388_s30, [#allocation15]  }
  0xfa   : > { %s8671_s7 = smov [#allocation19]   ;;  %s8481_s26 = scalar_lea.hbm %s9944_s10, 16 }
  0xfb   : > { %s411_s17 = sshll.u32 %s8671_s7, 4  ;;  %p8482_p1 = scmp.ne.s32.totalorder %s9944_s10, %s8481_s26  ;;  %s412_s17 = int_to_ptr.vmem [resolvable:$true] %s411_s17 }
  0xfc   : > { %p8488_p11 = scmp.lt.u32.totalorder %s8481_s26, %s9944_s10 }
  0xfd   : > { %p8484_p8 = pnand %p8482_p1, %p10000_p6 }
  0xff   : > { %p8485_p2 = pneg %p8484_p8 }
 0x101   : > { %p8490_p10 = pnand %p8488_p11, %p8485_p2 }
 0x103   : > { %8493 = shalt.err (!%p8490_p10)
}
 0x104   : > { %s8494_s30 = scalar_lea.vmem %s412_s17, 16  ;;  %s8501_s21 = scalar_lea.vmem %s412_s17, 32 }
 0x105   : > { %p8495_p13 = scmp.ne.s32.totalorder %s412_s17, %s8494_s30  ;;  %p8502_p3 = scmp.lt.s32.totalorder %s412_s17, %s412_s17 }
 0x106   : > { %p8503_p12 = scmp.lt.s32.totalorder %s8501_s21, %s8494_s30 }
 0x107   : > { %p8497_p7 = pnand %p8495_p13, %p10000_p6 }
 0x108   : > { %p8504_p0 = por %p8503_p12, %p8502_p3 }
 0x109   : > { %p8498_p9 = pneg %p8497_p7 }
 0x10b   : > { %p8505_p5 = pnand %p8504_p0, %p8498_p9 }
 0x10d   : > { %8508 = shalt.err (!%p8505_p5)
}
 0x10e   : > { %8064 = dma.hbm_to_vmem [thread:$0]  (!%p10001_p4), %s9944_s10, 16, %s412_s17, [#allocation18]  }
 0x10f   : > { %s9058_s25 = scalar_lea.hbm %s9934_s0, %s8930_s24  ;;  %s426_s7 = scalar_lea.vmem [#allocation2], %s8927_s12 }
 0x110   : > { %s433_s28 = sshll.u32 %s426_s7, 4  ;;  %s10004_s27 = sand.u32 1, %s8651_s19   ;;  %s434_s28 = int_to_ptr.vmem [resolvable:$true] %s433_s28 }
 0x111   : > { %s423_s23 = scalar_lea.sflag [#allocation3], %s10004_s27  ;;  %s8509_s26 = scalar_lea.hbm %s9058_s25, 128 }
 0x112   : > { %p8510_p6 = scmp.ne.s32.totalorder %s9058_s25, %s8509_s26  ;;  %p10005_p1 = scmp.ne.s32.totalorder %s9999_s16, 0 }
 0x113   : > { %s8514_s3 = scalar_lea.hbm %s9934_s0, 256  ;;  %p8515_p4 = scmp.lt.u32.totalorder %s9058_s25, %s9934_s0 }
 0x114   : > { %p8512_p8 = pnand %p8510_p6, %p10005_p1  ;;  %p8516_p11 = scmp.lt.u32.totalorder %s8514_s3, %s8509_s26 }
 0x115   : > { %p8518_p13 = scmp.lt.u32.totalorder %s8509_s26, %s9058_s25 }
 0x116   : > { %p8513_p2 = pneg %p8512_p8  ;;  %p8517_p10 = por %p8516_p11, %p8515_p4 }
 0x118   : > { %p8519_p7 = por %p8518_p13, %p8517_p10 }
 0x11a   : > { %p8520_p9 = pnand %p8519_p7, %p8513_p2 }
 0x11c   : > { %8523 = shalt.err (!%p8520_p9)
}
 0x11d   : > { %s8524_s30 = scalar_lea.vmem %s434_s28, 128  ;;  %s8672_s21 = smov [#allocation2]  }
 0x11e   : > { %p8525_p3 = scmp.ne.s32.totalorder %s434_s28, %s8524_s30  ;;  %s8529_s15 = sshll.u32 %s8672_s21, 4  ;;  %s8530_s15 = int_to_ptr.vmem [resolvable:$false] %s8529_s15 }
 0x11f   : > { %s8531_s5 = scalar_lea.vmem %s8530_s15, 256  ;;  %p8532_p5 = scmp.lt.s32.totalorder %s434_s28, %s8530_s15 }
 0x120   : > { %p8527_p12 = pnand %p8525_p3, %p10005_p1  ;;  %p8533_p6 = scmp.lt.s32.totalorder %s8531_s5, %s8524_s30 }
 0x122   : > { %p8528_p0 = pneg %p8527_p12  ;;  %p8534_p8 = por %p8533_p6, %p8532_p5 }
 0x124   : > { %p8535_p4 = pnand %p8534_p8, %p8528_p0 }
 0x126   : > { %8538 = shalt.err (!%p8535_p4)
}
 0x127   : > { %p10006_p11 = scmp.ne.s32.totalorder %s9997_s29, 0  ;;  %s9084_s7 = scalar_lea.hbm %s9936_s2, %s8930_s24 }
 0x128   : > { %s462_s27 = scalar_lea.vmem [#allocation7], %s8927_s12  ;;  %s8539_s17 = scalar_lea.hbm %s9084_s7, 128 }
 0x129   : > { %8068 = dma.hbm_to_vmem [thread:$0]  (!%p10006_p11), %s9058_s25, 128, %s434_s28, %s423_s23  }
 0x12a   : > { %s469_s26 = sshll.u32 %s462_s27, 4  ;;  %p8540_p2 = scmp.ne.s32.totalorder %s9084_s7, %s8539_s17  ;;  %s470_s26 = int_to_ptr.vmem [resolvable:$true] %s469_s26 }
 0x12b   : > { %s8544_s25 = scalar_lea.hbm %s9936_s2, 256  ;;  %p8545_p7 = scmp.lt.u32.totalorder %s9084_s7, %s9936_s2 }
 0x12c   : > { %p8542_p10 = pnand %p8540_p2, %p10005_p1  ;;  %p8546_p9 = scmp.lt.u32.totalorder %s8544_s25, %s8539_s17 }
 0x12d   : > { %p8548_p12 = scmp.lt.u32.totalorder %s8539_s17, %s9084_s7 }
 0x12e   : > { %p8543_p13 = pneg %p8542_p10  ;;  %p8547_p3 = por %p8546_p9, %p8545_p7 }
 0x130   : > { %p8549_p0 = por %p8548_p12, %p8547_p3 }
 0x132   : > { %p8550_p5 = pnand %p8549_p0, %p8543_p13 }
 0x134   : > { %8553 = shalt.err (!%p8550_p5)
}
 0x135   : > { %s8554_s12 = scalar_lea.vmem %s470_s26, 128  ;;  %s8673_s24 = smov [#allocation7]  }
 0x136   : > { %p8555_p6 = scmp.ne.s32.totalorder %s470_s26, %s8554_s12  ;;  %s8559_s13 = sshll.u32 %s8673_s24, 4  ;;  %s8560_s13 = int_to_ptr.vmem [resolvable:$false] %s8559_s13 }
 0x137   : > { %s8561_s22 = scalar_lea.vmem %s8560_s13, 256  ;;  %p8562_p2 = scmp.lt.s32.totalorder %s470_s26, %s8560_s13 }
 0x138   : > { %p8557_p8 = pnand %p8555_p6, %p10005_p1  ;;  %p8563_p10 = scmp.lt.s32.totalorder %s8561_s22, %s8554_s12 }
 0x13a   : > { %p8558_p4 = pneg %p8557_p8  ;;  %p8564_p11 = por %p8563_p10, %p8562_p2 }
 0x13c   : > { %p8565_p7 = pnand %p8564_p11, %p8558_p4 }
 0x13e   : > { %8568 = shalt.err (!%p8565_p7)
}
 0x13f   : > { %p10007_p9 = scmp.ne.s32.totalorder %s9997_s29, 0  ;;  %s10008_s30 = sld [smem:[#allocation31_spill]] }
 0x141   : > { %8074 = dma.hbm_to_vmem [thread:$0]  (!%p10007_p9), %s9084_s7, 128, %s470_s26, %s8948_s9  }
 0x145   : > { %p10009_p13 = scmp.ne.s32.totalorder %s10008_s30, 0 }
 0x146   : > { %s9108_s16 = sand.u32 (!%p10009_p13), 1, %s8647_s18   ;;  %p10010_p1 = scmp.ne.s32.totalorder (!%p10009_p13), %s9992_s11, 0 }
 0x147   : > { %478 = sbr.rel (%p10009_p13) target bundleno = 7804 (0x1e7c), region = 64  ;;  %s9111_s21 = sshll.u32 (!%p10009_p13), %s9108_s16, 3 }
 0x148   : > { %s481_s15 = scalar_lea.sflag (!%p10009_p13), [#allocation3], %s9108_s16  ;;  %s484_s5 = scalar_lea.vmem (!%p10009_p13), [#allocation2], %s9111_s21 }
 0x14e   : > { %8614 = dma.done.wait (%p10010_p1), %s481_s15, 128  }
 0x14f   : > { %8616 = vsyncadd (%p10010_p1), %s481_s15, 4294967168  ;;  %s10011_s9 = sld [smem:[#allocation30_spill]]  ;;  %s493_s14 = scalar_lea.vmem [#allocation5], %s9111_s21 }
 0x155   : > { %s489_s29 = sand.u32 1, %s10011_s9  }
 0x156   : > { %s490_s20 = scalar_lea.sflag [#allocation6], %s489_s29 }
 0x157   : > { %8618 = dma.done.wait (%p10010_p1), %s490_s20, 256  }
 0x158   : > { %8620 = vsyncadd (%p10010_p1), %s490_s20, 4294967040  ;;  %s502_s7 = scalar_lea.vmem [#allocation7], %s9111_s21  ;;  %p10012_p11 = scmp.eq.s32.totalorder %s10011_s9, 0 }
 0x15a   : > { %8622 = dma.done.wait (%p10012_p11), [#allocation9], 3360   ;;  %p10013_p3 = pmov %p10012_p11 }
 0x15c   : > { %8624 = vsyncadd (%p10013_p3), [#allocation9], 4294963936  ;;  %p10014_p12 = pmov %p10013_p3 }
 0x15d   : > { %p10015_p0 = pmov %p10013_p3 }
 0x15e   : > { %8626 = dma.done.wait (%p10014_p12), [#allocation12], 80  }
 0x15f   : > { %8628 = vsyncadd (%p10015_p0), [#allocation12], 4294967216  ;;  %p10016_p5 = pmov %p10015_p0 }
 0x160   : > { %p10017_p6 = pmov %p10015_p0 }
 0x161   : > { %8630 = dma.done.wait (%p10016_p5), [#allocation15], 784  }
 0x162   : > { %8632 = vsyncadd (%p10017_p6), [#allocation15], 4294966512  ;;  %p10018_p8 = pmov %p10015_p0 }
 0x163   : > { %p10019_p4 = pmov %p10015_p0 }
 0x164   : > { %8634 = dma.done.wait (%p10018_p8), [#allocation18], 528  }
 0x165   : > { %8636 = vsyncadd (%p10019_p4), [#allocation18], 4294966768  ;;  %vm588_vm0 = vcmask 261120   ;;  %v586_v0 = vld [vmem:[%s502_s7] sm:$0xff]  ;;  %v585_v1 = vld [vmem:[%s493_s14] sm:$0xff]  ;;  %v8674_v16 = vmov 0.0   ;;  %v603_v25 = vlaneseq }
 0x166   : > { %v616_v2 = vsel %vm588_vm0, %v586_v0, 0.0  ;;  %v589_v3 = vsel %vm588_vm0, %v585_v1, 0.0  ;;  %v8156_v14 = vld [vmem:[#allocation10] sm:$0xff]   ;;  %v8157_v15 = vld [vmem:[#allocation10 + $0x10] sm:$0xff]   ;;  %7732 = vmatprep.subr.bf16.mxu0 %v8674_v16  ;;  %7740 = vmatprep.subr.bf16.mxu1 %v8674_v16  ;;  %v8158_v17 = vld [vmem:[#allocation10 + $0x8] sm:$0xff]   ;;  %vm8675_vm1 = vmmov 0  }
 0x167   : > { %617 = vadd.xlane.f32.xlu0 %v616_v2  ;;  %590 = vadd.xlane.f32.xlu1 %v589_v3  ;;  %v8159_v18 = vld [vmem:[#allocation10 + $0x18] sm:$0xff]   ;;  %v604_v28 = vshrl.u32 %v603_v25, 7  ;;  %v615_v30 = vld [vmem:[#allocation8 + $0x2] sm:$0x3]  ;;  %v587_v31 = vld [vmem:[#allocation8] sm:$0x3] }
 0x168   : > { %7733 = vmatpush3.bf16.msra.mxu0 %v8156_v14  ;;  %7741 = vmatpush3.bf16.msra.mxu1 %v8157_v15  ;;  %v9162_v19 = vld [vmem:[%s484_s5] sm:$0xff]  ;;  %s8676_s11 = smov 120   ;;  %s8677_s27 = smov 112   ;;  %v8679_v56 = vmov 1983009808   ;;  %vm1593_vm2 = vcmask 1043456  }
 0x169   : > { %7734 = vmatprep.subr.bf16.mxu0 %v8674_v16  ;;  %7742 = vmatprep.subr.bf16.mxu1 %v8674_v16  ;;  %v642_v20 = vsel %vm588_vm0, %v9162_v19, 0.0  ;;  %v9166_v29 = vsub.s32 0, %v604_v28  ;;  %v9168_v32 = vsub.s32 1, %v604_v28  ;;  %s8678_s26 = smov 104   ;;  %v864_v57 = vunpack.c.l.s4 %v8679_v56  ;;  %s8682_s17 = smov 16  }
 0x16a   : > { %7736 = vmatprep.mubr.msk.bf16.mxu0 %vm8675_vm1, %v8674_v16  ;;  %7744 = vmatprep.mubr.msk.bf16.mxu1 %vm8675_vm1, %v8674_v16  ;;  %v8680_v58 = vmov 1934713408   ;;  %vm1589_vm3 = vcmask 64512   ;;  %s8683_s1 = smov 8   ;;  %s8684_s3 = smov 24   ;;  %vm2702_vm4 = vcmask 130048  }
 0x16b   : > { %v632_v33 = vrot.slane %v615_v30, %v9166_v29  ;;  %v606_v35 = vrot.slane %v587_v31, %v9166_v29  ;;  %v637_v38 = vrot.slane %v615_v30, %v9168_v32  ;;  %v611_v40 = vrot.slane %v587_v31, %v9168_v32  ;;  %s8685_s25 = smov 32   ;;  %s8686_s28 = smov 64  }
 0x16c   : > { %7735 = vmatpush3.bf16.msra.mxu0 %v8158_v17  ;;  %7743 = vmatpush3.bf16.msra.mxu1 %v8159_v18  ;;  %v896_v59 = vunpack.c.l.s4 %v8680_v58  ;;  %v865_v60 = vunpack.c.0.s8 %v864_v57  ;;  %vm2704_vm5 = vcmask 195584   ;;  %vm7084_vm6 = vcmask 523264   ;;  %s10020_s23 = sld [smem:[#allocation34_spill]]  ;;  %s7633_s12 = sshll.u32 %s10011_s9, 7 }
 0x16d   : > { %7748 = vmatprep.subr.bf16.mxu0 %v8674_v16  ;;  %7756 = vmatprep.subr.bf16.mxu1 %v8674_v16  ;;  %vm7088_vm7 = vcmask 785408   ;;  %s582_s24 = scalar_lea.vmem [#allocation20], %s9111_s21  ;;  %s10021_s15 = sld [smem:[#allocation41_spill]] }
 0x16e   : > { %v897_v63 = vunpack.c.0.s8 %v896_v59  ;;  %s7316_s13 = sshll.u32 %s582_s24, 4  ;;  %s7303_s21 = scalar_lea.sflag [#allocation4], %s9108_s16  ;;  %s9891_s13 = int_to_ptr.vmem [resolvable:$true] %s7316_s13 }
 0x16f   : > { %s8569_s9 = scalar_lea.vmem %s9891_s13, 128  ;;  %s8687_s29 = smov [#allocation20]  }
 0x170   : > { %p8570_p2 = scmp.ne.s32.totalorder %s9891_s13, %s8569_s9  ;;  %s8573_s20 = sshll.u32 %s8687_s29, 4  ;;  %s8574_s20 = int_to_ptr.vmem [resolvable:$false] %s8573_s20 }
 0x171   : > { %p8576_p13 = scmp.lt.s32.totalorder %s9891_s13, %s8574_s20 }
 0x172   : > { %p10022_p10 = scmp.ne.s32.totalorder %s10020_s23, 0 }
 0x174   : > { %p8571_p7 = pnand %p8570_p2, %p10022_p10 }
 0x176   : > { %p8572_p9 = pneg %p8571_p7 }
 0x1f4   : > { %v618_v4 = vpop.xlane.xlu0 %617  ;;  %v591_v5 = vpop.xlane.xlu1 %590 }
 0x1f5   : > { %v619_v6 = vmul.f32 0.03125, %v618_v4  ;;  %v593_v7 = vmul.f32 0.03125, %v591_v5 }
 0x1f7   : > { %v620_v8 = vsub.f32 %v586_v0, %v619_v6  ;;  %v594_v9 = vsub.f32 %v585_v1, %v593_v7  ;;  %v9191_v0 = vsub.s32 %v865_v60, %v604_v28  ;;  %v9193_v6 = vsub.s32 %v897_v63, %v604_v28 }
 0x1f9   : > { %v621_v10 = vmul.f32 %v620_v8, %v620_v8  ;;  %v595_v11 = vmul.f32 %v594_v9, %v594_v9 }
 0x1fb   : > { %v622_v12 = vsel %vm588_vm0, %v621_v10, 0.0  ;;  %v596_v13 = vsel %vm588_vm0, %v595_v11, 0.0 }
 0x1fc   : > { %623 = vadd.xlane.f32.xlu0 %v622_v12  ;;  %597 = vadd.xlane.f32.xlu1 %v596_v13 }
 0x200   : > { %643 = vadd.xlane.f32.xlu0 %v642_v20 }
 0x289   : > { %v624_v21 = vpop.xlane.xlu0 %623  ;;  %v598_v22 = vpop.xlane.xlu1 %597 }
 0x28a   : > { %v625_v23 = vmul.f32 0.03125, %v624_v21  ;;  %v599_v24 = vmul.f32 0.03125, %v598_v22 }
 0x28c   : > { %v626_v26 = vadd.f32 1e-05, %v625_v23  ;;  %v600_v27 = vadd.f32 1e-05, %v599_v24 }
 0x28d   : > { %v644_v55 = vpop.xlane.xlu0 %643 }
 0x28e   : > { %8190 = vrsqrt.f32 %v626_v26 }
 0x28f   : > { %8192 = vrsqrt.f32 %v600_v27  ;;  %v645_v27 = vmul.f32 0.03125, %v644_v55 }
 0x291   : > { %v9209_v28 = vsub.f32 %v9162_v19, %v645_v27  ;;  %v8160_v19 = vld [vmem:[#allocation10 + $0x20] sm:$0xff]  }
 0x293   : > { %v647_v30 = vmul.f32 %v9209_v28, %v9209_v28 }
 0x295   : > { %v648_v31 = vsel %vm588_vm0, %v647_v30, 0.0 }
 0x298   : > { %v8191_v34 = vpop.eup %8190 }
 0x299   : > { %v8193_v36 = vpop.eup %8192  ;;  %v9172_v37 = vmul.f32 %v8191_v34, %v620_v8 }
 0x29a   : > { %v9175_v39 = vmul.f32 %v8193_v36, %v594_v9 }
 0x29b   : > { %v633_v41 = vmul.f32 %v632_v33, %v9172_v37 }
 0x29c   : > { %v607_v42 = vmul.f32 %v606_v35, %v9175_v39 }
 0x29d   : > { %v638_v43 = vadd.f32 %v637_v38, %v633_v41  ;;  %v8161_v41 = vld [vmem:[#allocation10 + $0x28] sm:$0xff]  }
 0x29e   : > { %v612_v44 = vadd.f32 %v611_v40, %v607_v42 }
 0x29f   : > { %v639_v45 = vpack.c.bf16 %v638_v43, %v638_v43 }
 0x2a0   : > { %v613_v46 = vpack.c.bf16 %v612_v44, %v612_v44 }
 0x2a1   : > { %7745 = vmatmul.mubr.msk.bf16.vlgmr.msra.gmra.mrb[0].mxu1 %vm588_vm0, %v639_v45 }
 0x2a2   : > { %7737 = vmatmul.mubr.msk.bf16.vlgmr.msra.gmra.mrb[0].mxu0 %vm588_vm0, %v613_v46  ;;  %7758 = vmatprep.mubr.msk.bf16.mxu1 %vm8675_vm1, %v8674_v16 }
 0x2a3   : > { %7752 = vmatprep.mubr.msk.bf16.mxu0 %vm8675_vm1, %v8674_v16  ;;  %7749 = vmatpush3.bf16.msra.mxu0 %v8160_v19 }
 0x2a4   : > { %7750 = vmatprep.subr.bf16.mxu0 %v8674_v16 }
 0x2a7   : > { %7751 = vmatpush3.bf16.msra.mxu0 %v8161_v41 }
 0x2a8   : > { %7762 = vmatprep.subr.bf16.mxu0 %v8674_v16 }
 0x374   : > { %v790_v47 = vpop.f32.mrb[0].mxu1 }
 0x375   : > { %v9186_v48 = vpop.f32.mrb[0].mxu0  ;;  %v7746_v49 = vpop.f32.mrb[1].mxu1  ;;  %938 = vrot.lane.b32.xlu1 %v790_v47, %s8676_s11  ;;  %941 = vrot.lane.b32.xlu0 %v790_v47, %s8677_s27 }
 0x376   : > { %v7738_v50 = vpop.f32.mrb[1].mxu0  ;;  %v793_v51 = vpop.f32.mrb[2].mxu1 }
 0x377   : > { %v738_v52 = vpop.f32.mrb[2].mxu0  ;;  %v7747_v53 = vpop.f32.mrb[3].mxu1 }
 0x378   : > { %v7739_v54 = vpop.f32.mrb[3].mxu0 }
 0x379   : > { %944 = vrot.lane.b32.xlu1 %v790_v47, %s8678_s26 }
 0x3e7   : > { %v939_v61 = vpop.permute.xlu1 %938  ;;  %v942_v62 = vpop.permute.xlu0 %941 }
 0x3e8   : > { %v947_v1 = vcombine.low %v790_v47, %v942_v62  ;;  %v948_v2 = vcombine.high %v790_v47, %v942_v62 }
 0x3ea   : > { %v955_v7 = vrot.slane %v947_v1, %v9191_v0  ;;  %v962_v8 = vrot.slane %v948_v2, %v9191_v0 }
 0x3eb   : > { %v945_v3 = vpop.permute.xlu1 %944 }
 0x3ec   : > { %v963_v4 = vcombine.low %v939_v61, %v945_v3  ;;  %v964_v5 = vcombine.high %v939_v61, %v945_v3 }
 0x3ee   : > { %v971_v9 = vrot.slane %v963_v4, %v9191_v0  ;;  %v978_v10 = vrot.slane %v964_v5, %v9191_v0 }
 0x3f0   : > { %v980_v11 = vcombine.high %v955_v7, %v971_v9  ;;  %v979_v12 = vcombine.low %v955_v7, %v971_v9  ;;  %v995_v13 = vcombine.low %v962_v8, %v978_v10  ;;  %v996_v21 = vcombine.high %v962_v8, %v978_v10 }
 0x3f2   : > { %v994_v14 = vrot.slane %v980_v11, %v9193_v6  ;;  %v987_v15 = vrot.slane %v979_v12, %v9193_v6  ;;  %v1003_v20 = vrot.slane %v995_v13, %v9193_v6  ;;  %v1010_v23 = vrot.slane %v996_v21, %v9193_v6 }
 0x3f3   : > { %v8681_v12 = vmov 0  }
 0x3f4   : > { %v1017_v17 = vpack.c.bf16 %v994_v14, %v994_v14  ;;  %v1015_v18 = vpack.c.bf16 %v987_v15, %v987_v15  ;;  %v1019_v22 = vpack.c.bf16 %v1003_v20, %v1003_v20  ;;  %v1021_v24 = vpack.c.bf16 %v1010_v23, %v1010_v23 }
 0x3f5   : > { %v1011_v25 = vcombine.high %v987_v15, %v8674_v16  ;;  %v1012_v33 = vcombine.high %v994_v14, %v8674_v16  ;;  %v1013_v35 = vcombine.high %v1003_v20, %v8674_v16  ;;  %v1014_v38 = vcombine.high %v1010_v23, %v8674_v16 }
 0x3f6   : > { %1203 = vxpose.xlu0.c.b16.start.end [1/1] (short) (narrow) %v1017_v17, 16  ;;  %1171 = vxpose.xlu1.c.b16.start.end [1/1] (short) (narrow) %v1015_v18, 16 }
 0x3f7   : > { %v1016_v26 = vpack.c.bf16 %v1011_v25, %v1011_v25  ;;  %v1018_v34 = vpack.c.bf16 %v1012_v33, %v1012_v33  ;;  %v1020_v36 = vpack.c.bf16 %v1013_v35, %v1013_v35  ;;  %v1022_v40 = vpack.c.bf16 %v1014_v38, %v1014_v38  ;;  %v641_v35 = vld [vmem:[#allocation8 + $0x4] sm:$0x3] }
 0x3f8   : > { %v658_v38 = vrot.slane %v641_v35, %v9166_v29  ;;  %v663_v41 = vrot.slane %v641_v35, %v9168_v32 }
 0x3fa   : > { %1235 = vxpose.xlu0.c.b16.start.end [1/1] (short) (narrow) %v1019_v22, 16  ;;  %852 = vrot.lane.b32.xlu1 %v9186_v48, %s8676_s11 }
 0x3fe   : > { %1267 = vxpose.xlu0.c.b16.start.end [1/1] (short) (narrow) %v1021_v24, 16  ;;  %855 = vrot.lane.b32.xlu1 %v9186_v48, %s8677_s27 }
 0x402   : > { %1187 = vxpose.xlu0.c.b16.start.end [1/1] (short) (narrow) %v1016_v26, 16 }
 0x40f   : > { %649 = vadd.xlane.f32.xlu0 %v648_v31 }
 0x421   : > { %1219 = vxpose.xlu1.c.b16.start.end [1/1] (short) (narrow) %v1018_v34, 16 }
 0x425   : > { %1251 = vxpose.xlu1.c.b16.start.end [1/1] (short) (narrow) %v1020_v36, 16 }
 0x429   : > { %1283 = vxpose.xlu1.c.b16.start.end [1/1] (short) (narrow) %v1022_v40, 16 }
 0x42d   : > { %858 = vrot.lane.b32.xlu1 %v9186_v48, %s8678_s26 }
 0x45c   : > { %v1179_v42 = vpop.trf.xlu1  ;;  %v1211_v43 = vpop.trf.xlu0 }
 0x460   : > { %v1243_v45 = vpop.trf.xlu0 }
 0x461   : > { %v1299_v50 = vcombine.low %v1179_v42, %v1243_v45 }
 0x463   : > { %v1306_v54 = vrot.slane %v1299_v50, %v9191_v0 }
 0x464   : > { %v1275_v47 = vpop.trf.xlu0 }
 0x465   : > { %v1307_v51 = vcombine.low %v1211_v43, %v1275_v47 }
 0x467   : > { %v1314_v55 = vrot.slane %v1307_v51, %v9191_v0 }
 0x468   : > { %v1195_v53 = vpop.trf.xlu0 }
 0x469   : > { %v1315_v58 = vcombine.low %v1306_v54, %v1314_v55  ;;  %v1316_v62 = vcombine.high %v1306_v54, %v1314_v55 }
 0x46b   : > { %v1323_v63 = vrot.slane %v1315_v58, %v9193_v6  ;;  %v1330_v9 = vrot.slane %v1316_v62, %v9193_v6 }
 0x46c   : > { %v9221_v44 = vpop.permute.xlu1 %852 }
 0x46d   : > { %v1371_v7 = vshrl.u32 %v1323_v63, 16  ;;  %v1387_v17 = vshrl.u32 %v1330_v9, 16  ;;  %v1332_v20 = vcombine.high %v1330_v9, %v8681_v12  ;;  %v1331_v23 = vcombine.high %v1323_v63, %v8681_v12 }
 0x46f   : > { %v1395_v27 = vshrl.u32 %v1332_v20, 16  ;;  %v1379_v33 = vshrl.u32 %v1331_v23, 16 }
 0x470   : > { %v9223_v46 = vpop.permute.xlu1 %855 }
 0x471   : > { %v861_v51 = vcombine.low %v9186_v48, %v9223_v46 }
 0x473   : > { %v869_v54 = vrot.slane %v861_v51, %v9191_v0 }
 0x487   : > { %v1227_v49 = vpop.trf.xlu1 }
 0x48b   : > { %v1259_v52 = vpop.trf.xlu1 }
 0x48c   : > { %v1333_v56 = vcombine.low %v1195_v53, %v1259_v52 }
 0x48e   : > { %v1340_v60 = vrot.slane %v1333_v56, %v9191_v0 }
 0x48f   : > { %v1291_v57 = vpop.trf.xlu1 }
 0x490   : > { %v1341_v59 = vcombine.low %v1227_v49, %v1291_v57 }
 0x492   : > { %v1348_v61 = vrot.slane %v1341_v59, %v9191_v0 }
 0x494   : > { %v1349_v1 = vcombine.low %v1340_v60, %v1348_v61  ;;  %v1350_v2 = vcombine.high %v1340_v60, %v1348_v61 }
 0x496   : > { %v1357_v3 = vrot.slane %v1349_v1, %v9193_v6  ;;  %v1364_v4 = vrot.slane %v1350_v2, %v9193_v6 }
 0x498   : > { %v1369_v5 = vpack.i.b16 %v1357_v3, %v1323_v63  ;;  %v1372_v8 = vshrl.u32 %v1357_v3, 16  ;;  %v1388_v11 = vshrl.u32 %v1364_v4, 16  ;;  %v1366_v13 = vcombine.high %v1364_v4, %v8681_v12 }
 0x499   : > { %v1385_v15 = vpack.i.b16 %v1364_v4, %v1330_v9  ;;  %v1365_v18 = vcombine.high %v1357_v3, %v8681_v12 }
 0x49a   : > { %1399 = vxpose.xlu1.c.b16.start.end [1/1] (short) (narrow) %v1369_v5, 16  ;;  %v1373_v10 = vpack.i.b16 %v1372_v8, %v1371_v7  ;;  %v1389_v22 = vpack.i.b16 %v1388_v11, %v1387_v17  ;;  %v1396_v24 = vshrl.u32 %v1366_v13, 16  ;;  %v1393_v36 = vpack.i.b16 %v1366_v13, %v1332_v20 }
 0x49b   : > { %v1377_v26 = vpack.i.b16 %v1365_v18, %v1331_v23  ;;  %v1380_v30 = vshrl.u32 %v1365_v18, 16 }
 0x49c   : > { %1415 = vxpose.xlu0.c.b16.start.end [1/1] (short) (narrow) %v1373_v10, 16  ;;  %v650_v14 = vpop.xlane.xlu0 %649  ;;  %v1397_v31 = vpack.i.b16 %v1396_v24, %v1395_v27 }
 0x49d   : > { %v651_v21 = vmul.f32 0.03125, %v650_v14  ;;  %v1381_v34 = vpack.i.b16 %v1380_v30, %v1379_v33 }
 0x49e   : > { %1463 = vxpose.xlu1.c.b16.start.end [1/1] (short) (narrow) %v1385_v15, 16 }
 0x49f   : > { %v652_v25 = vadd.f32 1e-05, %v651_v21  ;;  %v859_v47 = vpop.permute.xlu1 %858 }
 0x4a0   : > { %1479 = vxpose.xlu0.c.b16.start.end [1/1] (short) (narrow) %v1389_v22, 16  ;;  %v877_v49 = vcombine.low %v9221_v44, %v859_v47  ;;  %v878_v50 = vcombine.high %v9221_v44, %v859_v47 }
 0x4a1   : > { %8194 = vrsqrt.f32 %v652_v25 }
 0x4a2   : > { %1431 = vxpose.xlu1.c.b16.start.end [1/1] (short) (narrow) %v1377_v26, 16  ;;  %v885_v52 = vrot.slane %v877_v49, %v9191_v0  ;;  %v892_v53 = vrot.slane %v878_v50, %v9191_v0 }
 0x4a4   : > { %1511 = vxpose.xlu0.c.b16.start.end [1/1] (short) (narrow) %v1397_v31, 16  ;;  %v893_v56 = vcombine.low %v869_v54, %v885_v52  ;;  %v894_v57 = vcombine.high %v869_v54, %v885_v52 }
 0x4a6   : > { %1447 = vxpose.xlu1.c.b16.start.end [1/1] (short) (narrow) %v1381_v34, 16  ;;  %v901_v44 = vrot.slane %v893_v56, %v9193_v6  ;;  %v908_v61 = vrot.slane %v894_v57, %v9193_v6 }
 0x4a8   : > { %v925_v1 = vcombine.high %v901_v44, %v8674_v16  ;;  %v926_v2 = vcombine.high %v908_v61, %v8674_v16 }
 0x4aa   : > { %1495 = vxpose.xlu1.c.b16.start.end [1/1] (short) (narrow) %v1393_v36, 16 }
 0x4ab   : > { %v8195_v40 = vpop.eup %8194 }
 0x4ac   : > { %v654_v19 = vmul.f32 %v8195_v40, %v9209_v28  ;;  %v862_v28 = vcombine.high %v9186_v48, %v9223_v46 }
 0x4ae   : > { %v659_v42 = vmul.f32 %v658_v38, %v654_v19  ;;  %v876_v55 = vrot.slane %v862_v28, %v9191_v0 }
 0x4b0   : > { %v664_v43 = vadd.f32 %v663_v41, %v659_v42  ;;  %v909_v58 = vcombine.low %v876_v55, %v892_v53  ;;  %v910_v59 = vcombine.high %v876_v55, %v892_v53 }
 0x4b2   : > { %v665_v45 = vpack.c.bf16 %v664_v43, %v664_v43  ;;  %v917_v62 = vrot.slane %v909_v58, %v9193_v6  ;;  %v924_v48 = vrot.slane %v910_v59, %v9193_v6 }
 0x4b4   : > { %7753 = vmatmul.mubr.msk.bf16.vlgmr.msra.gmra.mrb[4].mxu0 %vm588_vm0, %v665_v45  ;;  %v927_v3 = vcombine.high %v917_v62, %v8674_v16  ;;  %v928_v4 = vcombine.high %v924_v48, %v8674_v16  ;;  %v7544_v13 = vpack.c.bf16 %v917_v62, %v901_v44  ;;  %v7545_v14 = vpack.c.bf16 %v924_v48, %v908_v61 }
 0x4b5   : > { %7764 = vmatprep.mubr.msk.bf16.mxu0 %vm8675_vm1, %v8674_v16 }
 0x4b6   : > { %v7546_v8 = vpack.c.bf16 %v927_v3, %v925_v1  ;;  %v7547_v9 = vpack.c.bf16 %v928_v4, %v926_v2  ;;  %v1116_v24 = vrot.slane %v7544_v13, %v9191_v0  ;;  %v1124_v25 = vrot.slane %v7545_v14, %v9191_v0 }
 0x4b8   : > { %v1141_v18 = vrot.slane %v7546_v8, %v9191_v0  ;;  %v1149_v20 = vrot.slane %v7547_v9, %v9191_v0  ;;  %v1125_v36 = vcombine.low %v1116_v24, %v1124_v25 }
 0x4ba   : > { %v1150_v31 = vcombine.low %v1141_v18, %v1149_v20  ;;  %v1132_v42 = vrot.slane %v1125_v36, %v9193_v6 }
 0x4bc   : > { %v1157_v40 = vrot.slane %v1150_v31, %v9193_v6  ;;  %v1162_v57 = vshrl.u32 %v1132_v42, 16  ;;  %v1133_v62 = vcombine.high %v1132_v42, %v8681_v12 }
 0x4be   : > { %v1163_v50 = vshrl.u32 %v1157_v40, 16  ;;  %v1161_v56 = vpack.i.b16 %v1157_v40, %v1132_v42  ;;  %v1158_v44 = vcombine.high %v1157_v40, %v8681_v12 }
 0x4c0   : > { %v1169_v48 = vshrl.u32 %v1158_v44, 16 }
 0x500   : > { %v1407_v60 = vpop.trf.xlu1 }
 0x502   : > { %v1423_v46 = vpop.trf.xlu0 }
 0x504   : > { %v1471_v63 = vpop.trf.xlu1 }
 0x505   : > { %v1527_v21 = vcombine.low %v1407_v60, %v1471_v63  ;;  %v1164_v60 = vpack.i.b16 %v1163_v50, %v1162_v57  ;;  %v1168_v63 = vshrl.u32 %v1133_v62, 16 }
 0x506   : > { %v1487_v5 = vpop.trf.xlu0 }
 0x507   : > { %v1552_v11 = vcombine.low %v1423_v46, %v1487_v5  ;;  %v1534_v33 = vrot.slane %v1527_v21, %v9191_v0  ;;  %v1167_v46 = vpack.i.b16 %v1158_v44, %v1133_v62  ;;  %v1170_v1 = vpack.i.b16 %v1169_v48, %v1168_v63 }
 0x508   : > { %v1439_v7 = vpop.trf.xlu1 }
 0x509   : > { %v1559_v22 = vrot.slane %v1552_v11, %v9191_v0 }
 0x50a   : > { %v1519_v10 = vpop.trf.xlu0 }
 0x50c   : > { %v1455_v15 = vpop.trf.xlu1 }
 0x50d   : > { %v1560_v17 = vcombine.low %v1455_v15, %v1519_v10 }
 0x50f   : > { %v1567_v23 = vrot.slane %v1560_v17, %v9191_v0 }
 0x510   : > { %v1503_v26 = vpop.trf.xlu1 }
 0x511   : > { %v1568_v27 = vcombine.low %v1559_v22, %v1567_v23  ;;  %v1535_v30 = vcombine.low %v1439_v7, %v1503_v26 }
 0x513   : > { %v1575_v34 = vrot.slane %v1568_v27, %v9193_v6  ;;  %v1542_v35 = vrot.slane %v1535_v30, %v9191_v0 }
 0x515   : > { %v1543_v38 = vcombine.low %v1534_v33, %v1542_v35  ;;  %v1576_v19 = vcombine.high %v1575_v34, %v8681_v12  ;;  %v1581_v47 = vshrl.u32 %v1575_v34, 16 }
 0x517   : > { %v1550_v41 = vrot.slane %v1543_v38, %v9193_v6  ;;  %v1587_v51 = vshrl.u32 %v1576_v19, 16 }
 0x519   : > { %v1579_v43 = vpack.i.b16 %v1575_v34, %v1550_v41  ;;  %v1580_v45 = vshrl.u32 %v1550_v41, 16  ;;  %v1551_v49 = vcombine.high %v1550_v41, %v8681_v12 }
 0x51b   : > { %v1595_v28 = vsel %vm1593_vm2, %v1579_v43, 0  ;;  %v1582_v52 = vpack.i.b16 %v1581_v47, %v1580_v45  ;;  %v1585_v53 = vpack.i.b16 %v1576_v19, %v1551_v49  ;;  %v1586_v54 = vshrl.u32 %v1551_v49, 16 }
 0x51c   : > { %7757 = vmatpush3.bf16.msra.mxu1 %v1595_v28 }
 0x51d   : > { %v1641_v55 = vsel %vm1593_vm2, %v1582_v52, 0  ;;  %7768 = vmatprep.subr.bf16.mxu1 %v8674_v16  ;;  %v1588_v58 = vpack.i.b16 %v1587_v51, %v1586_v54  ;;  %v1687_v59 = vsel %vm1593_vm2, %v1585_v53, 0 }
 0x51e   : > { %7763 = vmatpush3.bf16.msra.mxu0 %v1641_v55 }
 0x51f   : > { %7759 = vmatmul.mubr.msk.bf16.vlgmr.msra.gmra.mrb[4].mxu1 %vm1589_vm3, %v1161_v56  ;;  %7774 = vmatprep.subr.bf16.mxu0 %v8674_v16  ;;  %v1733_v61 = vsel %vm1593_vm2, %v1588_v58, 0 }
 0x520   : > { %7769 = vmatpush3.bf16.msra.mxu1 %v1687_v59  ;;  %7770 = vmatprep.mubr.msk.bf16.mxu1 %vm8675_vm1, %v8674_v16 }
 0x521   : > { %7765 = vmatmul.mubr.msk.bf16.vlgmr.msra.gmra.mrb[8].mxu0 %vm1589_vm3, %v1164_v60  ;;  %7780 = vmatprep.subr.bf16.mxu1 %v8674_v16 }
 0x522   : > { %7775 = vmatpush3.bf16.msra.mxu0 %v1733_v61  ;;  %7776 = vmatprep.mubr.msk.bf16.mxu0 %vm8675_vm1, %v8674_v16 }
 0x523   : > { %7786 = vmatprep.subr.bf16.mxu0 %v8674_v16 }
 0x527   : > { %7771 = vmatmul.mubr.msk.bf16.vlgmr.msra.gmra.mrb[8].mxu1 %vm1589_vm3, %v1167_v46 }
 0x528   : > { %7782 = vmatprep.mubr.msk.bf16.mxu1 %vm8675_vm1, %v8674_v16 }
 0x529   : > { %7777 = vmatmul.mubr.msk.bf16.vlgmr.msra.gmra.mrb[12].mxu0 %vm1589_vm3, %v1170_v1 }
 0x52a   : > { %7788 = vmatprep.mubr.msk.bf16.mxu0 %vm8675_vm1, %v8674_v16 }
 0x587   : > { %v845_v2 = vpop.f32.mrb[4].mxu0 }
 0x588   : > { %1027 = vrot.lane.b32.xlu0 %v845_v2, %s8677_s27  ;;  %1024 = vrot.lane.b32.xlu1 %v845_v2, %s8676_s11  ;;  %v7754_v3 = vpop.f32.mrb[5].mxu0 }
 0x589   : > { %v848_v4 = vpop.f32.mrb[6].mxu0 }
 0x58a   : > { %v7755_v5 = vpop.f32.mrb[7].mxu0 }
 0x58c   : > { %1030 = vrot.lane.b32.xlu1 %v845_v2, %s8678_s26 }
 0x5f2   : > { %v9300_v7 = vpop.f32.mrb[4].mxu1 }
 0x5f3   : > { %v7760_v8 = vpop.f32.mrb[5].mxu1  ;;  %v1775_v9 = vsel %vm1589_vm3, %v9300_v7, -inf }
 0x5f4   : > { %v9304_v10 = vpop.f32.mrb[8].mxu0  ;;  %1776 = vmax.xlane.f32.xlu1 %v1775_v9  ;;  %v1634_v11 = vpop.f32.mrb[6].mxu1 }
 0x5f5   : > { %v7761_v13 = vpop.f32.mrb[7].mxu1  ;;  %v7766_v14 = vpop.f32.mrb[9].mxu0  ;;  %v1778_v15 = vsel %vm1589_vm3, %v9304_v10, -inf }
 0x5f6   : > { %1779 = vmax.xlane.f32.xlu0 %v1778_v15  ;;  %v1680_v17 = vpop.f32.mrb[10].mxu0 }
 0x5f7   : > { %v7767_v18 = vpop.f32.mrb[11].mxu0 }
 0x5fa   : > { %v9308_v20 = vpop.f32.mrb[8].mxu1  ;;  %v1025_v30 = vpop.permute.xlu1 %1024 }
 0x5fb   : > { %v7772_v21 = vpop.f32.mrb[9].mxu1  ;;  %v1028_v33 = vpop.permute.xlu0 %1027  ;;  %v1781_v45 = vsel %vm1589_vm3, %v9308_v20, -inf }
 0x5fc   : > { %v1726_v22 = vpop.f32.mrb[10].mxu1  ;;  %v9310_v23 = vpop.f32.mrb[12].mxu0  ;;  %v1033_v35 = vcombine.low %v845_v2, %v1028_v33  ;;  %v1034_v50 = vcombine.high %v845_v2, %v1028_v33 }
 0x5fd   : > { %v7773_v24 = vpop.f32.mrb[11].mxu1  ;;  %v7778_v25 = vpop.f32.mrb[13].mxu0  ;;  %v1784_v47 = vsel %vm1589_vm3, %v9310_v23, -inf }
 0x5fe   : > { %v1772_v26 = vpop.f32.mrb[14].mxu0  ;;  %v1031_v31 = vpop.permute.xlu1 %1030  ;;  %v1041_v38 = vrot.slane %v1033_v35, %v9191_v0  ;;  %v1048_v52 = vrot.slane %v1034_v50, %v9191_v0 }
 0x5ff   : > { %v7779_v27 = vpop.f32.mrb[15].mxu0  ;;  %v1049_v34 = vcombine.low %v1025_v30, %v1031_v31  ;;  %v1050_v49 = vcombine.high %v1025_v30, %v1031_v31 }
 0x601   : > { %v1057_v36 = vrot.slane %v1049_v34, %v9191_v0  ;;  %v1064_v51 = vrot.slane %v1050_v49, %v9191_v0 }
 0x603   : > { %v1065_v40 = vcombine.low %v1041_v38, %v1057_v36  ;;  %v1066_v28 = vcombine.high %v1041_v38, %v1057_v36  ;;  %v1081_v54 = vcombine.low %v1048_v52, %v1064_v51  ;;  %v1082_v57 = vcombine.high %v1048_v52, %v1064_v51 }
 0x605   : > { %v1073_v19 = vrot.slane %v1065_v40, %v9193_v6  ;;  %v1080_v53 = vrot.slane %v1066_v28, %v9193_v6  ;;  %v1089_v56 = vrot.slane %v1081_v54, %v9193_v6  ;;  %v1096_v60 = vrot.slane %v1082_v57, %v9193_v6 }
 0x607   : > { %v1097_v41 = vcombine.high %v1073_v19, %v8674_v16  ;;  %v1101_v42 = vpack.c.bf16 %v1073_v19, %v1073_v19  ;;  %v1098_v55 = vcombine.high %v1080_v53, %v8674_v16  ;;  %v1099_v59 = vcombine.high %v1089_v56, %v8674_v16 }
 0x608   : > { %v1103_v44 = vpack.c.bf16 %v1080_v53, %v1080_v53  ;;  %v1100_v62 = vcombine.high %v1096_v60, %v8674_v16  ;;  %v1105_v48 = vpack.c.bf16 %v1089_v56, %v1089_v56  ;;  %v1107_v63 = vpack.c.bf16 %v1096_v60, %v1096_v60 }
 0x609   : > { %v1102_v43 = vpack.c.bf16 %v1097_v41, %v1097_v41  ;;  %v1104_v58 = vpack.c.bf16 %v1098_v55, %v1098_v55  ;;  %v1106_v61 = vpack.c.bf16 %v1099_v59, %v1099_v59 }
 0x60a   : > { %v1108_v46 = vpack.c.bf16 %v1100_v62, %v1100_v62 }
 0x621   : > { %1823 = vxpose.xlu1.c.b16.start.end [1/1] (short) (narrow) %v1101_v42, 16 }
 0x623   : > { %1839 = vxpose.xlu0.c.b16.start.end [1/1] (short) (narrow) %v1102_v43, 16 }
 0x62e   : > { %1782 = vmax.xlane.f32.xlu1 %v1781_v45 }
 0x630   : > { %1785 = vmax.xlane.f32.xlu0 %v1784_v47 }
 0x65b   : > { %1871 = vxpose.xlu1.c.b16.start.end [1/1] (short) (narrow) %v1104_v58, 16 }
 0x65d   : > { %1855 = vxpose.xlu0.c.b16.start.end [1/1] (short) (narrow) %v1103_v44, 16 }
 0x65f   : > { %1903 = vxpose.xlu1.c.b16.start.end [1/1] (short) (narrow) %v1106_v61, 16 }
 0x661   : > { %1887 = vxpose.xlu0.c.b16.start.end [1/1] (short) (narrow) %v1105_v48, 16 }
 0x663   : > { %1935 = vxpose.xlu1.c.b16.start.end [1/1] (short) (narrow) %v1108_v46, 16 }
 0x665   : > { %1919 = vxpose.xlu0.c.b16.start.end [1/1] (short) (narrow) %v1107_v63, 16 }
 0x681   : > { %v1777_v1 = vpop.xlane.xlu1 %1776 }
 0x682   : > { %v1787_v45 = vsub.f32 %v9300_v7, %v1777_v1 }
 0x683   : > { %v1780_v2 = vpop.xlane.xlu0 %1779 }
 0x684   : > { %v1788_v51 = vsub.f32 %v9304_v10, %v1780_v2  ;;  %v1791_v54 = vmul.f32 1.442695, %v1787_v45 }
 0x686   : > { %v1793_v58 = vmul.f32 1.442695, %v1788_v51  ;;  %8196 = vpow2.f32 %v1791_v54 }
 0x687   : > { %v1831_v3 = vpop.trf.xlu1 }
 0x688   : > { %8198 = vpow2.f32 %v1793_v58 }
 0x689   : > { %v1847_v4 = vpop.trf.xlu0 }
 0x690   : > { %v8197_v62 = vpop.eup %8196 }
 0x691   : > { %v1799_v48 = vsel %vm1589_vm3, %v8197_v62, 0.0 }
 0x6bb   : > { %v1783_v5 = vpop.xlane.xlu1 %1782 }
 0x6bc   : > { %v1789_v55 = vsub.f32 %v9308_v20, %v1783_v5  ;;  %v8199_v20 = vpop.eup %8198 }
 0x6bd   : > { %v1786_v8 = vpop.xlane.xlu0 %1785 }
 0x6be   : > { %v1790_v7 = vsub.f32 %v9310_v23, %v1786_v8  ;;  %v1795_v44 = vmul.f32 1.442695, %v1789_v55  ;;  %v1802_v23 = vsel %vm1589_vm3, %v8199_v20, 0.0 }
 0x6c0   : > { %v1797_v61 = vmul.f32 1.442695, %v1790_v7  ;;  %8200 = vpow2.f32 %v1795_v44 }
 0x6c1   : > { %v1879_v9 = vpop.trf.xlu1 }
 0x6c2   : > { %8202 = vpow2.f32 %v1797_v61 }
 0x6c3   : > { %v1863_v11 = vpop.trf.xlu0 }
 0x6c5   : > { %v1911_v13 = vpop.trf.xlu1 }
 0x6c6   : > { %v1985_v15 = vcombine.low %v1847_v4, %v1911_v13 }
 0x6c7   : > { %v1895_v14 = vpop.trf.xlu0 }
 0x6c8   : > { %v1951_v18 = vcombine.low %v1831_v3, %v1895_v14  ;;  %v1992_v24 = vrot.slane %v1985_v15, %v9191_v0 }
 0x6c9   : > { %v1943_v17 = vpop.trf.xlu1 }
 0x6ca   : > { %v1993_v21 = vcombine.low %v1879_v9, %v1943_v17  ;;  %v1958_v27 = vrot.slane %v1951_v18, %v9191_v0  ;;  %v8201_v46 = vpop.eup %8200 }
 0x6cb   : > { %v1927_v22 = vpop.trf.xlu0  ;;  %v1805_v1 = vsel %vm1589_vm3, %v8201_v46, 0.0 }
 0x6cc   : > { %v2000_v25 = vrot.slane %v1993_v21, %v9191_v0  ;;  %v1959_v26 = vcombine.low %v1863_v11, %v1927_v22  ;;  %v8203_v63 = vpop.eup %8202 }
 0x6cd   : > { %v1808_v2 = vsel %vm1589_vm3, %v8203_v63, 0.0 }
 0x6ce   : > { %v2001_v30 = vcombine.low %v1992_v24, %v2000_v25  ;;  %v1966_v31 = vrot.slane %v1959_v26, %v9191_v0  ;;  %v2002_v38 = vcombine.high %v1992_v24, %v2000_v25 }
 0x6d0   : > { %v1967_v33 = vcombine.low %v1958_v27, %v1966_v31  ;;  %v2009_v34 = vrot.slane %v2001_v30, %v9193_v6  ;;  %v1968_v35 = vcombine.high %v1958_v27, %v1966_v31  ;;  %v2016_v53 = vrot.slane %v2002_v38, %v9193_v6 }
 0x6d2   : > { %v1975_v36 = vrot.slane %v1967_v33, %v9193_v6  ;;  %v2024_v40 = vshrl.u32 %v2009_v34, 16  ;;  %v2017_v43 = vcombine.high %v2009_v34, %v8681_v12  ;;  %v1982_v50 = vrot.slane %v1968_v35, %v9193_v6 }
 0x6d3   : > { %v2040_v60 = vshrl.u32 %v2016_v53, 16  ;;  %v2018_v4 = vcombine.high %v2016_v53, %v8681_v12 }
 0x6d4   : > { %v2021_v19 = vpack.i.b16 %v2009_v34, %v1975_v36  ;;  %v2023_v41 = vshrl.u32 %v1975_v36, 16  ;;  %v1983_v42 = vcombine.high %v1975_v36, %v8681_v12  ;;  %v2032_v52 = vshrl.u32 %v2017_v43, 16 }
 0x6d5   : > { %v2039_v57 = vshrl.u32 %v1982_v50, 16  ;;  %v2037_v59 = vpack.i.b16 %v2016_v53, %v1982_v50  ;;  %v1984_v3 = vcombine.high %v1982_v50, %v8681_v12  ;;  %v2048_v9 = vshrl.u32 %v2018_v4, 16 }
 0x6d6   : > { %2051 = vxpose.xlu0.c.b16.start.end [1/1] (short) (narrow) %v2021_v19, 16  ;;  %v2025_v47 = vpack.i.b16 %v2024_v40, %v2023_v41  ;;  %v2031_v49 = vshrl.u32 %v1983_v42, 16  ;;  %v2029_v28 = vpack.i.b16 %v2017_v43, %v1983_v42 }
 0x6d7   : > { %v2041_v10 = vpack.i.b16 %v2040_v60, %v2039_v57  ;;  %v2047_v5 = vshrl.u32 %v1984_v3, 16  ;;  %v2045_v8 = vpack.i.b16 %v2018_v4, %v1984_v3 }
 0x6d8   : > { %2067 = vxpose.xlu1.c.b16.start.end [1/1] (short) (narrow) %v2025_v47, 16  ;;  %v2033_v56 = vpack.i.b16 %v2032_v52, %v2031_v49 }
 0x6d9   : > { %v2049_v11 = vpack.i.b16 %v2048_v9, %v2047_v5 }
 0x6da   : > { %2083 = vxpose.xlu0.c.b16.start.end [1/1] (short) (narrow) %v2029_v28, 16 }
 0x6dc   : > { %2099 = vxpose.xlu1.c.b16.start.end [1/1] (short) (narrow) %v2033_v56, 16 }
 0x6de   : > { %2115 = vxpose.xlu0.c.b16.start.end [1/1] (short) (narrow) %v2037_v59, 16 }
 0x6e0   : > { %2131 = vxpose.xlu1.c.b16.start.end [1/1] (short) (narrow) %v2041_v10, 16 }
 0x6eb   : > { %1800 = vadd.xlane.f32.xlu0 %v1799_v48 }
 0x6ed   : > { %1803 = vadd.xlane.f32.xlu1 %v1802_v23 }
 0x6ef   : > { %1806 = vadd.xlane.f32.xlu0 %v1805_v1 }
 0x6f1   : > { %1809 = vadd.xlane.f32.xlu1 %v1808_v2 }
 0x71c   : > { %2147 = vxpose.xlu0.c.b16.start.end [1/1] (short) (narrow) %v2045_v8, 16 }
 0x71e   : > { %2163 = vxpose.xlu1.c.b16.start.end [1/1] (short) (narrow) %v2049_v11, 16 }
 0x73c   : > { %v2059_v13 = vpop.trf.xlu0 }
 0x73e   : > { %v2075_v14 = vpop.trf.xlu1 }
 0x740   : > { %v2091_v15 = vpop.trf.xlu0 }
 0x742   : > { %v2107_v17 = vpop.trf.xlu1 }
 0x744   : > { %v2123_v18 = vpop.trf.xlu0 }
 0x745   : > { %v2179_v27 = vcombine.low %v2059_v13, %v2123_v18 }
 0x746   : > { %v2139_v21 = vpop.trf.xlu1 }
 0x747   : > { %v2204_v33 = vcombine.low %v2075_v14, %v2139_v21  ;;  %v2186_v40 = vrot.slane %v2179_v27, %v9191_v0 }
 0x749   : > { %v2211_v47 = vrot.slane %v2204_v33, %v9191_v0 }
 0x778   : > { %v1801_v22 = vpop.xlane.xlu0 %1800 }
 0x779   : > { %8204 = vrcp.f32 %v1801_v22 }
 0x77a   : > { %v1804_v24 = vpop.xlane.xlu1 %1803 }
 0x77b   : > { %8206 = vrcp.f32 %v1804_v24 }
 0x77c   : > { %v1807_v25 = vpop.xlane.xlu0 %1806 }
 0x77d   : > { %8208 = vrcp.f32 %v1807_v25 }
 0x77e   : > { %v1810_v26 = vpop.xlane.xlu1 %1809 }
 0x77f   : > { %8210 = vrcp.f32 %v1810_v26 }
 0x782   : > { %v2155_v30 = vpop.trf.xlu0 }
 0x783   : > { %v8205_v31 = vpop.eup %8204  ;;  %v2187_v34 = vcombine.low %v2091_v15, %v2155_v30 }
 0x784   : > { %v2171_v35 = vpop.trf.xlu1  ;;  %v1815_v36 = vmul.f32 %v8205_v31, %v8197_v62 }
 0x785   : > { %v8207_v38 = vpop.eup %8206  ;;  %v2194_v19 = vrot.slane %v2187_v34, %v9191_v0  ;;  %v2212_v41 = vcombine.low %v2107_v17, %v2171_v35 }
 0x786   : > { %v1819_v42 = vpack.c.bf16 %v1815_v36, %v1815_v36  ;;  %v1816_v43 = vmul.f32 %v8207_v38, %v8199_v20 }
 0x787   : > { %v8209_v45 = vpop.eup %8208  ;;  %v2195_v49 = vcombine.low %v2186_v40, %v2194_v19  ;;  %v2219_v50 = vrot.slane %v2212_v41, %v9191_v0 }
 0x788   : > { %v2245_v51 = vsel %vm1589_vm3, %v1819_v42, 0  ;;  %v1820_v28 = vpack.c.bf16 %v1816_v43, %v1816_v43  ;;  %v1817_v52 = vmul.f32 %v8209_v45, %v8201_v46 }
 0x789   : > { %v8211_v53 = vpop.eup %8210  ;;  %v2202_v54 = vrot.slane %v2195_v49, %v9193_v6  ;;  %v2220_v55 = vcombine.low %v2211_v47, %v2219_v50  ;;  %7781 = vmatpush3.bf16.xpose.msra.mxu1 %v2245_v51  ;;  %v8162_v50 = vld [vmem:[#allocation10 + $0x30] sm:$0xff]  }
 0x78a   : > { %v2291_v56 = vsel %vm1589_vm3, %v1820_v28, 0  ;;  %7792 = vmatprep.subr.bf16.mxu1 %v8674_v16  ;;  %v1818_v57 = vmul.f32 %v8211_v53, %v8203_v63  ;;  %v1821_v7 = vpack.c.bf16 %v1817_v52, %v1817_v52 }
 0x78b   : > { %v2227_v58 = vrot.slane %v2220_v55, %v9193_v6  ;;  %7787 = vmatpush3.bf16.xpose.msra.mxu0 %v2291_v56  ;;  %v2232_v59 = vshrl.u32 %v2202_v54, 16  ;;  %v2203_v48 = vcombine.high %v2202_v54, %v8681_v12 }
 0x78c   : > { %7798 = vmatprep.subr.bf16.mxu0 %v8674_v16  ;;  %v1822_v10 = vpack.c.bf16 %v1818_v57, %v1818_v57  ;;  %v2337_v20 = vsel %vm1589_vm3, %v1821_v7, 0 }
 0x78d   : > { %v2233_v60 = vshrl.u32 %v2227_v58, 16  ;;  %v2231_v44 = vpack.i.b16 %v2227_v58, %v2202_v54  ;;  %v2228_v62 = vcombine.high %v2227_v58, %v8681_v12  ;;  %v2238_v1 = vshrl.u32 %v2203_v48, 16  ;;  %v8163_v58 = vld [vmem:[#allocation10 + $0x38] sm:$0xff]  }
 0x78e   : > { %v2383_v46 = vsel %vm1589_vm3, %v1822_v10, 0 }
 0x78f   : > { %v2234_v61 = vpack.i.b16 %v2233_v60, %v2232_v59  ;;  %v2239_v23 = vshrl.u32 %v2228_v62, 16  ;;  %v2237_v63 = vpack.i.b16 %v2228_v62, %v2203_v48 }
 0x790   : > { %7783 = vmatmul.mubr.msk.bf16.vlgmr.msra.gmra.mrb[12].mxu1 %vm1589_vm3, %v2231_v44 }
 0x791   : > { %7793 = vmatpush3.bf16.xpose.msra.mxu1 %v2337_v20  ;;  %7794 = vmatprep.mubr.msk.bf16.mxu1 %vm8675_vm1, %v8674_v16  ;;  %v2240_v2 = vpack.i.b16 %v2239_v23, %v2238_v1 }
 0x792   : > { %7789 = vmatmul.mubr.msk.bf16.vlgmr.msra.gmra.mrb[16].mxu0 %vm1589_vm3, %v2234_v61  ;;  %7804 = vmatprep.subr.bf16.mxu1 %v8674_v16 }
 0x793   : > { %7799 = vmatpush3.bf16.xpose.msra.mxu0 %v2383_v46  ;;  %7800 = vmatprep.mubr.msk.bf16.mxu0 %vm8675_vm1, %v8674_v16 }
 0x794   : > { %7812 = vmatprep.subr.bf16.mxu0 %v8674_v16 }
 0x798   : > { %7795 = vmatmul.mubr.msk.bf16.vlgmr.msra.gmra.mrb[16].mxu1 %vm1589_vm3, %v2237_v63 }
 0x799   : > { %7808 = vmatprep.mubr.msk.bf16.mxu1 %vm8675_vm1, %v8674_v16  ;;  %7805 = vmatpush3.bf16.msra.mxu1 %v8162_v50 }
 0x79a   : > { %7801 = vmatmul.mubr.msk.bf16.vlgmr.msra.gmra.mrb[20].mxu0 %vm1589_vm3, %v2240_v2  ;;  %7806 = vmatprep.subr.bf16.mxu1 %v8674_v16 }
 0x79b   : > { %7816 = vmatprep.mubr.msk.bf16.mxu0 %vm8675_vm1, %v8674_v16 }
 0x79d   : > { %7807 = vmatpush3.bf16.msra.mxu1 %v8163_v58 }
 0x79e   : > { %7820 = vmatprep.subr.bf16.mxu1 %v8674_v16 }
 0x863   : > { %v2281_v3 = vpop.f32.mrb[12].mxu1 }
 0x864   : > { %2425 = vxpose.xlu0.b32.start.end [1/1] (short) (narrow) %v2281_v3, 8  ;;  %v7784_v4 = vpop.f32.mrb[13].mxu1 }
 0x865   : > { %v2284_v5 = vpop.f32.mrb[14].mxu1  ;;  %v2327_v8 = vpop.f32.mrb[16].mxu0 }
 0x866   : > { %2457 = vxpose.xlu1.b32.start.end [1/1] (short) (narrow) %v2327_v8, 8  ;;  %v7785_v9 = vpop.f32.mrb[15].mxu1  ;;  %v7790_v11 = vpop.f32.mrb[17].mxu0  ;;  %v2796_v5 = vld [vmem:[#allocation8 + $0x8] sm:$0x3] }
 0x867   : > { %v2330_v13 = vpop.f32.mrb[18].mxu0 }
 0x868   : > { %v7791_v14 = vpop.f32.mrb[19].mxu0  ;;  %v2800_v13 = vrot.slane %v2796_v5, %v9166_v29 }
 0x86b   : > { %v2373_v15 = vpop.f32.mrb[16].mxu1 }
 0x86c   : > { %2489 = vxpose.xlu0.b32.start.end [1/1] (short) (narrow) %v2373_v15, 8  ;;  %v7796_v17 = vpop.f32.mrb[17].mxu1 }
 0x86d   : > { %v2376_v18 = vpop.f32.mrb[18].mxu1  ;;  %v2419_v21 = vpop.f32.mrb[20].mxu0 }
 0x86e   : > { %v7797_v22 = vpop.f32.mrb[19].mxu1  ;;  %v7802_v24 = vpop.f32.mrb[21].mxu0  ;;  %v8164_v18 = vld [vmem:[#allocation10 + $0x50] sm:$0xff]  }
 0x86f   : > { %v2422_v25 = vpop.f32.mrb[22].mxu0  ;;  %v2801_v22 = vmul.f32 %v2800_v13, %v9172_v37  ;;  %v2805_v24 = vrot.slane %v2796_v5, %v9168_v32 }
 0x870   : > { %v7803_v26 = vpop.f32.mrb[23].mxu0  ;;  %2521 = vxpose.xlu0.b32.start.end [1/1] (short) (narrow) %v2419_v21, 8  ;;  %v8165_v25 = vld [vmem:[#allocation10 + $0x58] sm:$0xff]  }
 0x871   : > { %v2806_v26 = vadd.f32 %v2805_v24, %v2801_v22 }
 0x8e4   : > { %v2441_v27 = vpop.trf.xlu0 }
 0x8e6   : > { %v2473_v31 = vpop.trf.xlu1 }
 0x8ec   : > { %v2505_v30 = vpop.trf.xlu0 }
 0x8ed   : > { %v2553_v33 = vcombine.low %v2441_v27, %v2505_v30  ;;  %v2554_v34 = vcombine.high %v2441_v27, %v2505_v30  ;;  %v2807_v27 = vpack.c.bf16 %v2806_v26, %v2806_v26  ;;  %v7558_v30 = vld [vmem:[#allocation11] ss:$0 sm:$0xff] }
 0x8ef   : > { %v2561_v40 = vrot.slane %v2553_v33, %v9191_v0  ;;  %v2568_v19 = vrot.slane %v2554_v34, %v9191_v0 }
 0x8f0   : > { %v2537_v35 = vpop.trf.xlu0 }
 0x8f1   : > { %v2569_v36 = vcombine.low %v2473_v31, %v2537_v35  ;;  %v2570_v38 = vcombine.high %v2473_v31, %v2537_v35 }
 0x8f3   : > { %v2577_v41 = vrot.slane %v2569_v36, %v9191_v0  ;;  %v2584_v42 = vrot.slane %v2570_v38, %v9191_v0  ;;  %v8252_v36 = vld [vmem:[%s484_s5] sm:$0xff]  ;;  %s9889_s5 = scalar_lea.hbm %s10021_s15, %s7633_s12 }
 0x8f5   : > { %v2585_v43 = vcombine.low %v2561_v40, %v2577_v41  ;;  %v2586_v45 = vcombine.high %v2561_v40, %v2577_v41  ;;  %v2601_v47 = vcombine.low %v2568_v19, %v2584_v42  ;;  %v2602_v49 = vcombine.high %v2568_v19, %v2584_v42 }
 0x8f7   : > { %v2593_v51 = vrot.slane %v2585_v43, %v9193_v6  ;;  %v2600_v28 = vrot.slane %v2586_v45, %v9193_v6  ;;  %v2609_v52 = vrot.slane %v2601_v47, %v9193_v6  ;;  %v2616_v53 = vrot.slane %v2602_v49, %v9193_v6 }
 0x8f9   : > { %v2621_v54 = vcombine.low %v2593_v51, %v2600_v28  ;;  %v7556_v55 = vcombine.high %v2593_v51, %v2600_v28  ;;  %v2637_v56 = vcombine.low %v2609_v52, %v2616_v53  ;;  %v7557_v57 = vcombine.high %v2609_v52, %v2616_v53  ;;  %v8166_v52 = vld [vmem:[#allocation10 + $0x40] sm:$0xff]   ;;  %v8167_v53 = vld [vmem:[#allocation10 + $0x48] sm:$0xff]  }
 0x8fa   : > { %7813 = vmatpush3.bf16.msra.mxu0 %v8166_v52 }
 0x8fb   : > { %v2628_v7 = vrot.slane %v2621_v54, %v9191_v0  ;;  %v2636_v59 = vrot.slane %v7556_v55, %v9191_v0  ;;  %v2644_v60 = vrot.slane %v2637_v56, %v9191_v0  ;;  %v2652_v44 = vrot.slane %v7557_v57, %v9191_v0  ;;  %7814 = vmatprep.subr.bf16.mxu0 %v8674_v16 }
 0x8fd   : > { %v2654_v10 = vcombine.high %v2628_v7, %v2636_v59  ;;  %v2670_v61 = vcombine.high %v2644_v60, %v2652_v44  ;;  %v2653_v62 = vcombine.low %v2628_v7, %v2636_v59  ;;  %v2669_v20 = vcombine.low %v2644_v60, %v2652_v44 }
 0x8fe   : > { %7815 = vmatpush3.bf16.msra.mxu0 %v8167_v53 }
 0x8ff   : > { %v2668_v48 = vrot.slane %v2654_v10, %v9193_v6  ;;  %v2684_v46 = vrot.slane %v2670_v61, %v9193_v6  ;;  %v2661_v23 = vrot.slane %v2653_v62, %v9193_v6  ;;  %v2677_v63 = vrot.slane %v2669_v20, %v9193_v6  ;;  %7828 = vmatprep.subr.bf16.mxu0 %v8674_v16 }
 0x901   : > { %v2687_v1 = vcombine.low %v2668_v48, %v2684_v46  ;;  %v2686_v2 = vcombine.high %v2661_v23, %v2677_v63  ;;  %v2685_v3 = vcombine.low %v2661_v23, %v2677_v63  ;;  %v2688_v4 = vcombine.high %v2668_v48, %v2684_v46 }
 0x903   : > { %2694 = vrot.lane.b32.xlu0 %v2687_v1, %s8682_s17  ;;  %2690 = vrot.lane.b32.xlu1 %v2686_v2, %s8683_s1 }
 0x907   : > { %2698 = vrot.lane.b32.xlu1 %v2688_v4, %s8684_s3 }
 0x975   : > { %v2691_v8 = vpop.permute.xlu1 %2690  ;;  %v2695_v9 = vpop.permute.xlu0 %2694 }
 0x976   : > { %v2701_v11 = vsel %vm1589_vm3, %v2685_v3, %v2691_v8  ;;  %v2770_v3 = vld [vmem:[#allocation8 + $0x6] sm:$0x3] }
 0x977   : > { %v2703_v15 = vsel %vm2702_vm4, %v2701_v11, %v2695_v9  ;;  %v2787_v13 = vrot.slane %v2770_v3, %v9166_v29 }
 0x979   : > { %v2699_v14 = vpop.permute.xlu1 %2698 }
 0x97a   : > { %v2705_v17 = vsel %vm2704_vm5, %v2703_v15, %v2699_v14  ;;  %v2809_v15 = vld [vmem:[#allocation8 + $0xa] sm:$0x3] }
 0x97b   : > { %v2706_v21 = vpack.c.bf16 %v2705_v17, %v2705_v17  ;;  %v2813_v26 = vrot.slane %v2809_v15, %v9166_v29 }
 0x97d   : > { %7809 = vmatmul.mubr.msk.bf16.vlgmr.msra.gmra.mrb[20].mxu1 %vm588_vm0, %v2706_v21  ;;  %v2792_v21 = vrot.slane %v2770_v3, %v9168_v32 }
 0x97e   : > { %7821 = vmatpush3.bf16.msra.mxu1 %v8164_v18  ;;  %7824 = vmatprep.mubr.msk.bf16.mxu1 %vm8675_vm1, %v8674_v16 }
 0x97f   : > { %7822 = vmatprep.subr.bf16.mxu1 %v8674_v16 }
 0x982   : > { %7823 = vmatpush3.bf16.msra.mxu1 %v8165_v25 }
 0x983   : > { %7836 = vmatprep.subr.bf16.mxu1 %v8674_v16 }
 0x985   : > { %7825 = vmatmul.mubr.msk.bf16.vlgmr.msra.gmra.mrb[24].mxu1 %vm588_vm0, %v2807_v27 }
 0x986   : > { %7838 = vmatprep.mubr.msk.bf16.mxu1 %vm8675_vm1, %v8674_v16 }
 0xa50   : > { %v2762_v31 = vpop.f32.mrb[20].mxu1 }
 0xa51   : > { %v2763_v33 = vadd.f32 %v7558_v30, %v2762_v31  ;;  %v7810_v34 = vpop.f32.mrb[21].mxu1 }
 0xa52   : > { %v2765_v35 = vpop.f32.mrb[22].mxu1  ;;  %v8168_v34 = vld [vmem:[#allocation10 + $0x60] sm:$0xff]  }
 0xa53   : > { %v9413_v38 = vadd.f32 %v8252_v36, %v2763_v33  ;;  %v7811_v40 = vpop.f32.mrb[23].mxu1  ;;  %v2814_v36 = vmul.f32 %v2813_v26, %v9175_v39 }
 0xa55   : > { %v2771_v19 = vsel %vm588_vm0, %v9413_v38, 0.0 }
 0xa56   : > { %2772 = vadd.xlane.f32.xlu1 %v2771_v19  ;;  %v2818_v19 = vrot.slane %v2809_v15, %v9168_v32 }
 0xa58   : > { %v2947_v41 = vpop.f32.mrb[24].mxu1 }
 0xa59   : > { %v7826_v42 = vpop.f32.mrb[25].mxu1 }
 0xa5a   : > { %v2950_v43 = vpop.f32.mrb[26].mxu1 }
 0xa5b   : > { %v7827_v45 = vpop.f32.mrb[27].mxu1  ;;  %v8169_v43 = vld [vmem:[#allocation10 + $0x68] sm:$0xff]  }
 0xa5c   : > { %v2819_v45 = vadd.f32 %v2818_v19, %v2814_v36 }
 0xa5e   : > { %v2820_v39 = vpack.c.bf16 %v2819_v45, %v2819_v45 }
 0xa67   : > { %3095 = vrot.lane.b32.xlu1 %v2947_v41, %s8676_s11 }
 0xa6b   : > { %3101 = vrot.lane.b32.xlu1 %v2947_v41, %s8678_s26 }
 0xae3   : > { %v2773_v47 = vpop.xlane.xlu1 %2772 }
 0xae4   : > { %v2774_v49 = vmul.f32 0.03125, %v2773_v47 }
 0xae6   : > { %v2775_v50 = vsub.f32 %v9413_v38, %v2774_v49 }
 0xae7   : > { %v3096_v54 = vpop.permute.xlu1 %3095 }
 0xae8   : > { %v2776_v51 = vmul.f32 %v2775_v50, %v2775_v50 }
 0xaea   : > { %v2777_v28 = vsel %vm588_vm0, %v2776_v51, 0.0 }
 0xaeb   : > { %2778 = vadd.xlane.f32.xlu0 %v2777_v28  ;;  %v3102_v55 = vpop.permute.xlu1 %3101 }
 0xaec   : > { %v3120_v58 = vcombine.low %v3096_v54, %v3102_v55  ;;  %v3121_v7 = vcombine.high %v3096_v54, %v3102_v55 }
 0xaee   : > { %v3128_v61 = vrot.slane %v3120_v58, %v9191_v0  ;;  %v3135_v62 = vrot.slane %v3121_v7, %v9191_v0 }
 0xb01   : > { %3098 = vrot.lane.b32.xlu0 %v2947_v41, %s8677_s27 }
 0xb78   : > { %v2779_v56 = vpop.xlane.xlu0 %2778 }
 0xb79   : > { %v2780_v57 = vmul.f32 0.03125, %v2779_v56 }
 0xb7b   : > { %v2781_v59 = vadd.f32 1e-05, %v2780_v57 }
 0xb7c   : > { %v3099_v60 = vpop.permute.xlu0 %3098 }
 0xb7d   : > { %8212 = vrsqrt.f32 %v2781_v59  ;;  %v3104_v44 = vcombine.low %v2947_v41, %v3099_v60  ;;  %v3105_v10 = vcombine.high %v2947_v41, %v3099_v60 }
 0xb7f   : > { %v3112_v20 = vrot.slane %v3104_v44, %v9191_v0  ;;  %v3119_v48 = vrot.slane %v3105_v10, %v9191_v0 }
 0xb81   : > { %v3136_v46 = vcombine.low %v3112_v20, %v3128_v61  ;;  %v3137_v23 = vcombine.high %v3112_v20, %v3128_v61  ;;  %v3152_v63 = vcombine.low %v3119_v48, %v3135_v62  ;;  %v3153_v4 = vcombine.high %v3119_v48, %v3135_v62 }
 0xb83   : > { %v3144_v1 = vrot.slane %v3136_v46, %v9193_v6  ;;  %v3151_v2 = vrot.slane %v3137_v23, %v9193_v6  ;;  %v3160_v11 = vrot.slane %v3152_v63, %v9193_v6  ;;  %v3167_v25 = vrot.slane %v3153_v4, %v9193_v6 }
 0xb85   : > { %v3172_v5 = vpack.c.bf16 %v3144_v1, %v3144_v1  ;;  %v3168_v8 = vcombine.high %v3144_v1, %v8674_v16  ;;  %v3169_v9 = vcombine.high %v3151_v2, %v8674_v16  ;;  %v3170_v24 = vcombine.high %v3160_v11, %v8674_v16 }
 0xb86   : > { %v3174_v30 = vpack.c.bf16 %v3151_v2, %v3151_v2  ;;  %v3171_v35 = vcombine.high %v3167_v25, %v8674_v16  ;;  %v3176_v41 = vpack.c.bf16 %v3160_v11, %v3160_v11  ;;  %v3178_v47 = vpack.c.bf16 %v3167_v25, %v3167_v25 }
 0xb87   : > { %v8213_v14 = vpop.eup %8212  ;;  %3328 = vxpose.xlu1.c.b16.start.end [1/1] (short) (narrow) %v3172_v5, 16  ;;  %v3173_v17 = vpack.c.bf16 %v3168_v8, %v3168_v8  ;;  %v3175_v22 = vpack.c.bf16 %v3169_v9, %v3169_v9  ;;  %v3177_v33 = vpack.c.bf16 %v3170_v24, %v3170_v24 }
 0xb88   : > { %v9434_v18 = vmul.f32 %v8213_v14, %v2775_v50  ;;  %v3179_v42 = vpack.c.bf16 %v3171_v35, %v3171_v35 }
 0xb89   : > { %3344 = vxpose.xlu0.c.b16.start.end [1/1] (short) (narrow) %v3173_v17, 16 }
 0xb8a   : > { %v2788_v27 = vmul.f32 %v2787_v13, %v9434_v18 }
 0xb8b   : > { %3376 = vxpose.xlu1.c.b16.start.end [1/1] (short) (narrow) %v3175_v22, 16 }
 0xb8c   : > { %v2793_v31 = vadd.f32 %v2792_v21, %v2788_v27 }
 0xb8d   : > { %3360 = vxpose.xlu0.c.b16.start.end [1/1] (short) (narrow) %v3174_v30, 16 }
 0xb8e   : > { %v2794_v40 = vpack.c.bf16 %v2793_v31, %v2793_v31 }
 0xb8f   : > { %3408 = vxpose.xlu1.c.b16.start.end [1/1] (short) (narrow) %v3177_v33, 16 }
 0xb90   : > { %7817 = vmatmul.mubr.msk.bf16.vlgmr.msra.gmra.mrb[24].mxu0 %vm588_vm0, %v2794_v40 }
 0xb91   : > { %7829 = vmatpush3.bf16.msra.mxu0 %v8168_v34  ;;  %3392 = vxpose.xlu0.c.b16.start.end [1/1] (short) (narrow) %v3176_v41, 16 }
 0xb92   : > { %7830 = vmatprep.subr.bf16.mxu0 %v8674_v16  ;;  %7832 = vmatprep.mubr.msk.bf16.mxu0 %vm8675_vm1, %v8674_v16 }
 0xb93   : > { %3440 = vxpose.xlu1.c.b16.start.end [1/1] (short) (narrow) %v3179_v42, 16 }
 0xb95   : > { %7831 = vmatpush3.bf16.msra.mxu0 %v8169_v43  ;;  %3424 = vxpose.xlu0.c.b16.start.end [1/1] (short) (narrow) %v3178_v47, 16 }
 0xb96   : > { %7842 = vmatprep.subr.bf16.mxu0 %v8674_v16 }
 0xb98   : > { %7833 = vmatmul.mubr.msk.bf16.vlgmr.msra.gmra.mrb[28].mxu0 %vm588_vm0, %v2820_v39 }
 0xb99   : > { %7844 = vmatprep.mubr.msk.bf16.mxu0 %vm8675_vm1, %v8674_v16 }
 0xbed   : > { %v3336_v49 = vpop.trf.xlu1 }
 0xbef   : > { %v3352_v50 = vpop.trf.xlu0 }
 0xbf1   : > { %v3384_v51 = vpop.trf.xlu1 }
 0xbf3   : > { %v3368_v28 = vpop.trf.xlu0 }
 0xbf5   : > { %v3416_v52 = vpop.trf.xlu1 }
 0xbf6   : > { %v3490_v53 = vcombine.low %v3352_v50, %v3416_v52 }
 0xbf7   : > { %v3400_v54 = vpop.trf.xlu0 }
 0xbf8   : > { %v3456_v55 = vcombine.low %v3336_v49, %v3400_v54  ;;  %v3497_v57 = vrot.slane %v3490_v53, %v9191_v0 }
 0xbf9   : > { %v3448_v56 = vpop.trf.xlu1 }
 0xbfa   : > { %v3498_v58 = vcombine.low %v3384_v51, %v3448_v56  ;;  %v3463_v59 = vrot.slane %v3456_v55, %v9191_v0 }
 0xbfb   : > { %v3432_v7 = vpop.trf.xlu0 }
 0xbfc   : > { %v3505_v60 = vrot.slane %v3498_v58, %v9191_v0  ;;  %v3464_v44 = vcombine.low %v3368_v28, %v3432_v7 }
 0xbfe   : > { %v3506_v10 = vcombine.low %v3497_v57, %v3505_v60  ;;  %v3507_v61 = vcombine.high %v3497_v57, %v3505_v60  ;;  %v3471_v62 = vrot.slane %v3464_v44, %v9191_v0 }
 0xc00   : > { %v3472_v20 = vcombine.low %v3463_v59, %v3471_v62  ;;  %v3473_v48 = vcombine.high %v3463_v59, %v3471_v62  ;;  %v3514_v46 = vrot.slane %v3506_v10, %v9193_v6  ;;  %v3521_v23 = vrot.slane %v3507_v61, %v9193_v6 }
 0xc02   : > { %v3480_v63 = vrot.slane %v3472_v20, %v9193_v6  ;;  %v3522_v1 = vcombine.high %v3514_v46, %v8681_v12  ;;  %v3487_v2 = vrot.slane %v3473_v48, %v9193_v6  ;;  %v3529_v3 = vshrl.u32 %v3514_v46, 16 }
 0xc03   : > { %v3523_v4 = vcombine.high %v3521_v23, %v8681_v12  ;;  %v3545_v21 = vshrl.u32 %v3521_v23, 16 }
 0xc04   : > { %v3526_v5 = vpack.i.b16 %v3514_v46, %v3480_v63  ;;  %v3488_v8 = vcombine.high %v3480_v63, %v8681_v12  ;;  %v3542_v9 = vpack.i.b16 %v3521_v23, %v3487_v2  ;;  %v3528_v11 = vshrl.u32 %v3480_v63, 16 }
 0xc05   : > { %v3489_v13 = vcombine.high %v3487_v2, %v8681_v12  ;;  %v3553_v14 = vshrl.u32 %v3523_v4, 16  ;;  %v3544_v17 = vshrl.u32 %v3487_v2, 16  ;;  %v3537_v31 = vshrl.u32 %v3522_v1, 16 }
 0xc06   : > { %3556 = vxpose.xlu0.c.b16.start.end [1/1] (short) (narrow) %v3526_v5, 16  ;;  %v3534_v15 = vpack.i.b16 %v3522_v1, %v3488_v8  ;;  %3620 = vxpose.xlu1.c.b16.start.end [1/1] (short) (narrow) %v3542_v9, 16  ;;  %v3530_v22 = vpack.i.b16 %v3529_v3, %v3528_v11  ;;  %v3536_v30 = vshrl.u32 %v3488_v8, 16 }
 0xc07   : > { %v3552_v24 = vshrl.u32 %v3489_v13, 16  ;;  %v3550_v25 = vpack.i.b16 %v3523_v4, %v3489_v13  ;;  %v3546_v27 = vpack.i.b16 %v3545_v21, %v3544_v17 }
 0xc08   : > { %v3538_v33 = vpack.i.b16 %v3537_v31, %v3536_v30 }
 0xc09   : > { %v3554_v26 = vpack.i.b16 %v3553_v14, %v3552_v24 }
 0xc0a   : > { %3588 = vxpose.xlu0.c.b16.start.end [1/1] (short) (narrow) %v3534_v15, 16  ;;  %3572 = vxpose.xlu1.c.b16.start.end [1/1] (short) (narrow) %v3530_v22, 16 }
 0xc0e   : > { %3636 = vxpose.xlu0.c.b16.start.end [1/1] (short) (narrow) %v3546_v27, 16 }
 0xc12   : > { %3604 = vxpose.xlu0.c.b16.start.end [1/1] (short) (narrow) %v3538_v33, 16 }
 0xc63   : > { %v2892_v34 = vpop.f32.mrb[24].mxu0 }
 0xc64   : > { %v7818_v35 = vpop.f32.mrb[25].mxu0  ;;  %3012 = vrot.lane.b32.xlu1 %v2892_v34, %s8677_s27  ;;  %3009 = vrot.lane.b32.xlu0 %v2892_v34, %s8676_s11 }
 0xc65   : > { %v2895_v36 = vpop.f32.mrb[26].mxu0 }
 0xc66   : > { %v7819_v40 = vpop.f32.mrb[27].mxu0 }
 0xc68   : > { %3015 = vrot.lane.b32.xlu1 %v2892_v34, %s8678_s26 }
 0xc6b   : > { %v9467_v19 = vpop.f32.mrb[28].mxu0 }
 0xc6c   : > { %v7834_v41 = vpop.f32.mrb[29].mxu0  ;;  %v3564_v45 = vpop.trf.xlu0 }
 0xc6d   : > { %v3005_v42 = vpop.f32.mrb[30].mxu0  ;;  %v3628_v39 = vpop.trf.xlu1 }
 0xc6e   : > { %v7835_v43 = vpop.f32.mrb[31].mxu0  ;;  %v3684_v24 = vcombine.low %v3564_v45, %v3628_v39 }
 0xc70   : > { %v3596_v47 = vpop.trf.xlu0 }
 0xc71   : > { %v3580_v50 = vpop.trf.xlu1 }
 0xc74   : > { %v3644_v49 = vpop.trf.xlu0 }
 0xc75   : > { %v3709_v8 = vcombine.low %v3580_v50, %v3644_v49 }
 0xc77   : > { %v3716_v17 = vrot.slane %v3709_v8, %v9191_v0 }
 0xc78   : > { %v3612_v51 = vpop.trf.xlu0 }
 0xc82   : > { %3668 = vxpose.xlu0.c.b16.start.end [1/1] (short) (narrow) %v3554_v26, 16 }
 0xc8b   : > { %3652 = vxpose.xlu1.c.b16.start.end [1/1] (short) (narrow) %v3550_v25, 16  ;;  %3184 = vrot.lane.b32.xlu0 %v9467_v19, %s8677_s27 }
 0xc8f   : > { %3181 = vrot.lane.b32.xlu1 %v9467_v19, %s8676_s11 }
 0xc93   : > { %3187 = vrot.lane.b32.xlu1 %v9467_v19, %s8678_s26 }
 0xcd6   : > { %v3013_v28 = vpop.permute.xlu1 %3012  ;;  %v3010_v54 = vpop.permute.xlu0 %3009 }
 0xcd7   : > { %v3018_v52 = vcombine.low %v2892_v34, %v3013_v28  ;;  %v3019_v53 = vcombine.high %v2892_v34, %v3013_v28  ;;  %v3691_v34 = vrot.slane %v3684_v24, %v9191_v0 }
 0xcd9   : > { %v3026_v58 = vrot.slane %v3018_v52, %v9191_v0  ;;  %v3033_v7 = vrot.slane %v3019_v53, %v9191_v0 }
 0xcda   : > { %v3016_v55 = vpop.permute.xlu1 %3015 }
 0xcdb   : > { %v3034_v56 = vcombine.low %v3010_v54, %v3016_v55  ;;  %v3035_v57 = vcombine.high %v3010_v54, %v3016_v55 }
 0xcdd   : > { %v3042_v59 = vrot.slane %v3034_v56, %v9191_v0  ;;  %v3049_v60 = vrot.slane %v3035_v57, %v9191_v0 }
 0xcdf   : > { %v3050_v44 = vcombine.low %v3026_v58, %v3042_v59  ;;  %v3051_v10 = vcombine.high %v3026_v58, %v3042_v59  ;;  %v3066_v61 = vcombine.low %v3033_v7, %v3049_v60  ;;  %v3067_v62 = vcombine.high %v3033_v7, %v3049_v60 }
 0xce1   : > { %v3058_v20 = vrot.slane %v3050_v44, %v9193_v6  ;;  %v3065_v48 = vrot.slane %v3051_v10, %v9193_v6  ;;  %v3074_v46 = vrot.slane %v3066_v61, %v9193_v6  ;;  %v3081_v23 = vrot.slane %v3067_v62, %v9193_v6 }
 0xce3   : > { %v3082_v63 = vcombine.high %v3058_v20, %v8674_v16  ;;  %v3083_v1 = vcombine.high %v3065_v48, %v8674_v16  ;;  %v3084_v2 = vcombine.high %v3074_v46, %v8674_v16  ;;  %v3085_v3 = vcombine.high %v3081_v23, %v8674_v16 }
 0xce4   : > { %v7571_v13 = vpack.c.bf16 %v3074_v46, %v3058_v20  ;;  %v7572_v14 = vpack.c.bf16 %v3081_v23, %v3065_v48 }
 0xce5   : > { %v7573_v9 = vpack.c.bf16 %v3084_v2, %v3082_v63  ;;  %v7574_v11 = vpack.c.bf16 %v3085_v3, %v3083_v1 }
 0xce6   : > { %v3273_v25 = vrot.slane %v7571_v13, %v9191_v0  ;;  %v3281_v26 = vrot.slane %v7572_v14, %v9191_v0 }
 0xce7   : > { %v3298_v21 = vrot.slane %v7573_v9, %v9191_v0  ;;  %v3306_v22 = vrot.slane %v7574_v11, %v9191_v0 }
 0xce8   : > { %v3676_v4 = vpop.trf.xlu0  ;;  %v3282_v36 = vcombine.low %v3273_v25, %v3281_v26 }
 0xce9   : > { %v3717_v5 = vcombine.low %v3612_v51, %v3676_v4  ;;  %v3307_v33 = vcombine.low %v3298_v21, %v3306_v22 }
 0xcea   : > { %v3289_v45 = vrot.slane %v3282_v36, %v9193_v6 }
 0xceb   : > { %v3724_v15 = vrot.slane %v3717_v5, %v9191_v0  ;;  %v3314_v42 = vrot.slane %v3307_v33, %v9193_v6 }
 0xcec   : > { %v3319_v7 = vshrl.u32 %v3289_v45, 16  ;;  %v3290_v48 = vcombine.high %v3289_v45, %v8681_v12 }
 0xced   : > { %v3725_v27 = vcombine.low %v3716_v17, %v3724_v15  ;;  %v3320_v28 = vshrl.u32 %v3314_v42, 16  ;;  %v3318_v58 = vpack.i.b16 %v3314_v42, %v3289_v45  ;;  %v3315_v10 = vcombine.high %v3314_v42, %v8681_v12 }
 0xcee   : > { %v3325_v3 = vshrl.u32 %v3290_v48, 16 }
 0xcef   : > { %v3732_v40 = vrot.slane %v3725_v27, %v9193_v6  ;;  %v3321_v44 = vpack.i.b16 %v3320_v28, %v3319_v7  ;;  %v3326_v23 = vshrl.u32 %v3315_v10, 16  ;;  %v3324_v2 = vpack.i.b16 %v3315_v10, %v3290_v48 }
 0xcf1   : > { %v3660_v30 = vpop.trf.xlu1  ;;  %v3733_v39 = vcombine.high %v3732_v40, %v8681_v12  ;;  %v3327_v8 = vpack.i.b16 %v3326_v23, %v3325_v3 }
 0xcf2   : > { %v3692_v31 = vcombine.low %v3596_v47, %v3660_v30  ;;  %v3738_v47 = vshrl.u32 %v3732_v40, 16 }
 0xcf3   : > { %v3744_v56 = vshrl.u32 %v3733_v39, 16 }
 0xcf4   : > { %v3699_v35 = vrot.slane %v3692_v31, %v9191_v0 }
 0xcf6   : > { %v3700_v41 = vcombine.low %v3691_v34, %v3699_v35 }
 0xcf8   : > { %v3707_v43 = vrot.slane %v3700_v41, %v9193_v6 }
 0xcfa   : > { %v3736_v49 = vpack.i.b16 %v3732_v40, %v3707_v43  ;;  %v3737_v50 = vshrl.u32 %v3707_v43, 16  ;;  %v3708_v51 = vcombine.high %v3707_v43, %v8681_v12 }
 0xcfc   : > { %v3750_v52 = vsel %vm1593_vm2, %v3736_v49, 0  ;;  %v3739_v53 = vpack.i.b16 %v3738_v47, %v3737_v50  ;;  %v3742_v54 = vpack.i.b16 %v3733_v39, %v3708_v51  ;;  %v3743_v55 = vshrl.u32 %v3708_v51, 16 }
 0xcfd   : > { %7837 = vmatpush3.bf16.msra.mxu1 %v3750_v52  ;;  %v3185_v61 = vpop.permute.xlu0 %3184 }
 0xcfe   : > { %v3796_v57 = vsel %vm1593_vm2, %v3739_v53, 0  ;;  %7848 = vmatprep.subr.bf16.mxu1 %v8674_v16  ;;  %v3745_v59 = vpack.i.b16 %v3744_v56, %v3743_v55  ;;  %v3842_v60 = vsel %vm1593_vm2, %v3742_v54, 0  ;;  %v3191_v46 = vcombine.high %v9467_v19, %v3185_v61 }
 0xcff   : > { %7843 = vmatpush3.bf16.msra.mxu0 %v3796_v57  ;;  %v3190_v43 = vcombine.low %v9467_v19, %v3185_v61 }
 0xd00   : > { %7839 = vmatmul.mubr.msk.bf16.vlgmr.msra.gmra.mrb[28].mxu1 %vm1589_vm3, %v3318_v58  ;;  %7854 = vmatprep.subr.bf16.mxu0 %v8674_v16  ;;  %v3888_v20 = vsel %vm1593_vm2, %v3745_v59, 0  ;;  %v3205_v4 = vrot.slane %v3191_v46, %v9191_v0 }
 0xd01   : > { %v3182_v62 = vpop.permute.xlu1 %3181  ;;  %7849 = vmatpush3.bf16.msra.mxu1 %v3842_v60  ;;  %7850 = vmatprep.mubr.msk.bf16.mxu1 %vm8675_vm1, %v8674_v16  ;;  %v3198_v39 = vrot.slane %v3190_v43, %v9191_v0 }
 0xd02   : > { %7845 = vmatmul.mubr.msk.bf16.vlgmr.msra.gmra.mrb[32].mxu0 %vm1589_vm3, %v3321_v44  ;;  %7860 = vmatprep.subr.bf16.mxu1 %v8674_v16 }
 0xd03   : > { %7855 = vmatpush3.bf16.msra.mxu0 %v3888_v20  ;;  %7856 = vmatprep.mubr.msk.bf16.mxu0 %vm8675_vm1, %v8674_v16 }
 0xd04   : > { %7866 = vmatprep.subr.bf16.mxu0 %v8674_v16 }
 0xd05   : > { %v3188_v63 = vpop.permute.xlu1 %3187 }
 0xd06   : > { %v3207_v1 = vcombine.high %v3182_v62, %v3188_v63  ;;  %v3206_v42 = vcombine.low %v3182_v62, %v3188_v63 }
 0xd08   : > { %v3221_v5 = vrot.slane %v3207_v1, %v9191_v0  ;;  %7851 = vmatmul.mubr.msk.bf16.vlgmr.msra.gmra.mrb[32].mxu1 %vm1589_vm3, %v3324_v2  ;;  %v3214_v45 = vrot.slane %v3206_v42, %v9191_v0 }
 0xd09   : > { %7862 = vmatprep.mubr.msk.bf16.mxu1 %vm8675_vm1, %v8674_v16 }
 0xd0a   : > { %v3238_v9 = vcombine.low %v3205_v4, %v3221_v5  ;;  %v3239_v11 = vcombine.high %v3205_v4, %v3221_v5  ;;  %7857 = vmatmul.mubr.msk.bf16.vlgmr.msra.gmra.mrb[36].mxu0 %vm1589_vm3, %v3327_v8  ;;  %v3222_v49 = vcombine.low %v3198_v39, %v3214_v45  ;;  %v3223_v53 = vcombine.high %v3198_v39, %v3214_v45 }
 0xd0b   : > { %7868 = vmatprep.mubr.msk.bf16.mxu0 %vm8675_vm1, %v8674_v16 }
 0xd0c   : > { %v3230_v50 = vrot.slane %v3222_v49, %v9193_v6  ;;  %v3237_v54 = vrot.slane %v3223_v53, %v9193_v6  ;;  %v3246_v56 = vrot.slane %v3238_v9, %v9193_v6  ;;  %v3253_v7 = vrot.slane %v3239_v11, %v9193_v6 }
 0xd0e   : > { %v3254_v47 = vcombine.high %v3230_v50, %v8674_v16  ;;  %v3258_v51 = vpack.c.bf16 %v3230_v50, %v3230_v50  ;;  %v3255_v55 = vcombine.high %v3237_v54, %v8674_v16  ;;  %v3256_v58 = vcombine.high %v3246_v56, %v8674_v16 }
 0xd0f   : > { %v3260_v59 = vpack.c.bf16 %v3237_v54, %v3237_v54  ;;  %v3257_v44 = vcombine.high %v3253_v7, %v8674_v16  ;;  %v3262_v10 = vpack.c.bf16 %v3246_v56, %v3246_v56  ;;  %v3264_v62 = vpack.c.bf16 %v3253_v7, %v3253_v7 }
 0xd10   : > { %v3259_v28 = vpack.c.bf16 %v3254_v47, %v3254_v47  ;;  %v3261_v57 = vpack.c.bf16 %v3255_v55, %v3255_v55  ;;  %v3263_v60 = vpack.c.bf16 %v3256_v58, %v3256_v58 }
 0xd11   : > { %v3265_v61 = vpack.c.bf16 %v3257_v44, %v3257_v44 }
 0xdd3   : > { %v9526_v13 = vpop.f32.mrb[28].mxu1 }
 0xdd4   : > { %v7840_v14 = vpop.f32.mrb[29].mxu1  ;;  %v3930_v15 = vsel %vm1589_vm3, %v9526_v13, -inf }
 0xdd5   : > { %v9530_v17 = vpop.f32.mrb[32].mxu0  ;;  %3931 = vmax.xlane.f32.xlu1 %v3930_v15  ;;  %v3789_v21 = vpop.f32.mrb[30].mxu1 }
 0xdd6   : > { %v7841_v22 = vpop.f32.mrb[31].mxu1  ;;  %v7846_v24 = vpop.f32.mrb[33].mxu0  ;;  %v3933_v25 = vsel %vm1589_vm3, %v9530_v17, -inf }
 0xdd7   : > { %3934 = vmax.xlane.f32.xlu0 %v3933_v25  ;;  %v3835_v26 = vpop.f32.mrb[34].mxu0 }
 0xdd8   : > { %v7847_v27 = vpop.f32.mrb[35].mxu0 }
 0xddb   : > { %v9534_v30 = vpop.f32.mrb[32].mxu1 }
 0xddc   : > { %v7852_v31 = vpop.f32.mrb[33].mxu1  ;;  %v3936_v52 = vsel %vm1589_vm3, %v9534_v30, -inf }
 0xddd   : > { %v3881_v33 = vpop.f32.mrb[34].mxu1  ;;  %v9536_v34 = vpop.f32.mrb[36].mxu0 }
 0xdde   : > { %v7853_v35 = vpop.f32.mrb[35].mxu1  ;;  %v7858_v36 = vpop.f32.mrb[37].mxu0  ;;  %v3939_v19 = vsel %vm1589_vm3, %v9536_v34, -inf }
 0xddf   : > { %v3927_v40 = vpop.f32.mrb[38].mxu0 }
 0xde0   : > { %v7859_v41 = vpop.f32.mrb[39].mxu0 }
 0xe02   : > { %3978 = vxpose.xlu1.c.b16.start.end [1/1] (short) (narrow) %v3258_v51, 16 }
 0xe04   : > { %3994 = vxpose.xlu0.c.b16.start.end [1/1] (short) (narrow) %v3259_v28, 16 }
 0xe0f   : > { %3937 = vmax.xlane.f32.xlu1 %v3936_v52 }
 0xe11   : > { %3940 = vmax.xlane.f32.xlu0 %v3939_v19 }
 0xe3c   : > { %4026 = vxpose.xlu1.c.b16.start.end [1/1] (short) (narrow) %v3261_v57, 16 }
 0xe3e   : > { %4010 = vxpose.xlu0.c.b16.start.end [1/1] (short) (narrow) %v3260_v59, 16 }
 0xe40   : > { %4058 = vxpose.xlu1.c.b16.start.end [1/1] (short) (narrow) %v3263_v60, 16 }
 0xe42   : > { %4042 = vxpose.xlu0.c.b16.start.end [1/1] (short) (narrow) %v3262_v10, 16 }
 0xe44   : > { %4090 = vxpose.xlu1.c.b16.start.end [1/1] (short) (narrow) %v3265_v61, 16 }
 0xe46   : > { %4074 = vxpose.xlu0.c.b16.start.end [1/1] (short) (narrow) %v3264_v62, 16 }
 0xe62   : > { %v3932_v20 = vpop.xlane.xlu1 %3931 }
 0xe63   : > { %v3942_v49 = vsub.f32 %v9526_v13, %v3932_v20 }
 0xe64   : > { %v3935_v48 = vpop.xlane.xlu0 %3934 }
 0xe65   : > { %v3943_v28 = vsub.f32 %v9530_v17, %v3935_v48  ;;  %v3946_v54 = vmul.f32 1.442695, %v3942_v49 }
 0xe67   : > { %v3948_v58 = vmul.f32 1.442695, %v3943_v28  ;;  %8214 = vpow2.f32 %v3946_v54 }
 0xe68   : > { %v3986_v46 = vpop.trf.xlu1 }
 0xe69   : > { %8216 = vpow2.f32 %v3948_v58 }
 0xe6a   : > { %v4002_v23 = vpop.trf.xlu0 }
 0xe71   : > { %v8215_v10 = vpop.eup %8214 }
 0xe72   : > { %v3954_v61 = vsel %vm1589_vm3, %v8215_v10, 0.0 }
 0xe9c   : > { %v3938_v63 = vpop.xlane.xlu1 %3937 }
 0xe9d   : > { %v3944_v55 = vsub.f32 %v9534_v30, %v3938_v63  ;;  %v8217_v30 = vpop.eup %8216 }
 0xe9e   : > { %v3941_v1 = vpop.xlane.xlu0 %3940 }
 0xe9f   : > { %v3945_v13 = vsub.f32 %v9536_v34, %v3941_v1  ;;  %v3950_v60 = vmul.f32 1.442695, %v3944_v55  ;;  %v3957_v34 = vsel %vm1589_vm3, %v8217_v30, 0.0 }
 0xea1   : > { %v3952_v44 = vmul.f32 1.442695, %v3945_v13  ;;  %8218 = vpow2.f32 %v3950_v60 }
 0xea2   : > { %v4034_v2 = vpop.trf.xlu1 }
 0xea3   : > { %8220 = vpow2.f32 %v3952_v44 }
 0xea4   : > { %v4018_v3 = vpop.trf.xlu0 }
 0xea6   : > { %v4066_v4 = vpop.trf.xlu1 }
 0xea7   : > { %v4140_v8 = vcombine.low %v4002_v23, %v4066_v4 }
 0xea8   : > { %v4050_v5 = vpop.trf.xlu0 }
 0xea9   : > { %v4106_v11 = vcombine.low %v3986_v46, %v4050_v5  ;;  %v4147_v21 = vrot.slane %v4140_v8, %v9191_v0 }
 0xeaa   : > { %v4098_v9 = vpop.trf.xlu1 }
 0xeab   : > { %v4148_v14 = vcombine.low %v4034_v2, %v4098_v9  ;;  %v4113_v25 = vrot.slane %v4106_v11, %v9191_v0  ;;  %v8219_v62 = vpop.eup %8218 }
 0xeac   : > { %v4082_v15 = vpop.trf.xlu0  ;;  %v3960_v48 = vsel %vm1589_vm3, %v8219_v62, 0.0 }
 0xead   : > { %v4155_v22 = vrot.slane %v4148_v14, %v9191_v0  ;;  %v4114_v24 = vcombine.low %v4018_v3, %v4082_v15  ;;  %v8221_v20 = vpop.eup %8220 }
 0xeae   : > { %v3963_v46 = vsel %vm1589_vm3, %v8221_v20, 0.0 }
 0xeaf   : > { %v4156_v26 = vcombine.low %v4147_v21, %v4155_v22  ;;  %v4121_v27 = vrot.slane %v4114_v24, %v9191_v0  ;;  %v4157_v40 = vcombine.high %v4147_v21, %v4155_v22 }
 0xeb1   : > { %v4122_v31 = vcombine.low %v4113_v25, %v4121_v27  ;;  %v4164_v33 = vrot.slane %v4156_v26, %v9193_v6  ;;  %v4123_v35 = vcombine.high %v4113_v25, %v4121_v27  ;;  %v4171_v52 = vrot.slane %v4157_v40, %v9193_v6 }
 0xeb3   : > { %v4130_v36 = vrot.slane %v4122_v31, %v9193_v6  ;;  %v4179_v41 = vshrl.u32 %v4164_v33, 16  ;;  %v4172_v39 = vcombine.high %v4164_v33, %v8681_v12  ;;  %v4137_v50 = vrot.slane %v4123_v35, %v9193_v6 }
 0xeb4   : > { %v4195_v59 = vshrl.u32 %v4171_v52, 16  ;;  %v4173_v63 = vcombine.high %v4171_v52, %v8681_v12 }
 0xeb5   : > { %v4176_v42 = vpack.i.b16 %v4164_v33, %v4130_v36  ;;  %v4178_v43 = vshrl.u32 %v4130_v36, 16  ;;  %v4138_v45 = vcombine.high %v4130_v36, %v8681_v12  ;;  %v4187_v53 = vshrl.u32 %v4172_v39, 16 }
 0xeb6   : > { %v4194_v57 = vshrl.u32 %v4137_v50, 16  ;;  %v4192_v7 = vpack.i.b16 %v4171_v52, %v4137_v50  ;;  %v4139_v23 = vcombine.high %v4137_v50, %v8681_v12  ;;  %v4203_v3 = vshrl.u32 %v4173_v63, 16 }
 0xeb7   : > { %4206 = vxpose.xlu0.c.b16.start.end [1/1] (short) (narrow) %v4176_v42, 16  ;;  %v4180_v47 = vpack.i.b16 %v4179_v41, %v4178_v43  ;;  %v4186_v51 = vshrl.u32 %v4138_v45, 16  ;;  %v4184_v19 = vpack.i.b16 %v4172_v39, %v4138_v45 }
 0xeb8   : > { %v4196_v17 = vpack.i.b16 %v4195_v59, %v4194_v57  ;;  %v4202_v1 = vshrl.u32 %v4139_v23, 16  ;;  %v4200_v2 = vpack.i.b16 %v4173_v63, %v4139_v23 }
 0xeb9   : > { %4222 = vxpose.xlu1.c.b16.start.end [1/1] (short) (narrow) %v4180_v47, 16  ;;  %v4188_v56 = vpack.i.b16 %v4187_v53, %v4186_v51 }
 0xeba   : > { %v4204_v4 = vpack.i.b16 %v4203_v3, %v4202_v1  ;;  %v8170_v1 = vld [vmem:[#allocation10 + $0x80] sm:$0xff]  }
 0xebb   : > { %4238 = vxpose.xlu0.c.b16.start.end [1/1] (short) (narrow) %v4184_v19, 16 }
 0xebd   : > { %4254 = vxpose.xlu1.c.b16.start.end [1/1] (short) (narrow) %v4188_v56, 16 }
 0xebf   : > { %4270 = vxpose.xlu0.c.b16.start.end [1/1] (short) (narrow) %v4192_v7, 16 }
 0xec1   : > { %4286 = vxpose.xlu1.c.b16.start.end [1/1] (short) (narrow) %v4196_v17, 16 }
 0xecc   : > { %3955 = vadd.xlane.f32.xlu0 %v3954_v61 }
 0xece   : > { %3958 = vadd.xlane.f32.xlu1 %v3957_v34 }
 0xed0   : > { %3961 = vadd.xlane.f32.xlu0 %v3960_v48 }
 0xed2   : > { %3964 = vadd.xlane.f32.xlu1 %v3963_v46 }
 0xefd   : > { %4302 = vxpose.xlu0.c.b16.start.end [1/1] (short) (narrow) %v4200_v2, 16 }
 0xeff   : > { %4318 = vxpose.xlu1.c.b16.start.end [1/1] (short) (narrow) %v4204_v4, 16 }
 0xf1d   : > { %v4214_v5 = vpop.trf.xlu0 }
 0xf1f   : > { %v4230_v8 = vpop.trf.xlu1 }
 0xf21   : > { %v4246_v9 = vpop.trf.xlu0 }
 0xf23   : > { %v4262_v11 = vpop.trf.xlu1 }
 0xf25   : > { %v4278_v14 = vpop.trf.xlu0 }
 0xf26   : > { %v4334_v26 = vcombine.low %v4214_v5, %v4278_v14  ;;  %v4962_v5 = vld [vmem:[#allocation8 + $0x10] sm:$0x3] }
 0xf27   : > { %v4294_v15 = vpop.trf.xlu1 }
 0xf28   : > { %v4359_v33 = vcombine.low %v4230_v8, %v4294_v15  ;;  %v4341_v42 = vrot.slane %v4334_v26, %v9191_v0  ;;  %v8171_v8 = vld [vmem:[#allocation10 + $0x88] sm:$0xff]  }
 0xf2a   : > { %v4366_v47 = vrot.slane %v4359_v33, %v9191_v0 }
 0xf59   : > { %v3956_v21 = vpop.xlane.xlu0 %3955 }
 0xf5a   : > { %8222 = vrcp.f32 %v3956_v21  ;;  %v4971_v21 = vrot.slane %v4962_v5, %v9168_v32 }
 0xf5b   : > { %v3959_v22 = vpop.xlane.xlu1 %3958 }
 0xf5c   : > { %8224 = vrcp.f32 %v3959_v22  ;;  %v8173_v22 = vld [vmem:[#allocation10 + $0xa8] sm:$0xff]  }
 0xf5d   : > { %v3962_v24 = vpop.xlane.xlu0 %3961 }
 0xf5e   : > { %8226 = vrcp.f32 %v3962_v24 }
 0xf5f   : > { %v3965_v25 = vpop.xlane.xlu1 %3964 }
 0xf60   : > { %8228 = vrcp.f32 %v3965_v25 }
 0xf63   : > { %v4310_v27 = vpop.trf.xlu0 }
 0xf64   : > { %v8223_v31 = vpop.eup %8222  ;;  %v4342_v35 = vcombine.low %v4246_v9, %v4310_v27 }
 0xf65   : > { %v4326_v36 = vpop.trf.xlu1  ;;  %v3970_v40 = vmul.f32 %v8223_v31, %v8215_v10 }
 0xf66   : > { %v8225_v41 = vpop.eup %8224  ;;  %v4349_v43 = vrot.slane %v4342_v35, %v9191_v0  ;;  %v4367_v45 = vcombine.low %v4262_v11, %v4326_v36  ;;  %v4966_v11 = vrot.slane %v4962_v5, %v9166_v29 }
 0xf67   : > { %v3974_v39 = vpack.c.bf16 %v3970_v40, %v3970_v40  ;;  %v3971_v49 = vmul.f32 %v8225_v41, %v8217_v30 }
 0xf68   : > { %v8227_v50 = vpop.eup %8226  ;;  %v4350_v51 = vcombine.low %v4341_v42, %v4349_v43  ;;  %v4374_v28 = vrot.slane %v4367_v45, %v9191_v0  ;;  %v4967_v15 = vmul.f32 %v4966_v11, %v9172_v37  ;;  %v8175_v11 = vld [vmem:[#allocation10 + $0x78] sm:$0xff]  }
 0xf69   : > { %v4400_v52 = vsel %vm1589_vm3, %v3974_v39, 0  ;;  %v3975_v19 = vpack.c.bf16 %v3971_v49, %v3971_v49  ;;  %v3972_v53 = vmul.f32 %v8227_v50, %v8219_v62  ;;  %v4923_v62 = vld [vmem:[#allocation8 + $0xc] sm:$0x3] }
 0xf6a   : > { %v8229_v54 = vpop.eup %8228  ;;  %v4357_v55 = vrot.slane %v4350_v51, %v9193_v6  ;;  %v4375_v56 = vcombine.low %v4366_v47, %v4374_v28  ;;  %7861 = vmatpush3.bf16.xpose.msra.mxu1 %v4400_v52  ;;  %v4927_v46 = vrot.slane %v4923_v62, %v9166_v29  ;;  %v4932_v4 = vrot.slane %v4923_v62, %v9168_v32 }
 0xf6b   : > { %v4446_v57 = vsel %vm1589_vm3, %v3975_v19, 0  ;;  %7872 = vmatprep.subr.bf16.mxu1 %v8674_v16  ;;  %v3973_v58 = vmul.f32 %v8229_v54, %v8221_v20  ;;  %v3976_v7 = vpack.c.bf16 %v3972_v53, %v3972_v53  ;;  %v4972_v24 = vadd.f32 %v4971_v21, %v4967_v15 }
 0xf6c   : > { %v4382_v13 = vrot.slane %v4375_v56, %v9193_v6  ;;  %7867 = vmatpush3.bf16.xpose.msra.mxu0 %v4446_v57  ;;  %v4387_v59 = vshrl.u32 %v4357_v55, 16  ;;  %v4358_v34 = vcombine.high %v4357_v55, %v8681_v12  ;;  %v4928_v3 = vmul.f32 %v4927_v46, %v9434_v18  ;;  %v8172_v18 = vld [vmem:[#allocation10 + $0xa0] sm:$0xff]  }
 0xf6d   : > { %7878 = vmatprep.subr.bf16.mxu0 %v8674_v16  ;;  %v3977_v44 = vpack.c.bf16 %v3973_v58, %v3973_v58  ;;  %v4492_v61 = vsel %vm1589_vm3, %v3976_v7, 0  ;;  %v4973_v25 = vpack.c.bf16 %v4972_v24, %v4972_v24 }
 0xf6e   : > { %v4386_v60 = vpack.i.b16 %v4382_v13, %v4357_v55  ;;  %v4388_v17 = vshrl.u32 %v4382_v13, 16  ;;  %v4383_v30 = vcombine.high %v4382_v13, %v8681_v12  ;;  %v4393_v23 = vshrl.u32 %v4358_v34, 16 }
 0xf6f   : > { %v4538_v20 = vsel %vm1589_vm3, %v3977_v44, 0  ;;  %v4933_v9 = vadd.f32 %v4932_v4, %v4928_v3 }
 0xf70   : > { %v4389_v10 = vpack.i.b16 %v4388_v17, %v4387_v59  ;;  %v4394_v48 = vshrl.u32 %v4383_v30, 16  ;;  %v4392_v63 = vpack.i.b16 %v4383_v30, %v4358_v34 }
 0xf71   : > { %7863 = vmatmul.mubr.msk.bf16.vlgmr.msra.gmra.mrb[36].mxu1 %vm1589_vm3, %v4386_v60  ;;  %v4934_v14 = vpack.c.bf16 %v4933_v9, %v4933_v9 }
 0xf72   : > { %7873 = vmatpush3.bf16.xpose.msra.mxu1 %v4492_v61  ;;  %7874 = vmatprep.mubr.msk.bf16.mxu1 %vm8675_vm1, %v8674_v16  ;;  %v4395_v2 = vpack.i.b16 %v4394_v48, %v4393_v23  ;;  %v8174_v23 = vld [vmem:[#allocation10 + $0x70] sm:$0xff]  }
 0xf73   : > { %7869 = vmatmul.mubr.msk.bf16.vlgmr.msra.gmra.mrb[40].mxu0 %vm1589_vm3, %v4389_v10  ;;  %7884 = vmatprep.subr.bf16.mxu1 %v8674_v16 }
 0xf74   : > { %7879 = vmatpush3.bf16.xpose.msra.mxu0 %v4538_v20  ;;  %7880 = vmatprep.mubr.msk.bf16.mxu0 %vm8675_vm1, %v8674_v16 }
 0xf75   : > { %7892 = vmatprep.subr.bf16.mxu0 %v8674_v16 }
 0xf79   : > { %7875 = vmatmul.mubr.msk.bf16.vlgmr.msra.gmra.mrb[40].mxu1 %vm1589_vm3, %v4392_v63 }
 0xf7a   : > { %7888 = vmatprep.mubr.msk.bf16.mxu1 %vm8675_vm1, %v8674_v16  ;;  %7885 = vmatpush3.bf16.msra.mxu1 %v8174_v23 }
 0xf7b   : > { %7881 = vmatmul.mubr.msk.bf16.vlgmr.msra.gmra.mrb[44].mxu0 %vm1589_vm3, %v4395_v2  ;;  %7886 = vmatprep.subr.bf16.mxu1 %v8674_v16 }
 0xf7c   : > { %7893 = vmatpush3.bf16.msra.mxu0 %v8170_v1  ;;  %7896 = vmatprep.mubr.msk.bf16.mxu0 %vm8675_vm1, %v8674_v16 }
 0xf7d   : > { %7894 = vmatprep.subr.bf16.mxu0 %v8674_v16 }
 0xf7e   : > { %7887 = vmatpush3.bf16.msra.mxu1 %v8175_v11 }
 0xf7f   : > { %7900 = vmatprep.subr.bf16.mxu1 %v8674_v16 }
 0xf80   : > { %7895 = vmatpush3.bf16.msra.mxu0 %v8171_v8 }
 0xf81   : > { %7908 = vmatprep.subr.bf16.mxu0 %v8674_v16 }
 0xf83   : > { %7897 = vmatmul.mubr.msk.bf16.vlgmr.msra.gmra.mrb[48].mxu0 %vm588_vm0, %v4934_v14 }
 0xf84   : > { %7909 = vmatpush3.bf16.msra.mxu0 %v8172_v18  ;;  %7912 = vmatprep.mubr.msk.bf16.mxu0 %vm8675_vm1, %v8674_v16 }
 0xf85   : > { %7910 = vmatprep.subr.bf16.mxu0 %v8674_v16 }
 0xf88   : > { %7911 = vmatpush3.bf16.msra.mxu0 %v8173_v22 }
 0xf89   : > { %7922 = vmatprep.subr.bf16.mxu0 %v8674_v16 }
 0xf8b   : > { %7913 = vmatmul.mubr.msk.bf16.vlgmr.msra.gmra.mrb[52].mxu0 %vm588_vm0, %v4973_v25 }
 0xf8c   : > { %7924 = vmatprep.mubr.msk.bf16.mxu0 %vm8675_vm1, %v8674_v16 }
0x1044   : > { %v4436_v37 = vpop.f32.mrb[36].mxu1 }
0x1045   : > { %4580 = vxpose.xlu0.b32.start.end [1/1] (short) (narrow) %v4436_v37, 8  ;;  %v7864_v26 = vpop.f32.mrb[37].mxu1 }
0x1046   : > { %v4439_v27 = vpop.f32.mrb[38].mxu1  ;;  %v4482_v31 = vpop.f32.mrb[40].mxu0 }
0x1047   : > { %4612 = vxpose.xlu1.b32.start.end [1/1] (short) (narrow) %v4482_v31, 8  ;;  %v7865_v33 = vpop.f32.mrb[39].mxu1  ;;  %v7870_v35 = vpop.f32.mrb[41].mxu0 }
0x1048   : > { %v4485_v36 = vpop.f32.mrb[42].mxu0 }
0x1049   : > { %v7871_v40 = vpop.f32.mrb[43].mxu0 }
0x104c   : > { %v4528_v41 = vpop.f32.mrb[40].mxu1 }
0x104d   : > { %4644 = vxpose.xlu0.b32.start.end [1/1] (short) (narrow) %v4528_v41, 8  ;;  %v7876_v42 = vpop.f32.mrb[41].mxu1 }
0x104e   : > { %v4531_v43 = vpop.f32.mrb[42].mxu1  ;;  %v4574_v45 = vpop.f32.mrb[44].mxu0 }
0x104f   : > { %v7877_v39 = vpop.f32.mrb[43].mxu1  ;;  %v7882_v49 = vpop.f32.mrb[45].mxu0 }
0x1050   : > { %v4577_v50 = vpop.f32.mrb[46].mxu0 }
0x1051   : > { %v7883_v47 = vpop.f32.mrb[47].mxu0  ;;  %4676 = vxpose.xlu0.b32.start.end [1/1] (short) (narrow) %v4574_v45, 8 }
0x1056   : > { %v9617_v51 = vpop.f32.mrb[48].mxu0 }
0x1057   : > { %v7898_v28 = vpop.f32.mrb[49].mxu0 }
0x1058   : > { %v5048_v52 = vpop.f32.mrb[50].mxu0  ;;  %v7585_v28 = vld [vmem:[#allocation11 + $0x1] ss:$0 sm:$0xff] }
0x1059   : > { %v7899_v19 = vpop.f32.mrb[51].mxu0 }
0x105e   : > { %v9619_v53 = vpop.f32.mrb[52].mxu0 }
0x105f   : > { %v7914_v54 = vpop.f32.mrb[53].mxu0 }
0x1060   : > { %v5158_v55 = vpop.f32.mrb[54].mxu0 }
0x1061   : > { %v7915_v56 = vpop.f32.mrb[55].mxu0 }
0x1062   : > { %v8253_v56 = vld [vmem:[%s493_s14] sm:$0xff]  ;;  %s8575_s14 = scalar_lea.vmem %s8574_s20, 256 }
0x1063   : > { %p8577_p1 = scmp.lt.s32.totalorder %s8575_s14, %s8569_s9 }
0x1065   : > { %p8578_p11 = por %p8577_p1, %p8576_p13 }
0x1067   : > { %p8579_p3 = pnand %p8578_p11, %p8572_p9 }
0x10c5   : > { %v4596_v57 = vpop.trf.xlu0 }
0x10c7   : > { %v4628_v13 = vpop.trf.xlu1 }
0x10cd   : > { %v4660_v58 = vpop.trf.xlu0 }
0x10ce   : > { %v4708_v7 = vcombine.low %v4596_v57, %v4660_v58  ;;  %v4709_v59 = vcombine.high %v4596_v57, %v4660_v58 }
0x10d0   : > { %v4716_v10 = vrot.slane %v4708_v7, %v9191_v0  ;;  %v4723_v30 = vrot.slane %v4709_v59, %v9191_v0 }
0x10d1   : > { %v4692_v60 = vpop.trf.xlu0 }
0x10d2   : > { %v4724_v17 = vcombine.low %v4628_v13, %v4692_v60  ;;  %v4725_v44 = vcombine.high %v4628_v13, %v4692_v60 }
0x10d4   : > { %v4732_v61 = vrot.slane %v4724_v17, %v9191_v0  ;;  %v4739_v62 = vrot.slane %v4725_v44, %v9191_v0 }
0x10d6   : > { %v4740_v34 = vcombine.low %v4716_v10, %v4732_v61  ;;  %v4741_v20 = vcombine.high %v4716_v10, %v4732_v61  ;;  %v4756_v48 = vcombine.low %v4723_v30, %v4739_v62  ;;  %v4757_v46 = vcombine.high %v4723_v30, %v4739_v62  ;;  %v8176_v10 = vld [vmem:[#allocation10 + $0x90] sm:$0xff]   ;;  %v8177_v30 = vld [vmem:[#allocation10 + $0x98] sm:$0xff]  }
0x10d8   : > { %v4748_v63 = vrot.slane %v4740_v34, %v9193_v6  ;;  %v4755_v1 = vrot.slane %v4741_v20, %v9193_v6  ;;  %v4764_v2 = vrot.slane %v4756_v48, %v9193_v6  ;;  %v4771_v3 = vrot.slane %v4757_v46, %v9193_v6  ;;  %v4936_v20 = vld [vmem:[#allocation8 + $0xe] sm:$0x3] }
0x10d9   : > { %v4953_v48 = vrot.slane %v4936_v20, %v9166_v29 }
0x10da   : > { %v4776_v4 = vcombine.low %v4748_v63, %v4755_v1  ;;  %v7583_v5 = vcombine.high %v4748_v63, %v4755_v1  ;;  %v4792_v8 = vcombine.low %v4764_v2, %v4771_v3  ;;  %v7584_v9 = vcombine.high %v4764_v2, %v4771_v3 }
0x10db   : > { %v4958_v63 = vrot.slane %v4936_v20, %v9168_v32 }
0x10dc   : > { %v4783_v18 = vrot.slane %v4776_v4, %v9191_v0  ;;  %v4791_v14 = vrot.slane %v7583_v5, %v9191_v0  ;;  %v4799_v15 = vrot.slane %v4792_v8, %v9191_v0  ;;  %v4807_v21 = vrot.slane %v7584_v9, %v9191_v0 }
0x10de   : > { %v4809_v22 = vcombine.high %v4783_v18, %v4791_v14  ;;  %v4825_v24 = vcombine.high %v4799_v15, %v4807_v21  ;;  %v4808_v25 = vcombine.low %v4783_v18, %v4791_v14  ;;  %v4824_v37 = vcombine.low %v4799_v15, %v4807_v21 }
0x10e0   : > { %v4823_v26 = vrot.slane %v4809_v22, %v9193_v6  ;;  %v4839_v27 = vrot.slane %v4825_v24, %v9193_v6  ;;  %v4816_v31 = vrot.slane %v4808_v25, %v9193_v6  ;;  %v4832_v33 = vrot.slane %v4824_v37, %v9193_v6 }
0x10e2   : > { %v4842_v35 = vcombine.low %v4823_v26, %v4839_v27  ;;  %v4841_v36 = vcombine.high %v4816_v31, %v4832_v33  ;;  %v4840_v40 = vcombine.low %v4816_v31, %v4832_v33  ;;  %v4843_v41 = vcombine.high %v4823_v26, %v4839_v27 }
0x10e4   : > { %4849 = vrot.lane.b32.xlu0 %v4842_v35, %s8682_s17  ;;  %4845 = vrot.lane.b32.xlu1 %v4841_v36, %s8683_s1 }
0x10e8   : > { %4853 = vrot.lane.b32.xlu1 %v4843_v41, %s8684_s3 }
0x1156   : > { %v4846_v42 = vpop.permute.xlu1 %4845  ;;  %v4850_v43 = vpop.permute.xlu0 %4849 }
0x1157   : > { %v4856_v45 = vsel %vm1589_vm3, %v4840_v40, %v4846_v42 }
0x1158   : > { %v4857_v49 = vsel %vm2702_vm4, %v4856_v45, %v4850_v43 }
0x115a   : > { %v4854_v39 = vpop.permute.xlu1 %4853 }
0x115b   : > { %v4858_v50 = vsel %vm2704_vm5, %v4857_v49, %v4854_v39 }
0x115c   : > { %v4859_v47 = vpack.c.bf16 %v4858_v50, %v4858_v50 }
0x115e   : > { %7889 = vmatmul.mubr.msk.bf16.vlgmr.msra.gmra.mrb[44].mxu1 %vm588_vm0, %v4859_v47 }
0x115f   : > { %7904 = vmatprep.mubr.msk.bf16.mxu1 %vm8675_vm1, %v8674_v16  ;;  %7901 = vmatpush3.bf16.msra.mxu1 %v8176_v10 }
0x1160   : > { %7902 = vmatprep.subr.bf16.mxu1 %v8674_v16 }
0x1163   : > { %7903 = vmatpush3.bf16.msra.mxu1 %v8177_v30 }
0x1164   : > { %7916 = vmatprep.subr.bf16.mxu1 %v8674_v16 }
0x1231   : > { %v4915_v52 = vpop.f32.mrb[44].mxu1 }
0x1232   : > { %v4916_v19 = vadd.f32 %v7585_v28, %v4915_v52  ;;  %v7890_v54 = vpop.f32.mrb[45].mxu1 }
0x1233   : > { %v4918_v55 = vpop.f32.mrb[46].mxu1 }
0x1234   : > { %v9650_v57 = vadd.f32 %v8253_v56, %v4916_v19  ;;  %v7891_v58 = vpop.f32.mrb[47].mxu1 }
0x1236   : > { %v4937_v13 = vsel %vm588_vm0, %v9650_v57, 0.0 }
0x1237   : > { %4938 = vadd.xlane.f32.xlu1 %v4937_v13 }
0x12c4   : > { %v4939_v7 = vpop.xlane.xlu1 %4938 }
0x12c5   : > { %v4940_v59 = vmul.f32 0.03125, %v4939_v7 }
0x12c7   : > { %v4941_v60 = vsub.f32 %v9650_v57, %v4940_v59 }
0x12c9   : > { %v4942_v17 = vmul.f32 %v4941_v60, %v4941_v60 }
0x12cb   : > { %v4943_v44 = vsel %vm588_vm0, %v4942_v17, 0.0 }
0x12cc   : > { %4944 = vadd.xlane.f32.xlu0 %v4943_v44 }
0x1359   : > { %v4945_v61 = vpop.xlane.xlu0 %4944 }
0x135a   : > { %v4946_v62 = vmul.f32 0.03125, %v4945_v61 }
0x135c   : > { %v4947_v34 = vadd.f32 1e-05, %v4946_v62 }
0x135e   : > { %8230 = vrsqrt.f32 %v4947_v34 }
0x1368   : > { %v8231_v46 = vpop.eup %8230 }
0x1369   : > { %v4949_v23 = vmul.f32 %v8231_v46, %v4941_v60 }
0x136b   : > { %v4954_v1 = vmul.f32 %v4953_v48, %v4949_v23 }
0x136d   : > { %v4959_v2 = vadd.f32 %v4958_v63, %v4954_v1 }
0x136f   : > { %v4960_v3 = vpack.c.bf16 %v4959_v2, %v4959_v2 }
0x1371   : > { %7905 = vmatmul.mubr.msk.bf16.vlgmr.msra.gmra.mrb[48].mxu1 %vm588_vm0, %v4960_v3 }
0x1372   : > { %7918 = vmatprep.mubr.msk.bf16.mxu1 %vm8675_vm1, %v8674_v16 }
0x1444   : > { %v5100_v4 = vpop.f32.mrb[48].mxu1 }
0x1445   : > { %5251 = vrot.lane.b32.xlu0 %v5100_v4, %s8677_s27  ;;  %5248 = vrot.lane.b32.xlu1 %v5100_v4, %s8676_s11  ;;  %v7906_v5 = vpop.f32.mrb[49].mxu1 }
0x1446   : > { %v5103_v8 = vpop.f32.mrb[50].mxu1 }
0x1447   : > { %v7907_v29 = vpop.f32.mrb[51].mxu1 }
0x1449   : > { %5254 = vrot.lane.b32.xlu1 %v5100_v4, %s8678_s26 }
0x14b7   : > { %v5252_v9 = vpop.permute.xlu0 %5251  ;;  %v5249_v32 = vpop.permute.xlu1 %5248 }
0x14b8   : > { %v5257_v11 = vcombine.low %v5100_v4, %v5252_v9  ;;  %v5258_v18 = vcombine.high %v5100_v4, %v5252_v9 }
0x14ba   : > { %v5265_v22 = vrot.slane %v5257_v11, %v9191_v0  ;;  %v5272_v24 = vrot.slane %v5258_v18, %v9191_v0 }
0x14bb   : > { %v5255_v14 = vpop.permute.xlu1 %5254 }
0x14bc   : > { %v5273_v15 = vcombine.low %v5249_v32, %v5255_v14  ;;  %v5274_v21 = vcombine.high %v5249_v32, %v5255_v14 }
0x14be   : > { %v5281_v25 = vrot.slane %v5273_v15, %v9191_v0  ;;  %v5288_v37 = vrot.slane %v5274_v21, %v9191_v0 }
0x14c0   : > { %v5289_v26 = vcombine.low %v5265_v22, %v5281_v25  ;;  %v5290_v27 = vcombine.high %v5265_v22, %v5281_v25  ;;  %v5305_v31 = vcombine.low %v5272_v24, %v5288_v37  ;;  %v5306_v36 = vcombine.high %v5272_v24, %v5288_v37 }
0x14c2   : > { %v5297_v33 = vrot.slane %v5289_v26, %v9193_v6  ;;  %v5304_v35 = vrot.slane %v5290_v27, %v9193_v6  ;;  %v5313_v42 = vrot.slane %v5305_v31, %v9193_v6  ;;  %v5320_v49 = vrot.slane %v5306_v36, %v9193_v6 }
0x14c4   : > { %v5327_v40 = vpack.c.bf16 %v5304_v35, %v5304_v35  ;;  %v5325_v41 = vpack.c.bf16 %v5297_v33, %v5297_v33  ;;  %v5322_v43 = vcombine.high %v5304_v35, %v8674_v16  ;;  %v5329_v45 = vpack.c.bf16 %v5313_v42, %v5313_v42 }
0x14c5   : > { %v5323_v50 = vcombine.high %v5313_v42, %v8674_v16  ;;  %v5331_v47 = vpack.c.bf16 %v5320_v49, %v5320_v49  ;;  %v5324_v52 = vcombine.high %v5320_v49, %v8674_v16  ;;  %v5321_v19 = vcombine.high %v5297_v33, %v8674_v16 }
0x14c6   : > { %5513 = vxpose.xlu0.c.b16.start.end [1/1] (short) (narrow) %v5327_v40, 16  ;;  %5481 = vxpose.xlu1.c.b16.start.end [1/1] (short) (narrow) %v5325_v41, 16  ;;  %v5328_v39 = vpack.c.bf16 %v5322_v43, %v5322_v43 }
0x14c7   : > { %v5330_v28 = vpack.c.bf16 %v5323_v50, %v5323_v50  ;;  %v5332_v54 = vpack.c.bf16 %v5324_v52, %v5324_v52  ;;  %v5326_v55 = vpack.c.bf16 %v5321_v19, %v5321_v19 }
0x14ca   : > { %5545 = vxpose.xlu0.c.b16.start.end [1/1] (short) (narrow) %v5329_v45, 16  ;;  %5529 = vxpose.xlu1.c.b16.start.end [1/1] (short) (narrow) %v5328_v39, 16 }
0x14ce   : > { %5577 = vxpose.xlu0.c.b16.start.end [1/1] (short) (narrow) %v5331_v47, 16  ;;  %5561 = vxpose.xlu1.c.b16.start.end [1/1] (short) (narrow) %v5330_v28, 16 }
0x14d2   : > { %5593 = vxpose.xlu1.c.b16.start.end [1/1] (short) (narrow) %v5332_v54, 16  ;;  %5497 = vxpose.xlu0.c.b16.start.end [1/1] (short) (narrow) %v5326_v55, 16 }
0x14d6   : > { %5165 = vrot.lane.b32.xlu1 %v9617_v51, %s8677_s27 }
0x14da   : > { %5168 = vrot.lane.b32.xlu1 %v9617_v51, %s8678_s26 }
0x14db   : > { %5162 = vrot.lane.b32.xlu0 %v9617_v51, %s8676_s11 }
0x152c   : > { %v5521_v56 = vpop.trf.xlu0  ;;  %v5489_v58 = vpop.trf.xlu1 }
0x1530   : > { %v5553_v13 = vpop.trf.xlu0  ;;  %v5537_v7 = vpop.trf.xlu1 }
0x1531   : > { %v5609_v17 = vcombine.low %v5489_v58, %v5553_v13 }
0x1533   : > { %v5616_v62 = vrot.slane %v5609_v17, %v9191_v0 }
0x1534   : > { %v5585_v59 = vpop.trf.xlu0  ;;  %v5569_v60 = vpop.trf.xlu1 }
0x1535   : > { %v5617_v44 = vcombine.low %v5521_v56, %v5585_v59 }
0x1537   : > { %v5624_v10 = vrot.slane %v5617_v44, %v9191_v0 }
0x1538   : > { %v5601_v30 = vpop.trf.xlu1  ;;  %v5505_v61 = vpop.trf.xlu0 }
0x1539   : > { %v5651_v34 = vcombine.low %v5537_v7, %v5601_v30  ;;  %v5643_v20 = vcombine.low %v5505_v61, %v5569_v60  ;;  %v5625_v48 = vcombine.low %v5616_v62, %v5624_v10  ;;  %v5626_v46 = vcombine.high %v5616_v62, %v5624_v10 }
0x153b   : > { %v5658_v23 = vrot.slane %v5651_v34, %v9191_v0  ;;  %v5650_v63 = vrot.slane %v5643_v20, %v9191_v0  ;;  %v5633_v3 = vrot.slane %v5625_v48, %v9193_v6  ;;  %v5640_v4 = vrot.slane %v5626_v46, %v9193_v6 }
0x153d   : > { %v5659_v1 = vcombine.low %v5650_v63, %v5658_v23  ;;  %v5660_v2 = vcombine.high %v5650_v63, %v5658_v23  ;;  %v5681_v18 = vshrl.u32 %v5633_v3, 16  ;;  %v5641_v14 = vcombine.high %v5633_v3, %v8681_v12 }
0x153e   : > { %v5642_v25 = vcombine.high %v5640_v4, %v8681_v12  ;;  %v5697_v37 = vshrl.u32 %v5640_v4, 16 }
0x153f   : > { %v5667_v5 = vrot.slane %v5659_v1, %v9193_v6  ;;  %v5674_v8 = vrot.slane %v5660_v2, %v9193_v6  ;;  %v5689_v33 = vshrl.u32 %v5641_v14, 16 }
0x1540   : > { %v5705_v40 = vshrl.u32 %v5642_v25, 16 }
0x1541   : > { %v5695_v29 = vpack.i.b16 %v5674_v8, %v5640_v4  ;;  %v5679_v9 = vpack.i.b16 %v5667_v5, %v5633_v3  ;;  %v5682_v32 = vshrl.u32 %v5667_v5, 16  ;;  %v5675_v11 = vcombine.high %v5667_v5, %v8681_v12 }
0x1542   : > { %v5676_v22 = vcombine.high %v5674_v8, %v8681_v12  ;;  %v5698_v24 = vshrl.u32 %v5674_v8, 16 }
0x1543   : > { %5773 = vxpose.xlu1.c.b16.start.end [1/1] (short) (narrow) %v5695_v29, 16  ;;  %5709 = vxpose.xlu0.c.b16.start.end [1/1] (short) (narrow) %v5679_v9, 16  ;;  %v5683_v15 = vpack.i.b16 %v5682_v32, %v5681_v18  ;;  %v5687_v21 = vpack.i.b16 %v5675_v11, %v5641_v14  ;;  %v5690_v31 = vshrl.u32 %v5675_v11, 16 }
0x1544   : > { %v5703_v26 = vpack.i.b16 %v5676_v22, %v5642_v25  ;;  %v5699_v27 = vpack.i.b16 %v5698_v24, %v5697_v37  ;;  %v5706_v36 = vshrl.u32 %v5676_v22, 16 }
0x1545   : > { %v5691_v35 = vpack.i.b16 %v5690_v31, %v5689_v33 }
0x1546   : > { %v5707_v41 = vpack.i.b16 %v5706_v36, %v5705_v40 }
0x1547   : > { %5725 = vxpose.xlu1.c.b16.start.end [1/1] (short) (narrow) %v5683_v15, 16  ;;  %5741 = vxpose.xlu0.c.b16.start.end [1/1] (short) (narrow) %v5687_v21, 16 }
0x1548   : > { %v5166_v42 = vpop.permute.xlu1 %5165 }
0x1549   : > { %v5171_v50 = vcombine.low %v9617_v51, %v5166_v42  ;;  %v5172_v47 = vcombine.high %v9617_v51, %v5166_v42 }
0x154b   : > { %5805 = vxpose.xlu1.c.b16.start.end [1/1] (short) (narrow) %v5703_v26, 16  ;;  %5789 = vxpose.xlu0.c.b16.start.end [1/1] (short) (narrow) %v5699_v27, 16  ;;  %v5179_v19 = vrot.slane %v5171_v50, %v9191_v0  ;;  %v5186_v54 = vrot.slane %v5172_v47, %v9191_v0 }
0x154c   : > { %v5169_v43 = vpop.permute.xlu1 %5168 }
0x154d   : > { %v5163_v45 = vpop.permute.xlu0 %5162 }
0x154e   : > { %v5187_v39 = vcombine.low %v5163_v45, %v5169_v43  ;;  %v5188_v49 = vcombine.high %v5163_v45, %v5169_v43 }
0x154f   : > { %5334 = vrot.lane.b32.xlu1 %v9619_v53, %s8676_s11  ;;  %5757 = vxpose.xlu0.c.b16.start.end [1/1] (short) (narrow) %v5691_v35, 16 }
0x1550   : > { %v5195_v28 = vrot.slane %v5187_v39, %v9191_v0  ;;  %v5202_v52 = vrot.slane %v5188_v49, %v9191_v0 }
0x1552   : > { %v5203_v55 = vcombine.low %v5179_v19, %v5195_v28  ;;  %v5204_v56 = vcombine.high %v5179_v19, %v5195_v28  ;;  %v5219_v58 = vcombine.low %v5186_v54, %v5202_v52  ;;  %v5220_v13 = vcombine.high %v5186_v54, %v5202_v52 }
0x1553   : > { %5340 = vrot.lane.b32.xlu1 %v9619_v53, %s8678_s26  ;;  %5821 = vxpose.xlu0.c.b16.start.end [1/1] (short) (narrow) %v5707_v41, 16 }
0x1554   : > { %v5211_v60 = vrot.slane %v5203_v55, %v9193_v6  ;;  %v5218_v17 = vrot.slane %v5204_v56, %v9193_v6  ;;  %v5227_v51 = vrot.slane %v5219_v58, %v9193_v6  ;;  %v5234_v44 = vrot.slane %v5220_v13, %v9193_v6 }
0x1556   : > { %v5235_v61 = vcombine.high %v5211_v60, %v8674_v16  ;;  %v5236_v62 = vcombine.high %v5218_v17, %v8674_v16  ;;  %v5237_v34 = vcombine.high %v5227_v51, %v8674_v16  ;;  %v5238_v20 = vcombine.high %v5234_v44, %v8674_v16 }
0x1557   : > { %v7598_v3 = vpack.c.bf16 %v5227_v51, %v5211_v60  ;;  %v7599_v4 = vpack.c.bf16 %v5234_v44, %v5218_v17 }
0x1558   : > { %v7600_v63 = vpack.c.bf16 %v5237_v34, %v5235_v61  ;;  %v7601_v1 = vpack.c.bf16 %v5238_v20, %v5236_v62 }
0x1559   : > { %v5426_v18 = vrot.slane %v7598_v3, %v9191_v0  ;;  %v5434_v14 = vrot.slane %v7599_v4, %v9191_v0 }
0x155a   : > { %v5451_v29 = vrot.slane %v7600_v63, %v9191_v0  ;;  %v5459_v9 = vrot.slane %v7601_v1, %v9191_v0 }
0x155b   : > { %v5435_v26 = vcombine.low %v5426_v18, %v5434_v14 }
0x155c   : > { %5337 = vrot.lane.b32.xlu0 %v9619_v53, %s8677_s27  ;;  %v5460_v24 = vcombine.low %v5451_v29, %v5459_v9 }
0x155d   : > { %v5442_v36 = vrot.slane %v5435_v26, %v9193_v6 }
0x155e   : > { %v5467_v33 = vrot.slane %v5460_v24, %v9193_v6 }
0x155f   : > { %v5472_v56 = vshrl.u32 %v5442_v36, 16  ;;  %v5443_v51 = vcombine.high %v5442_v36, %v8681_v12 }
0x1560   : > { %v5473_v39 = vshrl.u32 %v5467_v33, 16  ;;  %v5471_v55 = vpack.i.b16 %v5467_v33, %v5442_v36 }
0x1561   : > { %v5478_v62 = vshrl.u32 %v5443_v51, 16 }
0x15a9   : > { %v5781_v7 = vpop.trf.xlu1  ;;  %v5717_v59 = vpop.trf.xlu0 }
0x15aa   : > { %v5837_v2 = vcombine.low %v5717_v59, %v5781_v7  ;;  %v5474_v7 = vpack.i.b16 %v5473_v39, %v5472_v56  ;;  %v5468_v59 = vcombine.high %v5467_v33, %v8681_v12 }
0x15ac   : > { %v5844_v32 = vrot.slane %v5837_v2, %v9191_v0  ;;  %v5479_v44 = vshrl.u32 %v5468_v59, 16  ;;  %v5477_v61 = vpack.i.b16 %v5468_v59, %v5443_v51 }
0x15ad   : > { %v5733_v10 = vpop.trf.xlu1  ;;  %v5749_v30 = vpop.trf.xlu0 }
0x15ae   : > { %v5480_v20 = vpack.i.b16 %v5479_v44, %v5478_v62 }
0x15b1   : > { %v5813_v48 = vpop.trf.xlu1  ;;  %v5797_v46 = vpop.trf.xlu0 }
0x15b2   : > { %v5845_v23 = vcombine.low %v5749_v30, %v5813_v48  ;;  %v5862_v11 = vcombine.low %v5733_v10, %v5797_v46 }
0x15b4   : > { %v5852_v5 = vrot.slane %v5845_v23, %v9191_v0  ;;  %v5869_v25 = vrot.slane %v5862_v11, %v9191_v0 }
0x15b5   : > { %v5765_v8 = vpop.trf.xlu0 }
0x15b6   : > { %v5853_v15 = vcombine.low %v5844_v32, %v5852_v5 }
0x15b8   : > { %v5860_v27 = vrot.slane %v5853_v15, %v9193_v6 }
0x15b9   : > { %v5829_v21 = vpop.trf.xlu0 }
0x15ba   : > { %v5870_v22 = vcombine.low %v5765_v8, %v5829_v21  ;;  %v5861_v40 = vcombine.high %v5860_v27, %v8681_v12  ;;  %v5890_v42 = vshrl.u32 %v5860_v27, 16 }
0x15bc   : > { %v5877_v37 = vrot.slane %v5870_v22, %v9191_v0  ;;  %v5896_v19 = vshrl.u32 %v5861_v40, 16 }
0x15be   : > { %v5878_v31 = vcombine.low %v5869_v25, %v5877_v37 }
0x15c0   : > { %v5885_v35 = vrot.slane %v5878_v31, %v9193_v6 }
0x15c1   : > { %v9730_v49 = vpop.permute.xlu1 %5334 }
0x15c2   : > { %v5889_v41 = vpack.i.b16 %v5885_v35, %v5860_v27  ;;  %v5891_v43 = vshrl.u32 %v5885_v35, 16  ;;  %v5886_v45 = vcombine.high %v5885_v35, %v8681_v12 }
0x15c4   : > { %v5903_v50 = vsel %vm1593_vm2, %v5889_v41, 0  ;;  %v5892_v47 = vpack.i.b16 %v5891_v43, %v5890_v42  ;;  %v5895_v28 = vpack.i.b16 %v5886_v45, %v5861_v40  ;;  %v5897_v52 = vshrl.u32 %v5886_v45, 16 }
0x15c5   : > { %7917 = vmatpush3.bf16.msra.mxu1 %v5903_v50  ;;  %v5341_v60 = vpop.permute.xlu1 %5340 }
0x15c6   : > { %v5949_v54 = vsel %vm1593_vm2, %v5892_v47, 0  ;;  %7928 = vmatprep.subr.bf16.mxu1 %v8674_v16  ;;  %v5898_v58 = vpack.i.b16 %v5897_v52, %v5896_v19  ;;  %v5995_v13 = vsel %vm1593_vm2, %v5895_v28, 0  ;;  %v5360_v10 = vcombine.high %v9730_v49, %v5341_v60 }
0x15c7   : > { %7923 = vmatpush3.bf16.msra.mxu0 %v5949_v54  ;;  %v5359_v27 = vcombine.low %v9730_v49, %v5341_v60 }
0x15c8   : > { %7919 = vmatmul.mubr.msk.bf16.vlgmr.msra.gmra.mrb[52].mxu1 %vm1589_vm3, %v5471_v55  ;;  %7934 = vmatprep.subr.bf16.mxu0 %v8674_v16  ;;  %v6041_v17 = vsel %vm1593_vm2, %v5898_v58, 0  ;;  %v5374_v48 = vrot.slane %v5360_v10, %v9191_v0 }
0x15c9   : > { %7929 = vmatpush3.bf16.msra.mxu1 %v5995_v13  ;;  %7930 = vmatprep.mubr.msk.bf16.mxu1 %vm8675_vm1, %v8674_v16  ;;  %v5367_v33 = vrot.slane %v5359_v27, %v9191_v0 }
0x15ca   : > { %7925 = vmatmul.mubr.msk.bf16.vlgmr.msra.gmra.mrb[56].mxu0 %vm1589_vm3, %v5474_v7  ;;  %7940 = vmatprep.subr.bf16.mxu1 %v8674_v16 }
0x15cb   : > { %7935 = vmatpush3.bf16.msra.mxu0 %v6041_v17  ;;  %7936 = vmatprep.mubr.msk.bf16.mxu0 %vm8675_vm1, %v8674_v16 }
0x15cc   : > { %7946 = vmatprep.subr.bf16.mxu0 %v8674_v16 }
0x15ce   : > { %v5338_v30 = vpop.permute.xlu0 %5337 }
0x15cf   : > { %v5344_v34 = vcombine.high %v9619_v53, %v5338_v30  ;;  %v5343_v26 = vcombine.low %v9619_v53, %v5338_v30 }
0x15d0   : > { %7931 = vmatmul.mubr.msk.bf16.vlgmr.msra.gmra.mrb[56].mxu1 %vm1589_vm3, %v5477_v61 }
0x15d1   : > { %v5358_v46 = vrot.slane %v5344_v34, %v9191_v0  ;;  %7942 = vmatprep.mubr.msk.bf16.mxu1 %vm8675_vm1, %v8674_v16  ;;  %v5351_v31 = vrot.slane %v5343_v26, %v9191_v0 }
0x15d2   : > { %7937 = vmatmul.mubr.msk.bf16.vlgmr.msra.gmra.mrb[60].mxu0 %vm1589_vm3, %v5480_v20 }
0x15d3   : > { %v5391_v23 = vcombine.low %v5358_v46, %v5374_v48  ;;  %v5392_v63 = vcombine.high %v5358_v46, %v5374_v48  ;;  %7948 = vmatprep.mubr.msk.bf16.mxu0 %vm8675_vm1, %v8674_v16  ;;  %v5375_v35 = vcombine.low %v5351_v31, %v5367_v33  ;;  %v5376_v45 = vcombine.high %v5351_v31, %v5367_v33 }
0x15d5   : > { %v5383_v36 = vrot.slane %v5375_v35, %v9193_v6  ;;  %v5390_v39 = vrot.slane %v5376_v45, %v9193_v6  ;;  %v5399_v50 = vrot.slane %v5391_v23, %v9193_v6  ;;  %v5406_v52 = vrot.slane %v5392_v63, %v9193_v6 }
0x15d7   : > { %v5407_v40 = vcombine.high %v5383_v36, %v8674_v16  ;;  %v5411_v41 = vpack.c.bf16 %v5383_v36, %v5383_v36  ;;  %v5408_v49 = vcombine.high %v5390_v39, %v8674_v16  ;;  %v5409_v28 = vcombine.high %v5399_v50, %v8674_v16 }
0x15d8   : > { %v5413_v19 = vpack.c.bf16 %v5390_v39, %v5390_v39  ;;  %v5410_v55 = vcombine.high %v5406_v52, %v8674_v16  ;;  %v5415_v56 = vpack.c.bf16 %v5399_v50, %v5399_v50  ;;  %v5417_v13 = vpack.c.bf16 %v5406_v52, %v5406_v52 }
0x15d9   : > { %v5412_v42 = vpack.c.bf16 %v5407_v40, %v5407_v40  ;;  %v5414_v47 = vpack.c.bf16 %v5408_v49, %v5408_v49  ;;  %v5416_v54 = vpack.c.bf16 %v5409_v28, %v5409_v28 }
0x15da   : > { %v5418_v58 = vpack.c.bf16 %v5410_v55, %v5410_v55 }
0x169b   : > { %v9758_v1 = vpop.f32.mrb[52].mxu1 }
0x169c   : > { %v7920_v2 = vpop.f32.mrb[53].mxu1  ;;  %v6083_v3 = vsel %vm1589_vm3, %v9758_v1, -inf }
0x169d   : > { %v9762_v4 = vpop.f32.mrb[56].mxu0  ;;  %6084 = vmax.xlane.f32.xlu1 %v6083_v3  ;;  %v5942_v5 = vpop.f32.mrb[54].mxu1 }
0x169e   : > { %v7921_v8 = vpop.f32.mrb[55].mxu1  ;;  %v7926_v29 = vpop.f32.mrb[57].mxu0  ;;  %v6086_v9 = vsel %vm1589_vm3, %v9762_v4, -inf }
0x169f   : > { %6087 = vmax.xlane.f32.xlu0 %v6086_v9  ;;  %v5988_v32 = vpop.f32.mrb[58].mxu0 }
0x16a0   : > { %v7927_v11 = vpop.f32.mrb[59].mxu0 }
0x16a3   : > { %v9766_v18 = vpop.f32.mrb[56].mxu1 }
0x16a4   : > { %v7932_v14 = vpop.f32.mrb[57].mxu1  ;;  %v6089_v43 = vsel %vm1589_vm3, %v9766_v18, -inf }
0x16a5   : > { %v6034_v15 = vpop.f32.mrb[58].mxu1  ;;  %v9768_v21 = vpop.f32.mrb[60].mxu0 }
0x16a6   : > { %v7933_v22 = vpop.f32.mrb[59].mxu1  ;;  %v7938_v24 = vpop.f32.mrb[61].mxu0  ;;  %v6092_v53 = vsel %vm1589_vm3, %v9768_v21, -inf }
0x16a7   : > { %v6080_v25 = vpop.f32.mrb[62].mxu0 }
0x16a8   : > { %v7939_v37 = vpop.f32.mrb[63].mxu0 }
0x16ca   : > { %6131 = vxpose.xlu1.c.b16.start.end [1/1] (short) (narrow) %v5411_v41, 16 }
0x16cc   : > { %6147 = vxpose.xlu0.c.b16.start.end [1/1] (short) (narrow) %v5412_v42, 16 }
0x16d7   : > { %6090 = vmax.xlane.f32.xlu1 %v6089_v43 }
0x16d9   : > { %6093 = vmax.xlane.f32.xlu0 %v6092_v53 }
0x1704   : > { %6179 = vxpose.xlu1.c.b16.start.end [1/1] (short) (narrow) %v5414_v47, 16 }
0x1706   : > { %6163 = vxpose.xlu0.c.b16.start.end [1/1] (short) (narrow) %v5413_v19, 16 }
0x1708   : > { %6211 = vxpose.xlu1.c.b16.start.end [1/1] (short) (narrow) %v5416_v54, 16 }
0x170a   : > { %6195 = vxpose.xlu0.c.b16.start.end [1/1] (short) (narrow) %v5415_v56, 16 }
0x170c   : > { %6243 = vxpose.xlu1.c.b16.start.end [1/1] (short) (narrow) %v5418_v58, 16 }
0x170e   : > { %6227 = vxpose.xlu0.c.b16.start.end [1/1] (short) (narrow) %v5417_v13, 16 }
0x172a   : > { %v6085_v7 = vpop.xlane.xlu1 %6084 }
0x172b   : > { %v6095_v27 = vsub.f32 %v9758_v1, %v6085_v7 }
0x172c   : > { %v6088_v59 = vpop.xlane.xlu0 %6087 }
0x172d   : > { %v6096_v36 = vsub.f32 %v9762_v4, %v6088_v59  ;;  %v6099_v43 = vmul.f32 1.442695, %v6095_v27 }
0x172f   : > { %v6101_v49 = vmul.f32 1.442695, %v6096_v36  ;;  %8232 = vpow2.f32 %v6099_v43 }
0x1730   : > { %v6139_v60 = vpop.trf.xlu1 }
0x1731   : > { %8234 = vpow2.f32 %v6101_v49 }
0x1732   : > { %v6155_v17 = vpop.trf.xlu0 }
0x1739   : > { %v8233_v19 = vpop.eup %8232 }
0x173a   : > { %v6107_v54 = vsel %vm1589_vm3, %v8233_v19, 0.0 }
0x1764   : > { %v6091_v51 = vpop.xlane.xlu1 %6090 }
0x1765   : > { %v6097_v53 = vsub.f32 %v9766_v18, %v6091_v51  ;;  %v8235_v18 = vpop.eup %8234 }
0x1766   : > { %v6094_v44 = vpop.xlane.xlu0 %6093 }
0x1767   : > { %v6098_v1 = vsub.f32 %v9768_v21, %v6094_v44  ;;  %v6103_v28 = vmul.f32 1.442695, %v6097_v53  ;;  %v6110_v21 = vsel %vm1589_vm3, %v8235_v18, 0.0 }
0x1769   : > { %v6105_v52 = vmul.f32 1.442695, %v6098_v1  ;;  %8236 = vpow2.f32 %v6103_v28 }
0x176a   : > { %v6187_v10 = vpop.trf.xlu1 }
0x176b   : > { %8238 = vpow2.f32 %v6105_v52 }
0x176c   : > { %v6171_v30 = vpop.trf.xlu0 }
0x176e   : > { %v6219_v61 = vpop.trf.xlu1 }
0x176f   : > { %v6293_v34 = vcombine.low %v6155_v17, %v6219_v61 }
0x1770   : > { %v6203_v62 = vpop.trf.xlu0 }
0x1771   : > { %v6259_v48 = vcombine.low %v6139_v60, %v6203_v62  ;;  %v6300_v63 = vrot.slane %v6293_v34, %v9191_v0 }
0x1772   : > { %v6251_v20 = vpop.trf.xlu1 }
0x1773   : > { %v6301_v46 = vcombine.low %v6187_v10, %v6251_v20  ;;  %v6266_v5 = vrot.slane %v6259_v48, %v9191_v0  ;;  %v8237_v55 = vpop.eup %8236 }
0x1774   : > { %v6235_v23 = vpop.trf.xlu0  ;;  %v6113_v58 = vsel %vm1589_vm3, %v8237_v55, 0.0 }
0x1775   : > { %v6308_v2 = vrot.slane %v6301_v46, %v9191_v0  ;;  %v6267_v3 = vcombine.low %v6171_v30, %v6235_v23  ;;  %v8239_v56 = vpop.eup %8238 }
0x1776   : > { %v6116_v13 = vsel %vm1589_vm3, %v8239_v56, 0.0 }
0x1777   : > { %v6309_v8 = vcombine.low %v6300_v63, %v6308_v2  ;;  %v6274_v29 = vrot.slane %v6267_v3, %v9191_v0  ;;  %v6310_v15 = vcombine.high %v6300_v63, %v6308_v2 }
0x1779   : > { %v6317_v9 = vrot.slane %v6309_v8, %v9193_v6  ;;  %v6275_v32 = vcombine.low %v6266_v5, %v6274_v29  ;;  %v6276_v11 = vcombine.high %v6266_v5, %v6274_v29  ;;  %v6324_v40 = vrot.slane %v6310_v15, %v9193_v6 }
0x177b   : > { %v6283_v14 = vrot.slane %v6275_v32, %v9193_v6  ;;  %v6332_v22 = vshrl.u32 %v6317_v9, 16  ;;  %v6325_v26 = vcombine.high %v6317_v9, %v8681_v12  ;;  %v6290_v31 = vrot.slane %v6276_v11, %v9193_v6 }
0x177c   : > { %v6348_v47 = vshrl.u32 %v6324_v40, 16  ;;  %v6326_v59 = vcombine.high %v6324_v40, %v8681_v12 }
0x177d   : > { %v6329_v24 = vpack.i.b16 %v6317_v9, %v6283_v14  ;;  %v6331_v25 = vshrl.u32 %v6283_v14, 16  ;;  %v6291_v37 = vcombine.high %v6283_v14, %v8681_v12  ;;  %v6340_v42 = vshrl.u32 %v6325_v26, 16 }
0x177e   : > { %v6347_v39 = vshrl.u32 %v6290_v31, 16  ;;  %v6345_v50 = vpack.i.b16 %v6324_v40, %v6290_v31  ;;  %v6292_v7 = vcombine.high %v6290_v31, %v8681_v12  ;;  %v6356_v51 = vshrl.u32 %v6326_v59, 16 }
0x177f   : > { %6359 = vxpose.xlu0.c.b16.start.end [1/1] (short) (narrow) %v6329_v24, 16  ;;  %v6333_v33 = vpack.i.b16 %v6332_v22, %v6331_v25  ;;  %v6339_v35 = vshrl.u32 %v6291_v37, 16  ;;  %v6337_v41 = vpack.i.b16 %v6325_v26, %v6291_v37 }
0x1780   : > { %v6349_v4 = vpack.i.b16 %v6348_v47, %v6347_v39  ;;  %v6355_v60 = vshrl.u32 %v6292_v7, 16  ;;  %v6353_v17 = vpack.i.b16 %v6326_v59, %v6292_v7 }
0x1781   : > { %6375 = vxpose.xlu1.c.b16.start.end [1/1] (short) (narrow) %v6333_v33, 16  ;;  %v6341_v45 = vpack.i.b16 %v6340_v42, %v6339_v35 }
0x1782   : > { %v6357_v44 = vpack.i.b16 %v6356_v51, %v6355_v60 }
0x1783   : > { %6391 = vxpose.xlu0.c.b16.start.end [1/1] (short) (narrow) %v6337_v41, 16 }
0x1785   : > { %6407 = vxpose.xlu1.c.b16.start.end [1/1] (short) (narrow) %v6341_v45, 16 }
0x1787   : > { %6423 = vxpose.xlu0.c.b16.start.end [1/1] (short) (narrow) %v6345_v50, 16 }
0x1789   : > { %6439 = vxpose.xlu1.c.b16.start.end [1/1] (short) (narrow) %v6349_v4, 16 }
0x1794   : > { %6108 = vadd.xlane.f32.xlu0 %v6107_v54 }
0x1796   : > { %6111 = vadd.xlane.f32.xlu1 %v6110_v21 }
0x1798   : > { %6114 = vadd.xlane.f32.xlu0 %v6113_v58 }
0x179a   : > { %6117 = vadd.xlane.f32.xlu1 %v6116_v13 }
0x17c5   : > { %6455 = vxpose.xlu0.c.b16.start.end [1/1] (short) (narrow) %v6353_v17, 16 }
0x17c7   : > { %6471 = vxpose.xlu1.c.b16.start.end [1/1] (short) (narrow) %v6357_v44, 16 }
0x17e5   : > { %v6367_v10 = vpop.trf.xlu0 }
0x17e7   : > { %v6383_v30 = vpop.trf.xlu1 }
0x17e9   : > { %v6399_v61 = vpop.trf.xlu0 }
0x17eb   : > { %v6415_v62 = vpop.trf.xlu1 }
0x17ed   : > { %v6431_v34 = vpop.trf.xlu0 }
0x17ee   : > { %v6487_v2 = vcombine.low %v6367_v10, %v6431_v34 }
0x17ef   : > { %v6447_v20 = vpop.trf.xlu1 }
0x17f0   : > { %v6512_v8 = vcombine.low %v6383_v30, %v6447_v20  ;;  %v6494_v14 = vrot.slane %v6487_v2, %v9191_v0 }
0x17f2   : > { %v6519_v26 = vrot.slane %v6512_v8, %v9191_v0 }
0x1821   : > { %v6109_v48 = vpop.xlane.xlu0 %6108 }
0x1822   : > { %8240 = vrcp.f32 %v6109_v48 }
0x1823   : > { %v6112_v46 = vpop.xlane.xlu1 %6111 }
0x1824   : > { %8242 = vrcp.f32 %v6112_v46 }
0x1825   : > { %v6115_v23 = vpop.xlane.xlu0 %6114 }
0x1826   : > { %8244 = vrcp.f32 %v6115_v23 }
0x1827   : > { %v6118_v63 = vpop.xlane.xlu1 %6117 }
0x1828   : > { %8246 = vrcp.f32 %v6118_v63 }
0x182b   : > { %v6463_v3 = vpop.trf.xlu0 }
0x182c   : > { %v8241_v5 = vpop.eup %8240  ;;  %v6495_v29 = vcombine.low %v6399_v61, %v6463_v3 }
0x182d   : > { %v6479_v9 = vpop.trf.xlu1  ;;  %v6123_v32 = vmul.f32 %v8241_v5, %v8233_v19 }
0x182e   : > { %v8243_v11 = vpop.eup %8242  ;;  %v6502_v15 = vrot.slane %v6495_v29, %v9191_v0  ;;  %v6520_v22 = vcombine.low %v6415_v62, %v6479_v9 }
0x182f   : > { %v6127_v24 = vpack.c.bf16 %v6123_v32, %v6123_v32  ;;  %v6124_v25 = vmul.f32 %v8243_v11, %v8235_v18 }
0x1830   : > { %v8245_v37 = vpop.eup %8244  ;;  %v6503_v27 = vcombine.low %v6494_v14, %v6502_v15  ;;  %v6527_v31 = vrot.slane %v6520_v22, %v9191_v0 }
0x1831   : > { %v6553_v33 = vsel %vm1589_vm3, %v6127_v24, 0  ;;  %v6128_v35 = vpack.c.bf16 %v6124_v25, %v6124_v25  ;;  %v6125_v36 = vmul.f32 %v8245_v37, %v8237_v55  ;;  %v8178_v37 = vld [vmem:[#allocation10 + $0xb0] sm:$0xff]  }
0x1832   : > { %v8247_v40 = vpop.eup %8246  ;;  %v6510_v41 = vrot.slane %v6503_v27, %v9193_v6  ;;  %v6528_v42 = vcombine.low %v6519_v26, %v6527_v31  ;;  %7941 = vmatpush3.bf16.xpose.msra.mxu1 %v6553_v33 }
0x1833   : > { %v6599_v43 = vsel %vm1589_vm3, %v6128_v35, 0  ;;  %7952 = vmatprep.subr.bf16.mxu1 %v8674_v16  ;;  %v6126_v53 = vmul.f32 %v8247_v40, %v8239_v56  ;;  %v6129_v39 = vpack.c.bf16 %v6125_v36, %v6125_v36 }
0x1834   : > { %v6535_v45 = vrot.slane %v6528_v42, %v9193_v6  ;;  %7947 = vmatpush3.bf16.xpose.msra.mxu0 %v6599_v43  ;;  %v6540_v49 = vshrl.u32 %v6510_v41, 16  ;;  %v6511_v19 = vcombine.high %v6510_v41, %v8681_v12  ;;  %v8179_v42 = vld [vmem:[#allocation10 + $0xb8] sm:$0xff]  }
0x1835   : > { %7958 = vmatprep.subr.bf16.mxu0 %v8674_v16  ;;  %v6130_v47 = vpack.c.bf16 %v6126_v53, %v6126_v53  ;;  %v6645_v52 = vsel %vm1589_vm3, %v6129_v39, 0 }
0x1836   : > { %v6539_v1 = vpack.i.b16 %v6535_v45, %v6510_v41  ;;  %v6541_v50 = vshrl.u32 %v6535_v45, 16  ;;  %v6536_v4 = vcombine.high %v6535_v45, %v8681_v12  ;;  %v6546_v55 = vshrl.u32 %v6511_v19, 16 }
0x1837   : > { %v6691_v18 = vsel %vm1589_vm3, %v6130_v47, 0 }
0x1838   : > { %v6542_v28 = vpack.i.b16 %v6541_v50, %v6540_v49  ;;  %v6547_v54 = vshrl.u32 %v6536_v4, 16  ;;  %v6545_v21 = vpack.i.b16 %v6536_v4, %v6511_v19 }
0x1839   : > { %7943 = vmatmul.mubr.msk.bf16.vlgmr.msra.gmra.mrb[60].mxu1 %vm1589_vm3, %v6539_v1 }
0x183a   : > { %7953 = vmatpush3.bf16.xpose.msra.mxu1 %v6645_v52  ;;  %7954 = vmatprep.mubr.msk.bf16.mxu1 %vm8675_vm1, %v8674_v16  ;;  %v6548_v56 = vpack.i.b16 %v6547_v54, %v6546_v55 }
0x183b   : > { %7949 = vmatmul.mubr.msk.bf16.vlgmr.msra.gmra.mrb[64].mxu0 %vm1589_vm3, %v6542_v28  ;;  %7964 = vmatprep.subr.bf16.mxu1 %v8674_v16 }
0x183c   : > { %7959 = vmatpush3.bf16.xpose.msra.mxu0 %v6691_v18  ;;  %7960 = vmatprep.mubr.msk.bf16.mxu0 %vm8675_vm1, %v8674_v16 }
0x183d   : > { %7972 = vmatprep.subr.bf16.mxu0 %v8674_v16 }
0x1841   : > { %7955 = vmatmul.mubr.msk.bf16.vlgmr.msra.gmra.mrb[64].mxu1 %vm1589_vm3, %v6545_v21 }
0x1842   : > { %7968 = vmatprep.mubr.msk.bf16.mxu1 %vm8675_vm1, %v8674_v16  ;;  %7965 = vmatpush3.bf16.msra.mxu1 %v8178_v37  ;;  %v7617_v37 = vld [vmem:[#allocation13 + $0x1] ss:$0 sm:$0xff] }
0x1843   : > { %7961 = vmatmul.mubr.msk.bf16.vlgmr.msra.gmra.mrb[68].mxu0 %vm1589_vm3, %v6548_v56  ;;  %7966 = vmatprep.subr.bf16.mxu1 %v8674_v16 }
0x1844   : > { %7984 = vmatprep.mubr.msk.bf16.mxu0 %vm8675_vm1, %v8674_v16 }
0x1846   : > { %7967 = vmatpush3.bf16.msra.mxu1 %v8179_v42 }
0x1847   : > { %7988 = vmatprep.subr.bf16.mxu1 %v8674_v16 }
0x190c   : > { %v6589_v12 = vpop.f32.mrb[60].mxu1 }
0x190d   : > { %6733 = vxpose.xlu0.b32.start.end [1/1] (short) (narrow) %v6589_v12, 8  ;;  %v7944_v58 = vpop.f32.mrb[61].mxu1 }
0x190e   : > { %v6592_v13 = vpop.f32.mrb[62].mxu1  ;;  %v6635_v7 = vpop.f32.mrb[64].mxu0 }
0x190f   : > { %6765 = vxpose.xlu1.b32.start.end [1/1] (short) (narrow) %v6635_v7, 8  ;;  %v7945_v59 = vpop.f32.mrb[63].mxu1  ;;  %v7950_v60 = vpop.f32.mrb[65].mxu0 }
0x1910   : > { %v6638_v17 = vpop.f32.mrb[66].mxu0  ;;  %v7612_v59 = vld [vmem:[#allocation11 + $0x2] ss:$0 sm:$0xff] }
0x1911   : > { %v7951_v51 = vpop.f32.mrb[67].mxu0 }
0x1914   : > { %v6681_v44 = vpop.f32.mrb[64].mxu1 }
0x1915   : > { %6797 = vxpose.xlu0.b32.start.end [1/1] (short) (narrow) %v6681_v44, 8  ;;  %v7956_v10 = vpop.f32.mrb[65].mxu1  ;;  %v8254_v44 = vld [vmem:[%s502_s7] sm:$0xff] }
0x1916   : > { %v6684_v30 = vpop.f32.mrb[66].mxu1  ;;  %v6727_v61 = vpop.f32.mrb[68].mxu0 }
0x1917   : > { %v7957_v62 = vpop.f32.mrb[67].mxu1  ;;  %v7962_v34 = vpop.f32.mrb[69].mxu0 }
0x1918   : > { %v6730_v20 = vpop.f32.mrb[70].mxu0 }
0x1919   : > { %v7963_v48 = vpop.f32.mrb[71].mxu0  ;;  %6829 = vxpose.xlu0.b32.start.end [1/1] (short) (narrow) %v6727_v61, 8 }
0x198d   : > { %v6749_v46 = vpop.trf.xlu0 }
0x198f   : > { %v6781_v63 = vpop.trf.xlu1 }
0x1995   : > { %v6813_v23 = vpop.trf.xlu0 }
0x1996   : > { %v6861_v2 = vcombine.low %v6749_v46, %v6813_v23  ;;  %v6862_v3 = vcombine.high %v6749_v46, %v6813_v23 }
0x1998   : > { %v6869_v9 = vrot.slane %v6861_v2, %v9191_v0  ;;  %v6876_v32 = vrot.slane %v6862_v3, %v9191_v0 }
0x1999   : > { %v6845_v5 = vpop.trf.xlu0 }
0x199a   : > { %v6877_v8 = vcombine.low %v6781_v63, %v6845_v5  ;;  %v6878_v29 = vcombine.high %v6781_v63, %v6845_v5  ;;  %v8180_v5 = vld [vmem:[#allocation14] sm:$0xff]  }
0x199b   : > { %7973 = vmatpush3.bf16.msra.mxu0 %v8180_v5 }
0x199c   : > { %v6885_v11 = vrot.slane %v6877_v8, %v9191_v0  ;;  %v6892_v14 = vrot.slane %v6878_v29, %v9191_v0  ;;  %7974 = vmatprep.subr.bf16.mxu0 %v8674_v16  ;;  %v8182_v8 = vld [vmem:[#allocation14 + $0x10] sm:$0xff]   ;;  %v8183_v29 = vld [vmem:[#allocation14 + $0x18] sm:$0xff]  }
0x199e   : > { %v6893_v15 = vcombine.low %v6869_v9, %v6885_v11  ;;  %v6894_v22 = vcombine.high %v6869_v9, %v6885_v11  ;;  %v6909_v24 = vcombine.low %v6876_v32, %v6892_v14  ;;  %v6910_v25 = vcombine.high %v6876_v32, %v6892_v14  ;;  %v8184_v9 = vld [vmem:[#allocation14 + $0x20] sm:$0xff]   ;;  %v8185_v32 = vld [vmem:[#allocation14 + $0x28] sm:$0xff]  }
0x19a0   : > { %v6901_v26 = vrot.slane %v6893_v15, %v9193_v6  ;;  %v6908_v27 = vrot.slane %v6894_v22, %v9193_v6  ;;  %v6917_v31 = vrot.slane %v6909_v24, %v9193_v6  ;;  %v6924_v33 = vrot.slane %v6910_v25, %v9193_v6  ;;  %v7616_v24 = vld [vmem:[#allocation13] ss:$0 sm:$0xff] }
0x19a2   : > { %v6929_v35 = vcombine.low %v6901_v26, %v6908_v27  ;;  %v7610_v36 = vcombine.high %v6901_v26, %v6908_v27  ;;  %v6945_v40 = vcombine.low %v6917_v31, %v6924_v33  ;;  %v7611_v41 = vcombine.high %v6917_v31, %v6924_v33  ;;  %v8186_v33 = vld [vmem:[#allocation17] sm:$0xff]  }
0x19a4   : > { %v6936_v43 = vrot.slane %v6929_v35, %v9191_v0  ;;  %v6944_v53 = vrot.slane %v7610_v36, %v9191_v0  ;;  %v6952_v45 = vrot.slane %v6945_v40, %v9191_v0  ;;  %v6960_v39 = vrot.slane %v7611_v41, %v9191_v0  ;;  %v8187_v35 = vld [vmem:[#allocation17 + $0x8] sm:$0xff]   ;;  %v8188_v36 = vld [vmem:[#allocation17 + $0x10] sm:$0xff]   ;;  %v8189_v40 = vld [vmem:[#allocation17 + $0x18] sm:$0xff]  }
0x19a5   : > { %v7618_v41 = vld [vmem:[#allocation16] ss:$0 sm:$0xff] }
0x19a6   : > { %v6962_v49 = vcombine.high %v6936_v43, %v6944_v53  ;;  %v6978_v1 = vcombine.high %v6952_v45, %v6960_v39  ;;  %v6961_v50 = vcombine.low %v6936_v43, %v6944_v53  ;;  %v6977_v47 = vcombine.low %v6952_v45, %v6960_v39 }
0x19a8   : > { %v6976_v28 = vrot.slane %v6962_v49, %v9193_v6  ;;  %v6992_v4 = vrot.slane %v6978_v1, %v9193_v6  ;;  %v6969_v52 = vrot.slane %v6961_v50, %v9193_v6  ;;  %v6985_v19 = vrot.slane %v6977_v47, %v9193_v6 }
0x19aa   : > { %v6995_v18 = vcombine.low %v6976_v28, %v6992_v4  ;;  %v6994_v54 = vcombine.high %v6969_v52, %v6985_v19  ;;  %v6993_v55 = vcombine.low %v6969_v52, %v6985_v19  ;;  %v6996_v0 = vcombine.high %v6976_v28, %v6992_v4 }
0x19ac   : > { %7002 = vrot.lane.b32.xlu0 %v6995_v18, %s8682_s17  ;;  %6998 = vrot.lane.b32.xlu1 %v6994_v54, %s8683_s1 }
0x19b0   : > { %7006 = vrot.lane.b32.xlu1 %v6996_v0, %s8684_s3 }
0x19b4   : > { %7076 = vrot.lane.b32.xlu1 %v9650_v57, %s8685_s25 }
0x1a1e   : > { %v6999_v21 = vpop.permute.xlu1 %6998  ;;  %v7003_v56 = vpop.permute.xlu0 %7002 }
0x1a1f   : > { %v7009_v12 = vsel %vm1589_vm3, %v6993_v55, %v6999_v21 }
0x1a20   : > { %v7010_v6 = vsel %vm2702_vm4, %v7009_v12, %v7003_v56 }
0x1a22   : > { %v7007_v58 = vpop.permute.xlu1 %7006 }
0x1a23   : > { %v7011_v13 = vsel %vm2704_vm5, %v7010_v6, %v7007_v58 }
0x1a24   : > { %v7012_v7 = vpack.c.bf16 %v7011_v13, %v7011_v13 }
0x1a26   : > { %7969 = vmatmul.mubr.msk.bf16.vlgmr.msra.gmra.mrb[68].mxu1 %vm588_vm0, %v7012_v7  ;;  %v7077_v61 = vpop.permute.xlu1 %7076 }
0x1a27   : > { %7996 = vmatprep.mubr.msk.bf16.mxu1 %vm8675_vm1, %v8674_v16  ;;  %v7083_v62 = vsel %vm588_vm0, %v9413_v38, %v7077_v61  ;;  %v8181_v38 = vld [vmem:[#allocation14 + $0x8] sm:$0xff]   ;;  %7989 = vmatpush3.bf16.msra.mxu1 %v8186_v33 }
0x1a28   : > { %7975 = vmatpush3.bf16.msra.mxu0 %v8181_v38  ;;  %7990 = vmatprep.subr.bf16.mxu1 %v8674_v16 }
0x1a29   : > { %7976 = vmatprep.subr.bf16.mxu0 %v8674_v16 }
0x1a2b   : > { %7991 = vmatpush3.bf16.msra.mxu1 %v8187_v35 }
0x1a2c   : > { %7977 = vmatpush3.bf16.msra.mxu0 %v8182_v8  ;;  %7992 = vmatprep.subr.bf16.mxu1 %v8674_v16 }
0x1a2d   : > { %7978 = vmatprep.subr.bf16.mxu0 %v8674_v16 }
0x1a2f   : > { %7993 = vmatpush3.bf16.msra.mxu1 %v8188_v36 }
0x1a30   : > { %7979 = vmatpush3.bf16.msra.mxu0 %v8183_v29  ;;  %7994 = vmatprep.subr.bf16.mxu1 %v8674_v16 }
0x1a31   : > { %7980 = vmatprep.subr.bf16.mxu0 %v8674_v16 }
0x1a33   : > { %7995 = vmatpush3.bf16.msra.mxu1 %v8189_v40 }
0x1a34   : > { %7981 = vmatpush3.bf16.msra.mxu0 %v8184_v9 }
0x1a35   : > { %7982 = vmatprep.subr.bf16.mxu0 %v8674_v16  ;;  %v7626_v16 = vld [vmem:[#allocation19] ss:$0 sm:$0xff] }
0x1a38   : > { %7983 = vmatpush3.bf16.msra.mxu0 %v8185_v32 }
0x1af9   : > { %v7068_v60 = vpop.f32.mrb[68].mxu1 }
0x1afa   : > { %v7069_v17 = vadd.f32 %v7612_v59, %v7068_v60  ;;  %v7970_v51 = vpop.f32.mrb[69].mxu1 }
0x1afb   : > { %v7071_v57 = vpop.f32.mrb[70].mxu1 }
0x1afc   : > { %v7074_v10 = vadd.f32 %v8254_v44, %v7069_v17  ;;  %v7971_v30 = vpop.f32.mrb[71].mxu1 }
0x1afe   : > { %7080 = vrot.lane.b32.xlu1 %v7074_v10, %s8686_s28 }
0x1b70   : > { %v7081_v34 = vpop.permute.xlu1 %7080 }
0x1b71   : > { %v9867_v20 = vsel %vm7084_vm6, %v7083_v62, %v7081_v34 }
0x1b72   : > { %v7089_v48 = vsel %vm7088_vm7, %v9867_v20, 0.0 }
0x1b73   : > { %7090 = vadd.xlane.f32.xlu0 %v7089_v48 }
0x1c00   : > { %v7091_v46 = vpop.xlane.xlu0 %7090 }
0x1c01   : > { %v7093_v23 = vmul.f32 0.010416667, %v7091_v46 }
0x1c03   : > { %v7094_v63 = vsub.f32 %v9867_v20, %v7093_v23 }
0x1c05   : > { %v7095_v2 = vmul.f32 %v7094_v63, %v7094_v63 }
0x1c07   : > { %v7096_v3 = vsel %vm7088_vm7, %v7095_v2, 0.0 }
0x1c08   : > { %7097 = vadd.xlane.f32.xlu1 %v7096_v3 }
0x1c95   : > { %v7098_v11 = vpop.xlane.xlu1 %7097 }
0x1c96   : > { %v7099_v14 = vmul.f32 0.010416667, %v7098_v11 }
0x1c98   : > { %v7100_v15 = vadd.f32 1e-05, %v7099_v14 }
0x1c9a   : > { %8248 = vrsqrt.f32 %v7100_v15 }
0x1ca4   : > { %v8249_v22 = vpop.eup %8248 }
0x1ca5   : > { %v7102_v25 = vmul.f32 %v8249_v22, %v7094_v63 }
0x1ca7   : > { %v7107_v26 = vmul.f32 %v7616_v24, %v7102_v25 }
0x1ca9   : > { %v7112_v27 = vadd.f32 %v7617_v37, %v7107_v26 }
0x1cab   : > { %v7113_v31 = vpack.c.bf16 %v7112_v27, %v7112_v27 }
0x1cad   : > { %7985 = vmatmul.mubr.msk.bf16.vlgmr.msra.gmra.mrb[72].mxu0 %vm7088_vm7, %v7113_v31 }
0x1d80   : > { %v7206_v42 = vpop.f32.mrb[72].mxu0 }
0x1d81   : > { %v7207_v43 = vadd.f32 %v7618_v41, %v7206_v42  ;;  %v7986_v53 = vpop.f32.mrb[73].mxu0 }
0x1d82   : > { %v7209_v45 = vpop.f32.mrb[74].mxu0 }
0x1d83   : > { %v7213_v39 = vmul.f32 0.70710677, %v7207_v43  ;;  %v7987_v49 = vpop.f32.mrb[75].mxu0  ;;  %v7212_v50 = vmul.f32 0.5, %v7207_v43 }
0x1d85   : > { %8250 = verf.f32 %v7213_v39 }
0x1d8f   : > { %v8251_v1 = vpop.eup %8250 }
0x1d90   : > { %v7215_v47 = vadd.f32 1.0, %v8251_v1 }
0x1d92   : > { %v7216_v28 = vmul.f32 %v7215_v47, %v7212_v50 }
0x1d94   : > { %v7217_v4 = vpack.c.bf16 %v7216_v28, %v7216_v28 }
0x1d96   : > { %7997 = vmatmul.mubr.msk.bf16.vlgmr.msra.gmra.mrb[72].mxu1 %vm7084_vm6, %v7217_v4 }
0x1e69   : > { %v7294_v52 = vpop.f32.mrb[72].mxu1 }
0x1e6a   : > { %v7295_v19 = vadd.f32 %v7626_v16, %v7294_v52  ;;  %v7998_v18 = vpop.f32.mrb[73].mxu1 }
0x1e6b   : > { %v7297_v54 = vpop.f32.mrb[74].mxu1 }
0x1e6c   : > { %v7300_v55 = vadd.f32 %v7295_v19, %v9867_v20  ;;  %v7999_v0 = vpop.f32.mrb[75].mxu1 }
0x1e6e   : > { %7301 = vst.msk [vmem:[%s582_s24] sm:$0xff] %vm7088_vm7, %v7300_v55 }
0x1e6f   : > { %8582 = shalt.err (!%p8579_p3)
}
0x1e70   : > { %s8583_s16 = scalar_lea.hbm %s9889_s5, 128  ;;  %s8587_s27 = scalar_lea.hbm %s10021_s15, 256 }
0x1e71   : > { %p8584_p12 = scmp.ne.s32.totalorder %s9889_s5, %s8583_s16  ;;  %p8588_p6 = scmp.lt.u32.totalorder %s9889_s5, %s10021_s15 }
0x1e72   : > { %p8589_p8 = scmp.lt.u32.totalorder %s8587_s27, %s8583_s16  ;;  %p8591_p2 = scmp.lt.u32.totalorder %s8583_s16, %s9889_s5 }
0x1e73   : > { %p8585_p0 = pnand %p8584_p12, %p10022_p10 }
0x1e74   : > { %p8590_p4 = por %p8589_p8, %p8588_p6 }
0x1e75   : > { %p8586_p5 = pneg %p8585_p0 }
0x1e76   : > { %p8592_p7 = por %p8591_p2, %p8590_p4 }
0x1e78   : > { %p8593_p9 = pnand %p8592_p7, %p8586_p5 }
0x1e7a   : > { %8596 = shalt.err (!%p8593_p9)
}
0x1e7b   : > { %8038 = dma.vmem_to_hbm [thread:$0]  (%p10022_p10), %s9891_s13, 128, %s9889_s5, %s7303_s21  }
0x1e7c PF: > { %s10023_s1 = sld [smem:[#allocation28_spill]]  ;;  %s10024_s3 = sld [smem:[#allocation35_spill]] }
0x1e7d   : > { %s10025_s25 = sld [smem:[#allocation29_spill]] }
0x1e82   : > { %s7328_s28 = sand.u32 1, %s10023_s1   ;;  %p10026_p13 = scmp.ne.s32.totalorder %s10024_s3, 0 }
0x1e83   : > { %p10027_p1 = scmp.ge.s32.totalorder %s10025_s25, 2  ;;  %s7329_s12 = scalar_lea.sflag [#allocation4], %s7328_s28 }
0x1e85   : > { %p8076_p11 = pnand %p10027_p1, %p10026_p13 }
0x1e87   : > { %8638 = dma.done.wait (!%p8076_p11), %s7329_s12, 128  }
0x1e88   : > { %8640 = vsyncadd (!%p8076_p11), %s7329_s12, 4294967168  ;;  %s10028_s20 = sld [smem:[#allocation32_spill]]  ;;  %s10029_s24 = sld [smem:[#allocation33_spill]] }
0x1e89   : > { %s10030_s17 = smov %s8647_s18  ;;  %s10031_s18 = smov %s8651_s19 }
0x1e8e   : > { %p31_p3 = scmp.ge.s32.totalorder %s10028_s20, 4   ;;  %s10032_s19 = smov %s10029_s24 }
0x1e90   :  { %33 = sbr.rel (!%p31_p3) target bundleno = 18 (0x12), region = 186 }
0x1e97   :  { %7334 = vsyncpa [#allocation3], 1 }
0x1e98   :  { %7336 = vsyncpa [#allocation3 + $0x1], 1 }
0x1e99   :  { %7337 = vsyncpa [#allocation6], 1 }
0x1e9a   :  { %7339 = vsyncpa [#allocation6 + $0x1], 1 }
0x1e9b   :  { %7340 = vsyncpa [#allocation9], 1 }
0x1e9c   :  { %7341 = vsyncpa [#allocation12], 1 }
0x1e9d   :  { %7342 = vsyncpa [#allocation15], 1 }
0x1e9e   :  { %7343 = vsyncpa [#allocation18], 1 }
0x1e9f   :  { %7344 = vsyncpa [#allocation4], 1 }
0x1ea0   :  { %7346 = vsyncpa [#allocation4 + $0x1], 1 }

</bundles_post_ra>
